<compile_context>
chip_gen: v5e
topology: v5e:2x2
jax: 0.10.0
libtpu: 0.0.40
codegen_flags: <defaults>
</compile_context>

<pallas_src>
import functools

import jax
import jax.numpy as jnp
from jax import lax
from jax.experimental import pallas as pl
from jax.experimental.pallas import tpu as pltpu


def _round_up(x, m):
    return ((x + m - 1) // m) * m


# ----------------------------------------------------------------------------
# Pallas kernels
# ----------------------------------------------------------------------------
def _matmul_bias_act_kernel(a_ref, w_ref, b_ref, o_ref, *, relu):
    """out = act(A @ W + b).  A:[TM,K], W:[K,Np], b:[1,Np]  (all f32)."""
    acc = jnp.dot(a_ref[...], w_ref[...], preferred_element_type=jnp.float32)
    acc = acc + b_ref[...]
    if relu:
        acc = jnp.maximum(acc, 0.0)
    o_ref[...] = acc


def _fc_head_kernel(a_ref, w1_ref, b1_ref, w2_ref, b2_ref, o_ref):
    """Fused fc1(+ReLU)+fc2: out = relu(A @ W1 + b1) @ W2 + b2."""
    h = jnp.dot(a_ref[...], w1_ref[...], preferred_element_type=jnp.float32)
    h = jnp.maximum(h + b1_ref[...], 0.0)
    o_ref[...] = jnp.dot(h, w2_ref[...], preferred_element_type=jnp.float32) + b2_ref[...]


def _maxpool2x2_kernel(x_ref, o_ref):
    """2x2/2 max pool on channels-last, lane-padded data.

    x: [TR, 2, OW2, 256] where axis 1 is the height pair and the 256 lanes are
    (width-pair j, 128 padded channels).  Output: [TR, OW2, 128] (lane dense).
    """
    x = x_ref[...]
    m = jnp.maximum(x[:, 0], x[:, 1])                # height pair  -> [TR, OW2, 256]
    o_ref[...] = jnp.maximum(m[..., :128], m[..., 128:])   # width pair -> [TR, OW2, 128]


# ----------------------------------------------------------------------------
# Pallas wrappers
# ----------------------------------------------------------------------------
def matmul_bias_act(a, w_p, b_p, *, relu):
    """a:[M,K] (unpadded K) @ w_p:[K,Np] + b_p:[1,Np], optional ReLU.

    M is tiled with a pipelined, parallel grid; K uses a full-array block so no
    host-side K padding is needed; Np is already a multiple of 128 (lane dense).
    """
    a = a.astype(jnp.float32)
    M, K = a.shape
    Np = w_p.shape[1]

    TM = min(512, _round_up(M, 8))
    Mp = _round_up(M, TM)
    if Mp != M:
        a = jnp.pad(a, ((0, Mp - M), (0, 0)))

    out = pl.pallas_call(
        functools.partial(_matmul_bias_act_kernel, relu=relu),
        out_shape=jax.ShapeDtypeStruct((Mp, Np), jnp.float32),
        grid=(Mp // TM,),
        in_specs=[
            pl.BlockSpec((TM, K), lambda i: (i, 0)),
            pl.BlockSpec((K, Np), lambda i: (0, 0)),
            pl.BlockSpec((1, Np), lambda i: (0, 0)),
        ],
        out_specs=pl.BlockSpec((TM, Np), lambda i: (i, 0)),
        compiler_params=pltpu.CompilerParams(dimension_semantics=("parallel",)),
    )(a, w_p, b_p)
    return out[:M]


def fc_head(a, w1_p, b1_p, w2_p, b2_p):
    """Fused fc1(+ReLU)+fc2 in one pallas_call.  a:[B,1250] -> [B,128]."""
    a = a.astype(jnp.float32)
    M, K = a.shape
    N1p = w1_p.shape[1]   # 384
    N2p = w2_p.shape[1]   # 128

    TM = min(256, _round_up(M, 8))
    Mp = _round_up(M, TM)
    if Mp != M:
        a = jnp.pad(a, ((0, Mp - M), (0, 0)))

    out = pl.pallas_call(
        _fc_head_kernel,
        out_shape=jax.ShapeDtypeStruct((Mp, N2p), jnp.float32),
        grid=(Mp // TM,),
        in_specs=[
            pl.BlockSpec((TM, K), lambda i: (i, 0)),
            pl.BlockSpec((K, N1p), lambda i: (0, 0)),
            pl.BlockSpec((1, N1p), lambda i: (0, 0)),
            pl.BlockSpec((N1p, N2p), lambda i: (0, 0)),
            pl.BlockSpec((1, N2p), lambda i: (0, 0)),
        ],
        out_specs=pl.BlockSpec((TM, N2p), lambda i: (i, 0)),
        compiler_params=pltpu.CompilerParams(dimension_semantics=("parallel",)),
    )(a, w1_p, b1_p, w2_p, b2_p)
    return out[:M]


def maxpool2x2_lanes(y, B, OH, OW):
    """2x2 stride-2 max pool on a conv-matmul output y:[B*OH*OW, 128].

    Channels (padded to 128) sit on the lane axis; the width pair is merged
    into an aligned 256-lane group and the height pair becomes a leading dim,
    so the kernel is a single input pass with a lane-dense (128) output.
    Returns [B, OH//2, OW//2, 128].
    """
    OH2, OW2 = OH // 2, OW // 2
    R = B * OH2
    x = y.reshape(R, 2, OW2, 256)            # free reshape (row-major)

    TR = min(R, 512)
    Rp = _round_up(R, TR)
    if Rp != R:
        x = jnp.pad(x, ((0, Rp - R), (0, 0), (0, 0), (0, 0)))

    out = pl.pallas_call(
        _maxpool2x2_kernel,
        out_shape=jax.ShapeDtypeStruct((Rp, OW2, 128), jnp.float32),
        grid=(Rp // TR,),
        in_specs=[pl.BlockSpec((TR, 2, OW2, 256), lambda i: (i, 0, 0, 0))],
        out_specs=pl.BlockSpec((TR, OW2, 128), lambda i: (i, 0, 0)),
        compiler_params=pltpu.CompilerParams(dimension_semantics=("parallel",)),
    )(x)
    return out[:R].reshape(B, OH2, OW2, 128)


# ----------------------------------------------------------------------------
# Glue: im2col on NHWC (pure JAX reshuffling, fused under jit)
# ----------------------------------------------------------------------------
def im2col_nhwc(x, k, pad):
    """x: NHWC.  Returns patches [B*OH*OW, k*k*C] ordered (kh, kw, c), OH, OW."""
    if pad > 0:
        x = jnp.pad(x, ((0, 0), (pad, pad), (pad, pad), (0, 0)))
    B, H, W, C = x.shape
    OH, OW = H - k + 1, W - k + 1
    cols = [x[:, kh:kh + OH, kw:kw + OW, :] for kh in range(k) for kw in range(k)]
    patches = jnp.concatenate(cols, axis=-1)          # [B, OH, OW, k*k*C]
    return patches.reshape(B * OH * OW, k * k * C), OH, OW


# ----------------------------------------------------------------------------
# Parameters (PyTorch layout) + one-time preprocessing to MXU-friendly layout
# ----------------------------------------------------------------------------
def init_params(key):
    ks = jax.random.split(key, 8)
    s = 0.05
    return {
        "conv1_w": s * jax.random.normal(ks[0], (20, 1, 5, 5), jnp.float32),
        "conv1_b": s * jax.random.normal(ks[1], (20,), jnp.float32),
        "conv2_w": s * jax.random.normal(ks[2], (50, 20, 5, 5), jnp.float32),
        "conv2_b": s * jax.random.normal(ks[3], (50,), jnp.float32),
        "fc1_w": s * jax.random.normal(ks[4], (320, 1250), jnp.float32),
        "fc1_b": s * jax.random.normal(ks[5], (320,), jnp.float32),
        "fc2_w": s * jax.random.normal(ks[6], (10, 320), jnp.float32),
        "fc2_b": s * jax.random.normal(ks[7], (10,), jnp.float32),
    }


def prepare_params(params):
    """One-time: transpose weights to (K, N), pad N to multiples of 128, and
    permute fc1 columns from PyTorch's (c,h,w) flatten to our (h,w,c) flatten."""
    def pad2(w, rows, cols):
        w = jnp.asarray(w, jnp.float32)
        return jnp.zeros((rows, cols), jnp.float32).at[:w.shape[0], :w.shape[1]].set(w)

    w1 = params["conv1_w"].transpose(2, 3, 1, 0).reshape(25, 20)      # (kh,kw,c) x oc
    w2 = params["conv2_w"].transpose(2, 3, 1, 0).reshape(500, 50)
    f1 = params["fc1_w"].reshape(320, 50, 5, 5).transpose(0, 2, 3, 1) \
                        .reshape(320, 1250).T                         # (h,w,c) x 320
    f2 = params["fc2_w"].T                                            # 320 x 10
    return {
        "conv1_w": pad2(w1, 25, 128),
        "conv1_b": pad2(params["conv1_b"][None, :], 1, 128),
        "conv2_w": pad2(w2, 500, 128),
        "conv2_b": pad2(params["conv2_b"][None, :], 1, 128),
        "fc1_w": pad2(f1, 1250, 384),
        "fc1_b": pad2(params["fc1_b"][None, :], 1, 384),
        "fc2_w": pad2(f2, 384, 128),          # rows 320..383 are zero (h pad lanes)
        "fc2_b": pad2(params["fc2_b"][None, :], 1, 128),
    }


# ----------------------------------------------------------------------------
# LeNet5 forward (channels-last internally, NCHW public API)
# ----------------------------------------------------------------------------
def _lenet5_forward(x, pp):
    B = x.shape[0]
    x = jnp.transpose(x, (0, 2, 3, 1)).astype(jnp.float32)      # NHWC [B,28,28,1]

    # conv1 (1->20, k=5, pad=2) + ReLU, fused matmul+bias+relu on MXU
    p, oh, ow = im2col_nhwc(x, 5, pad=2)                         # [B*784, 25]
    o = matmul_bias_act(p, pp["conv1_w"], pp["conv1_b"], relu=True)   # [B*784, 128]

    # pool1 (channels stay lane-padded to 128 through the pool)
    o = maxpool2x2_lanes(o, B, oh, ow)                           # [B,14,14,128]
    o = o[..., :20]                                              # [B,14,14,20]

    # conv2 (20->50, k=5, pad=0) + ReLU
    p, oh, ow = im2col_nhwc(o, 5, pad=0)                         # [B*100, 500]
    o = matmul_bias_act(p, pp["conv2_w"], pp["conv2_b"], relu=True)   # [B*100, 128]

    # pool2
    o = maxpool2x2_lanes(o, B, oh, ow)                           # [B,5,5,128]
    o = o[..., :50]                                              # [B,5,5,50]

    # flatten in (h, w, c) order — fc1 weight columns were permuted to match
    o = o.reshape(B, -1)                                         # [B, 1250]

    # fused fc1(+ReLU) + fc2
    o = fc_head(o, pp["fc1_w"], pp["fc1_b"], pp["fc2_w"], pp["fc2_b"])  # [B, 128]
    return o[:, :10]


lenet5_forward = jax.jit(_lenet5_forward)


# ----------------------------------------------------------------------------
# Pure-JAX reference (PyTorch semantics) for a sanity check
# ----------------------------------------------------------------------------
def _reference_forward(x, params):
    dn = ("NCHW", "OIHW", "NCHW")
    hp = lax.Precision.HIGHEST
    o = lax.conv_general_dilated(x, params["conv1_w"], (1, 1), ((2, 2), (2, 2)),
                                 dimension_numbers=dn, precision=hp)
    o = jax.nn.relu(o + params["conv1_b"][None, :, None, None])
    o = lax.reduce_window(o, -jnp.inf, lax.max, (1, 1, 2, 2), (1, 1, 2, 2), "VALID")
    o = lax.conv_general_dilated(o, params["conv2_w"], (1, 1), "VALID",
                                 dimension_numbers=dn, precision=hp)
    o = jax.nn.relu(o + params["conv2_b"][None, :, None, None])
    o = lax.reduce_window(o, -jnp.inf, lax.max, (1, 1, 2, 2), (1, 1, 2, 2), "VALID")
    o = o.reshape(x.shape[0], -1)
    o = jax.nn.relu(jnp.dot(o, params["fc1_w"].T, precision=hp) + params["fc1_b"])
    return jnp.dot(o, params["fc2_w"].T, precision=hp) + params["fc2_b"]


if __name__ == "__main__":
    key = jax.random.PRNGKey(0)
    k_x, k_p = jax.random.split(key)
    x = jax.random.normal(k_x, (2, 1, 28, 28), jnp.float32)      # NCHW, MNIST-sized
    params = init_params(k_p)
    pp = prepare_params(params)

    out = lenet5_forward(x, pp)
    out = jax.block_until_ready(out)
    assert out.shape == (2, 10), out.shape

    ref = _reference_forward(x, params)
    err = float(jnp.max(jnp.abs(out - ref)))
    assert err < 5e-3, f"mismatch vs reference: max abs err = {err}"

    print("KERNEL_OK")
</pallas_src>

<mosaic_0001>
module attributes {stable_mosaic.version = 11 : i64} {
  func.func @_matmul_bias_act_kernel(%arg0: i32, %arg1: memref<512x25xf32, #tpu.memory_space<vmem>>, %arg2: memref<25x128xf32, #tpu.memory_space<vmem>>, %arg3: memref<1x128xf32, #tpu.memory_space<vmem>>, %arg4: memref<512x128xf32, #tpu.memory_space<vmem>>) attributes {dimension_semantics = [#tpu.dimension_semantics<parallel>], iteration_bounds = array<i64: 4>, scalar_prefetch = 0 : i64, scratch_operands = 0 : i64, tpu.core_type = #tpu.core_type<tc>, window_params = [{transform_indices = @transform_0, window_bounds = array<i64: 512, 25>}, {pipeline_mode = #tpu.pipeline_mode<synchronous>, transform_indices = @transform_1, window_bounds = array<i64: 25, 128>}, {pipeline_mode = #tpu.pipeline_mode<synchronous>, transform_indices = @transform_2, window_bounds = array<i64: 1, 128>}, {transform_indices = @transform_3, window_bounds = array<i64: 512, 128>}]} {
    %c0 = arith.constant 0 : index
    %c0_0 = arith.constant 0 : index
    %0 = vector.load %arg1[%c0, %c0_0] : memref<512x25xf32, #tpu.memory_space<vmem>>, vector<512x25xf32>
    %c0_1 = arith.constant 0 : index
    %c0_2 = arith.constant 0 : index
    %1 = vector.load %arg2[%c0_1, %c0_2] : memref<25x128xf32, #tpu.memory_space<vmem>>, vector<25x128xf32>
    %cst = arith.constant dense<0.000000e+00> : vector<512x128xf32>
    %2 = tpu.matmul %0, %1, %cst {dimension_numbers = #tpu.dot_dimension_numbers<[1], [0], [0], [1], [0, 0, 1, 1], [], []>} : vector<512x25xf32>, vector<25x128xf32>, vector<512x128xf32> -> vector<512x128xf32>
    %c0_3 = arith.constant 0 : index
    %c0_4 = arith.constant 0 : index
    %3 = vector.load %arg3[%c0_3, %c0_4] : memref<1x128xf32, #tpu.memory_space<vmem>>, vector<1x128xf32>
    %4 = vector.broadcast %3 : vector<1x128xf32> to vector<512x128xf32>
    %5 = arith.addf %2, %4 : vector<512x128xf32>
    %cst_5 = arith.constant 0.000000e+00 : f32
    %6 = vector.broadcast %cst_5 : f32 to vector<512x128xf32>
    %7 = arith.maximumf %5, %6 : vector<512x128xf32>
    %c0_6 = arith.constant 0 : index
    %c0_7 = arith.constant 0 : index
    %8 = vector.load %arg4[%c0_6, %c0_7] : memref<512x128xf32, #tpu.memory_space<vmem>>, vector<512x128xf32>
    tpu.vector_store %arg4[%c0_6, %c0_7], %7 {strides = array<i32>} : memref<512x128xf32, #tpu.memory_space<vmem>>, vector<512x128xf32>,
    return
  }
  func.func @transform_0(%arg0: i32) -> (i32, i32) {
    %c0_i32 = arith.constant 0 : i32
    %c0_i32_0 = arith.constant 0 : i32
    return %arg0, %c0_i32 : i32, i32
  }
  func.func @transform_1(%arg0: i32) -> (i32, i32) {
    %c0_i32 = arith.constant 0 : i32
    %c0_i32_0 = arith.constant 0 : i32
    %c0_i32_1 = arith.constant 0 : i32
    return %c0_i32, %c0_i32_0 : i32, i32
  }
  func.func @transform_2(%arg0: i32) -> (i32, i32) {
    %c0_i32 = arith.constant 0 : i32
    %c0_i32_0 = arith.constant 0 : i32
    %c0_i32_1 = arith.constant 0 : i32
    return %c0_i32, %c0_i32_0 : i32, i32
  }
  func.func @transform_3(%arg0: i32) -> (i32, i32) {
    %c0_i32 = arith.constant 0 : i32
    %c0_i32_0 = arith.constant 0 : i32
    return %arg0, %c0_i32 : i32, i32
  }
}

module attributes {stable_mosaic.version = 11 : i64} {
  func.func @_maxpool2x2_kernel(%arg0: i32, %arg1: memref<28x2x14x256xf32, #tpu.memory_space<vmem>>, %arg2: memref<28x14x128xf32, #tpu.memory_space<vmem>>) attributes {dimension_semantics = [#tpu.dimension_semantics<parallel>], iteration_bounds = array<i64: 1>, scalar_prefetch = 0 : i64, scratch_operands = 0 : i64, tpu.core_type = #tpu.core_type<tc>, window_params = [{transform_indices = @transform_0, window_bounds = array<i64: 28, 2, 14, 256>}, {transform_indices = @transform_1, window_bounds = array<i64: 28, 14, 128>}]} {
    %c0 = arith.constant 0 : index
    %c0_0 = arith.constant 0 : index
    %c0_1 = arith.constant 0 : index
    %c0_2 = arith.constant 0 : index
    %0 = vector.load %arg1[%c0, %c0_0, %c0_1, %c0_2] : memref<28x2x14x256xf32, #tpu.memory_space<vmem>>, vector<28x2x14x256xf32>
    %1 = vector.extract_strided_slice %0 {offsets = [0, 0, 0, 0], sizes = [28, 1, 14, 256], strides = [1, 1, 1, 1]} : vector<28x2x14x256xf32> to vector<28x1x14x256xf32>
    %2 = vector.shape_cast %1 : vector<28x1x14x256xf32> to vector<28x14x256xf32>
    %3 = vector.extract_strided_slice %0 {offsets = [0, 1, 0, 0], sizes = [28, 1, 14, 256], strides = [1, 1, 1, 1]} : vector<28x2x14x256xf32> to vector<28x1x14x256xf32>
    %4 = vector.shape_cast %3 : vector<28x1x14x256xf32> to vector<28x14x256xf32>
    %5 = arith.maximumf %2, %4 : vector<28x14x256xf32>
    %6 = vector.extract_strided_slice %5 {offsets = [0, 0, 0], sizes = [28, 14, 128], strides = [1, 1, 1]} : vector<28x14x256xf32> to vector<28x14x128xf32>
    %7 = vector.extract_strided_slice %5 {offsets = [0, 0, 128], sizes = [28, 14, 128], strides = [1, 1, 1]} : vector<28x14x256xf32> to vector<28x14x128xf32>
    %8 = arith.maximumf %6, %7 : vector<28x14x128xf32>
    %c0_3 = arith.constant 0 : index
    %c0_4 = arith.constant 0 : index
    %c0_5 = arith.constant 0 : index
    %9 = vector.load %arg2[%c0_3, %c0_4, %c0_5] : memref<28x14x128xf32, #tpu.memory_space<vmem>>, vector<28x14x128xf32>
    tpu.vector_store %arg2[%c0_3, %c0_4, %c0_5], %8 {strides = array<i32>} : memref<28x14x128xf32, #tpu.memory_space<vmem>>, vector<28x14x128xf32>,
    return
  }
  func.func @transform_0(%arg0: i32) -> (i32, i32, i32, i32) {
    %c0_i32 = arith.constant 0 : i32
    %c0_i32_0 = arith.constant 0 : i32
    %c0_i32_1 = arith.constant 0 : i32
    %c0_i32_2 = arith.constant 0 : i32
    return %arg0, %c0_i32, %c0_i32_0, %c0_i32_1 : i32, i32, i32, i32
  }
  func.func @transform_1(%arg0: i32) -> (i32, i32, i32) {
    %c0_i32 = arith.constant 0 : i32
    %c0_i32_0 = arith.constant 0 : i32
    %c0_i32_1 = arith.constant 0 : i32
    return %arg0, %c0_i32, %c0_i32_0 : i32, i32, i32
  }
}

module attributes {stable_mosaic.version = 11 : i64} {
  func.func @_matmul_bias_act_kernel(%arg0: i32, %arg1: memref<200x500xf32, #tpu.memory_space<vmem>>, %arg2: memref<500x128xf32, #tpu.memory_space<vmem>>, %arg3: memref<1x128xf32, #tpu.memory_space<vmem>>, %arg4: memref<200x128xf32, #tpu.memory_space<vmem>>) attributes {dimension_semantics = [#tpu.dimension_semantics<parallel>], iteration_bounds = array<i64: 1>, scalar_prefetch = 0 : i64, scratch_operands = 0 : i64, tpu.core_type = #tpu.core_type<tc>, window_params = [{transform_indices = @transform_0, window_bounds = array<i64: 200, 500>}, {pipeline_mode = #tpu.pipeline_mode<synchronous>, transform_indices = @transform_1, window_bounds = array<i64: 500, 128>}, {pipeline_mode = #tpu.pipeline_mode<synchronous>, transform_indices = @transform_2, window_bounds = array<i64: 1, 128>}, {transform_indices = @transform_3, window_bounds = array<i64: 200, 128>}]} {
    %c0 = arith.constant 0 : index
    %c0_0 = arith.constant 0 : index
    %0 = vector.load %arg1[%c0, %c0_0] : memref<200x500xf32, #tpu.memory_space<vmem>>, vector<200x500xf32>
    %c0_1 = arith.constant 0 : index
    %c0_2 = arith.constant 0 : index
    %1 = vector.load %arg2[%c0_1, %c0_2] : memref<500x128xf32, #tpu.memory_space<vmem>>, vector<500x128xf32>
    %cst = arith.constant dense<0.000000e+00> : vector<200x128xf32>
    %2 = tpu.matmul %0, %1, %cst {dimension_numbers = #tpu.dot_dimension_numbers<[1], [0], [0], [1], [0, 0, 1, 1], [], []>} : vector<200x500xf32>, vector<500x128xf32>, vector<200x128xf32> -> vector<200x128xf32>
    %c0_3 = arith.constant 0 : index
    %c0_4 = arith.constant 0 : index
    %3 = vector.load %arg3[%c0_3, %c0_4] : memref<1x128xf32, #tpu.memory_space<vmem>>, vector<1x128xf32>
    %4 = vector.broadcast %3 : vector<1x128xf32> to vector<200x128xf32>
    %5 = arith.addf %2, %4 : vector<200x128xf32>
    %cst_5 = arith.constant 0.000000e+00 : f32
    %6 = vector.broadcast %cst_5 : f32 to vector<200x128xf32>
    %7 = arith.maximumf %5, %6 : vector<200x128xf32>
    %c0_6 = arith.constant 0 : index
    %c0_7 = arith.constant 0 : index
    %8 = vector.load %arg4[%c0_6, %c0_7] : memref<200x128xf32, #tpu.memory_space<vmem>>, vector<200x128xf32>
    tpu.vector_store %arg4[%c0_6, %c0_7], %7 {strides = array<i32>} : memref<200x128xf32, #tpu.memory_space<vmem>>, vector<200x128xf32>,
    return
  }
  func.func @transform_0(%arg0: i32) -> (i32, i32) {
    %c0_i32 = arith.constant 0 : i32
    %c0_i32_0 = arith.constant 0 : i32
    return %arg0, %c0_i32 : i32, i32
  }
  func.func @transform_1(%arg0: i32) -> (i32, i32) {
    %c0_i32 = arith.constant 0 : i32
    %c0_i32_0 = arith.constant 0 : i32
    %c0_i32_1 = arith.constant 0 : i32
    return %c0_i32, %c0_i32_0 : i32, i32
  }
  func.func @transform_2(%arg0: i32) -> (i32, i32) {
    %c0_i32 = arith.constant 0 : i32
    %c0_i32_0 = arith.constant 0 : i32
    %c0_i32_1 = arith.constant 0 : i32
    return %c0_i32, %c0_i32_0 : i32, i32
  }
  func.func @transform_3(%arg0: i32) -> (i32, i32) {
    %c0_i32 = arith.constant 0 : i32
    %c0_i32_0 = arith.constant 0 : i32
    return %arg0, %c0_i32 : i32, i32
  }
}

module attributes {stable_mosaic.version = 11 : i64} {
  func.func @_maxpool2x2_kernel(%arg0: i32, %arg1: memref<10x2x5x256xf32, #tpu.memory_space<vmem>>, %arg2: memref<10x5x128xf32, #tpu.memory_space<vmem>>) attributes {dimension_semantics = [#tpu.dimension_semantics<parallel>], iteration_bounds = array<i64: 1>, scalar_prefetch = 0 : i64, scratch_operands = 0 : i64, tpu.core_type = #tpu.core_type<tc>, window_params = [{transform_indices = @transform_0, window_bounds = array<i64: 10, 2, 5, 256>}, {transform_indices = @transform_1, window_bounds = array<i64: 10, 5, 128>}]} {
    %c0 = arith.constant 0 : index
    %c0_0 = arith.constant 0 : index
    %c0_1 = arith.constant 0 : index
    %c0_2 = arith.constant 0 : index
    %0 = vector.load %arg1[%c0, %c0_0, %c0_1, %c0_2] : memref<10x2x5x256xf32, #tpu.memory_space<vmem>>, vector<10x2x5x256xf32>
    %1 = vector.extract_strided_slice %0 {offsets = [0, 0, 0, 0], sizes = [10, 1, 5, 256], strides = [1, 1, 1, 1]} : vector<10x2x5x256xf32> to vector<10x1x5x256xf32>
    %2 = vector.shape_cast %1 : vector<10x1x5x256xf32> to vector<10x5x256xf32>
    %3 = vector.extract_strided_slice %0 {offsets = [0, 1, 0, 0], sizes = [10, 1, 5, 256], strides = [1, 1, 1, 1]} : vector<10x2x5x256xf32> to vector<10x1x5x256xf32>
    %4 = vector.shape_cast %3 : vector<10x1x5x256xf32> to vector<10x5x256xf32>
    %5 = arith.maximumf %2, %4 : vector<10x5x256xf32>
    %6 = vector.extract_strided_slice %5 {offsets = [0, 0, 0], sizes = [10, 5, 128], strides = [1, 1, 1]} : vector<10x5x256xf32> to vector<10x5x128xf32>
    %7 = vector.extract_strided_slice %5 {offsets = [0, 0, 128], sizes = [10, 5, 128], strides = [1, 1, 1]} : vector<10x5x256xf32> to vector<10x5x128xf32>
    %8 = arith.maximumf %6, %7 : vector<10x5x128xf32>
    %c0_3 = arith.constant 0 : index
    %c0_4 = arith.constant 0 : index
    %c0_5 = arith.constant 0 : index
    %9 = vector.load %arg2[%c0_3, %c0_4, %c0_5] : memref<10x5x128xf32, #tpu.memory_space<vmem>>, vector<10x5x128xf32>
    tpu.vector_store %arg2[%c0_3, %c0_4, %c0_5], %8 {strides = array<i32>} : memref<10x5x128xf32, #tpu.memory_space<vmem>>, vector<10x5x128xf32>,
    return
  }
  func.func @transform_0(%arg0: i32) -> (i32, i32, i32, i32) {
    %c0_i32 = arith.constant 0 : i32
    %c0_i32_0 = arith.constant 0 : i32
    %c0_i32_1 = arith.constant 0 : i32
    %c0_i32_2 = arith.constant 0 : i32
    return %arg0, %c0_i32, %c0_i32_0, %c0_i32_1 : i32, i32, i32, i32
  }
  func.func @transform_1(%arg0: i32) -> (i32, i32, i32) {
    %c0_i32 = arith.constant 0 : i32
    %c0_i32_0 = arith.constant 0 : i32
    %c0_i32_1 = arith.constant 0 : i32
    return %arg0, %c0_i32, %c0_i32_0 : i32, i32, i32
  }
}

module attributes {stable_mosaic.version = 11 : i64} {
  func.func @_fc_head_kernel(%arg0: i32, %arg1: memref<8x1250xf32, #tpu.memory_space<vmem>>, %arg2: memref<1250x384xf32, #tpu.memory_space<vmem>>, %arg3: memref<1x384xf32, #tpu.memory_space<vmem>>, %arg4: memref<384x128xf32, #tpu.memory_space<vmem>>, %arg5: memref<1x128xf32, #tpu.memory_space<vmem>>, %arg6: memref<8x128xf32, #tpu.memory_space<vmem>>) attributes {dimension_semantics = [#tpu.dimension_semantics<parallel>], iteration_bounds = array<i64: 1>, scalar_prefetch = 0 : i64, scratch_operands = 0 : i64, tpu.core_type = #tpu.core_type<tc>, window_params = [{transform_indices = @transform_0, window_bounds = array<i64: 8, 1250>}, {pipeline_mode = #tpu.pipeline_mode<synchronous>, transform_indices = @transform_1, window_bounds = array<i64: 1250, 384>}, {pipeline_mode = #tpu.pipeline_mode<synchronous>, transform_indices = @transform_2, window_bounds = array<i64: 1, 384>}, {pipeline_mode = #tpu.pipeline_mode<synchronous>, transform_indices = @transform_3, window_bounds = array<i64: 384, 128>}, {pipeline_mode = #tpu.pipeline_mode<synchronous>, transform_indices = @transform_4, window_bounds = array<i64: 1, 128>}, {transform_indices = @transform_5, window_bounds = array<i64: 8, 128>}]} {
    %c0 = arith.constant 0 : index
    %c0_0 = arith.constant 0 : index
    %0 = vector.load %arg1[%c0, %c0_0] : memref<8x1250xf32, #tpu.memory_space<vmem>>, vector<8x1250xf32>
    %c0_1 = arith.constant 0 : index
    %c0_2 = arith.constant 0 : index
    %1 = vector.load %arg2[%c0_1, %c0_2] : memref<1250x384xf32, #tpu.memory_space<vmem>>, vector<1250x384xf32>
    %cst = arith.constant dense<0.000000e+00> : vector<8x384xf32>
    %2 = tpu.matmul %0, %1, %cst {dimension_numbers = #tpu.dot_dimension_numbers<[1], [0], [0], [1], [0, 0, 1, 1], [], []>} : vector<8x1250xf32>, vector<1250x384xf32>, vector<8x384xf32> -> vector<8x384xf32>
    %c0_3 = arith.constant 0 : index
    %c0_4 = arith.constant 0 : index
    %3 = vector.load %arg3[%c0_3, %c0_4] : memref<1x384xf32, #tpu.memory_space<vmem>>, vector<1x384xf32>
    %4 = vector.broadcast %3 : vector<1x384xf32> to vector<8x384xf32>
    %5 = arith.addf %2, %4 : vector<8x384xf32>
    %cst_5 = arith.constant 0.000000e+00 : f32
    %6 = vector.broadcast %cst_5 : f32 to vector<8x384xf32>
    %7 = arith.maximumf %5, %6 : vector<8x384xf32>
    %c0_6 = arith.constant 0 : index
    %c0_7 = arith.constant 0 : index
    %8 = vector.load %arg4[%c0_6, %c0_7] : memref<384x128xf32, #tpu.memory_space<vmem>>, vector<384x128xf32>
    %cst_8 = arith.constant dense<0.000000e+00> : vector<8x128xf32>
    %9 = tpu.matmul %7, %8, %cst_8 {dimension_numbers = #tpu.dot_dimension_numbers<[1], [0], [0], [1], [0, 0, 1, 1], [], []>} : vector<8x384xf32>, vector<384x128xf32>, vector<8x128xf32> -> vector<8x128xf32>
    %c0_9 = arith.constant 0 : index
    %c0_10 = arith.constant 0 : index
    %10 = vector.load %arg5[%c0_9, %c0_10] : memref<1x128xf32, #tpu.memory_space<vmem>>, vector<1x128xf32>
    %11 = vector.broadcast %10 : vector<1x128xf32> to vector<8x128xf32>
    %12 = arith.addf %9, %11 : vector<8x128xf32>
    %c0_11 = arith.constant 0 : index
    %c0_12 = arith.constant 0 : index
    %13 = vector.load %arg6[%c0_11, %c0_12] : memref<8x128xf32, #tpu.memory_space<vmem>>, vector<8x128xf32>
    tpu.vector_store %arg6[%c0_11, %c0_12], %12 {strides = array<i32>} : memref<8x128xf32, #tpu.memory_space<vmem>>, vector<8x128xf32>,
    return
  }
  func.func @transform_0(%arg0: i32) -> (i32, i32) {
    %c0_i32 = arith.constant 0 : i32
    %c0_i32_0 = arith.constant 0 : i32
    return %arg0, %c0_i32 : i32, i32
  }
  func.func @transform_1(%arg0: i32) -> (i32, i32) {
    %c0_i32 = arith.constant 0 : i32
    %c0_i32_0 = arith.constant 0 : i32
    %c0_i32_1 = arith.constant 0 : i32
    return %c0_i32, %c0_i32_0 : i32, i32
  }
  func.func @transform_2(%arg0: i32) -> (i32, i32) {
    %c0_i32 = arith.constant 0 : i32
    %c0_i32_0 = arith.constant 0 : i32
    %c0_i32_1 = arith.constant 0 : i32
    return %c0_i32, %c0_i32_0 : i32, i32
  }
  func.func @transform_3(%arg0: i32) -> (i32, i32) {
    %c0_i32 = arith.constant 0 : i32
    %c0_i32_0 = arith.constant 0 : i32
    %c0_i32_1 = arith.constant 0 : i32
    return %c0_i32, %c0_i32_0 : i32, i32
  }
  func.func @transform_4(%arg0: i32) -> (i32, i32) {
    %c0_i32 = arith.constant 0 : i32
    %c0_i32_0 = arith.constant 0 : i32
    %c0_i32_1 = arith.constant 0 : i32
    return %c0_i32, %c0_i32_0 : i32, i32
  }
  func.func @transform_5(%arg0: i32) -> (i32, i32) {
    %c0_i32 = arith.constant 0 : i32
    %c0_i32_0 = arith.constant 0 : i32
    return %arg0, %c0_i32 : i32, i32
  }
}

</mosaic_0001>

<bundles_post_ra>
// kernel: _lenet5_forward.5
= control target key start
LH: loop header
LB: loop body
LE: loop exit
PB: predicated region body
PF: predicated region fallthrough
CT: control target
= control target key end

     0   :  { %s961_s12 = smov 0   ;;  %s1262_s0 = inlined_call_operand.vmem [shape: f32[2048,25], index: 0, kind: input, shape index: {}]   ;;  %s1263_s1 = inlined_call_operand.vmem [shape: f32[25,128], index: 1, kind: input, shape index: {}]   ;;  %s1264_s2 = inlined_call_operand.vmem [shape: f32[1,128], index: 2, kind: input, shape index: {}]   ;;  %s1265_s3 = inlined_call_operand.vmem [shape: f32[2048,128], index: 3, kind: output, shape index: {}]  }
   0x1 LB: > { %s836_s13 = sadd.s32 4294967295, %s939_s12   ;;  %p840_p0 = scmp.ge.s32.totalorder %s939_s12, 1  ;;  %s939_s12 = sphi %s961_s12, %s13_s12  }
   0x2   : > { %p138_p1 = scmp.lt.s32.totalorder %s939_s12, 5 }
   0x4   : > { %p139_p2 = pnand %p840_p0, %p138_p1 }
   0x5   : > { %s841_s18 = sshll.u32 (!%p139_p2), %s836_s13, 6 }
   0x6   : > { %142 = sbr.rel (%p139_p2) target bundleno = 277 (0x115), region = 32  ;;  %p163_p3 = scmp.lt.s32.totalorder (!%p139_p2), %s841_s18, 255 }
   0xb   : > { %v241_v0 = vld [vmem:[%s1263_s1 + $0x18] sm:$0x1]  ;;  %vm439_vm0 = vcmask 1040384   ;;  %v240_v1 = vld [vmem:[%s1263_s1 + $0x10] sm:$0xff]  ;;  %v239_v2 = vld [vmem:[%s1263_s1 + $0x8] sm:$0xff]  ;;  %s1267_s18 = smov (!%p163_p3, %s841_s18), 255 }
   0xc   : > { %913 = vmatpush.msk.msra.mxu2 %vm439_vm0, %v241_v0  ;;  %914 = vmatpush.msk.msra.mxu3 %vm439_vm0, %v241_v0  ;;  %v238_v3 = vld [vmem:[%s1263_s1] sm:$0xff]  ;;  %s842_s23 = sshll.u32 %s1267_s18, 3  ;;  %vm246_vm1 = vcmask 203776  }
   0xd   : > { %845 = vmatpush.msk.msra.mxu0 %vm439_vm0, %v241_v0  ;;  %912 = vmatpush.msk.msra.mxu1 %vm439_vm0, %v241_v0  ;;  %s989_s26 = scalar_lea.vmem %s1262_s0, %s842_s23  ;;  %s1131_s4 = scalar_lea.vmem %s1265_s3, %s842_s23 }
   0xe   : > { %916 = vmatpush.msra.mxu2 %v240_v1  ;;  %917 = vmatpush.msra.mxu3 %v240_v1  ;;  %v206_v4 = vld [vmem:[%s989_s26 + $0x100] sm:$0xff]  ;;  %v207_v8 = vld [vmem:[%s989_s26 + $0x108] sm:$0xff]  ;;  %v208_v12 = vld [vmem:[%s989_s26 + $0x110] sm:$0xff] }
   0xf   : > { %456 = vmatpush.msra.mxu0 %v240_v1  ;;  %915 = vmatpush.msra.mxu1 %v240_v1  ;;  %v222_v5 = vld [vmem:[%s989_s26 + $0x180] sm:$0xff]  ;;  %v223_v9 = vld [vmem:[%s989_s26 + $0x188] sm:$0xff]  ;;  %v224_v13 = vld [vmem:[%s989_s26 + $0x190] sm:$0xff] }
  0x10   : > { %919 = vmatpush.msra.mxu2 %v239_v2  ;;  %920 = vmatpush.msra.mxu3 %v239_v2  ;;  %v174_v6 = vld [vmem:[%s989_s26] sm:$0xff]  ;;  %v175_v10 = vld [vmem:[%s989_s26 + $0x8] sm:$0xff]  ;;  %v176_v14 = vld [vmem:[%s989_s26 + $0x10] sm:$0xff] }
  0x11   : > { %457 = vmatpush.msra.mxu0 %v239_v2  ;;  %918 = vmatpush.msra.mxu1 %v239_v2  ;;  %v190_v7 = vld [vmem:[%s989_s26 + $0x80] sm:$0xff]  ;;  %v191_v11 = vld [vmem:[%s989_s26 + $0x88] sm:$0xff]  ;;  %v192_v15 = vld [vmem:[%s989_s26 + $0x90] sm:$0xff] }
  0x12   : > { %922 = vmatpush.msra.mxu2 %v238_v3  ;;  %923 = vmatpush.msra.mxu3 %v238_v3  ;;  %v209_v16 = vld [vmem:[%s989_s26 + $0x118] sm:$0xff]  ;;  %v210_v20 = vld [vmem:[%s989_s26 + $0x120] sm:$0xff]  ;;  %v211_v24 = vld [vmem:[%s989_s26 + $0x128] sm:$0xff] }
  0x13   : > { %878 = vmatmul.msk.f32.vlgmr.msra.gmra.mxu2 %vm246_vm1, %v206_v4  ;;  %894 = vmatmul.msk.f32.vlgmr.msra.gmra.mxu3 %vm246_vm1, %v222_v5  ;;  %v225_v17 = vld [vmem:[%s989_s26 + $0x198] sm:$0xff]  ;;  %v226_v21 = vld [vmem:[%s989_s26 + $0x1a0] sm:$0xff]  ;;  %v227_v25 = vld [vmem:[%s989_s26 + $0x1a8] sm:$0xff] }
  0x14   : > { %458 = vmatpush.msra.mxu0 %v238_v3  ;;  %921 = vmatpush.msra.mxu1 %v238_v3  ;;  %v177_v18 = vld [vmem:[%s989_s26 + $0x18] sm:$0xff]  ;;  %v178_v22 = vld [vmem:[%s989_s26 + $0x20] sm:$0xff]  ;;  %v179_v26 = vld [vmem:[%s989_s26 + $0x28] sm:$0xff] }
  0x15   : > { %846 = vmatmul.msk.f32.vlgmr.msra.gmra.mxu0 %vm246_vm1, %v174_v6  ;;  %862 = vmatmul.msk.f32.vlgmr.msra.gmra.mxu1 %vm246_vm1, %v190_v7  ;;  %v193_v19 = vld [vmem:[%s989_s26 + $0x98] sm:$0xff]  ;;  %v194_v23 = vld [vmem:[%s989_s26 + $0xa0] sm:$0xff]  ;;  %v195_v27 = vld [vmem:[%s989_s26 + $0xa8] sm:$0xff] }
  0x16   : > { %v212_v28 = vld [vmem:[%s989_s26 + $0x130] sm:$0xff]  ;;  %v213_v32 = vld [vmem:[%s989_s26 + $0x138] sm:$0xff]  ;;  %v214_v36 = vld [vmem:[%s989_s26 + $0x140] sm:$0xff] }
  0x17   : > { %v228_v29 = vld [vmem:[%s989_s26 + $0x1b0] sm:$0xff]  ;;  %v229_v33 = vld [vmem:[%s989_s26 + $0x1b8] sm:$0xff]  ;;  %v230_v37 = vld [vmem:[%s989_s26 + $0x1c0] sm:$0xff] }
  0x18   : > { %v180_v30 = vld [vmem:[%s989_s26 + $0x30] sm:$0xff]  ;;  %v181_v34 = vld [vmem:[%s989_s26 + $0x38] sm:$0xff]  ;;  %v182_v38 = vld [vmem:[%s989_s26 + $0x40] sm:$0xff] }
  0x19   : > { %v196_v31 = vld [vmem:[%s989_s26 + $0xb0] sm:$0xff]  ;;  %v197_v35 = vld [vmem:[%s989_s26 + $0xb8] sm:$0xff]  ;;  %v198_v39 = vld [vmem:[%s989_s26 + $0xc0] sm:$0xff] }
  0x1a   : > { %v215_v40 = vld [vmem:[%s989_s26 + $0x148] sm:$0xff]  ;;  %v216_v44 = vld [vmem:[%s989_s26 + $0x150] sm:$0xff]  ;;  %v217_v48 = vld [vmem:[%s989_s26 + $0x158] sm:$0xff] }
  0x1b   : > { %879 = vmatmul.msk.f32.gmra.mxu2 %vm246_vm1, %v207_v8  ;;  %895 = vmatmul.msk.f32.gmra.mxu3 %vm246_vm1, %v223_v9  ;;  %v231_v41 = vld [vmem:[%s989_s26 + $0x1c8] sm:$0xff]  ;;  %v232_v45 = vld [vmem:[%s989_s26 + $0x1d0] sm:$0xff]  ;;  %v233_v49 = vld [vmem:[%s989_s26 + $0x1d8] sm:$0xff] }
  0x1c   : > { %v183_v42 = vld [vmem:[%s989_s26 + $0x48] sm:$0xff]  ;;  %v184_v46 = vld [vmem:[%s989_s26 + $0x50] sm:$0xff]  ;;  %v185_v50 = vld [vmem:[%s989_s26 + $0x58] sm:$0xff] }
  0x1d   : > { %847 = vmatmul.msk.f32.gmra.mxu0 %vm246_vm1, %v175_v10  ;;  %863 = vmatmul.msk.f32.gmra.mxu1 %vm246_vm1, %v191_v11  ;;  %v199_v43 = vld [vmem:[%s989_s26 + $0xc8] sm:$0xff]  ;;  %v200_v47 = vld [vmem:[%s989_s26 + $0xd0] sm:$0xff]  ;;  %v201_v51 = vld [vmem:[%s989_s26 + $0xd8] sm:$0xff] }
  0x1e   : > { %v218_v52 = vld [vmem:[%s989_s26 + $0x160] sm:$0xff]  ;;  %v219_v56 = vld [vmem:[%s989_s26 + $0x168] sm:$0xff]  ;;  %v220_v60 = vld [vmem:[%s989_s26 + $0x170] sm:$0xff] }
  0x1f   : > { %v234_v53 = vld [vmem:[%s989_s26 + $0x1e0] sm:$0xff]  ;;  %v235_v57 = vld [vmem:[%s989_s26 + $0x1e8] sm:$0xff]  ;;  %v236_v61 = vld [vmem:[%s989_s26 + $0x1f0] sm:$0xff] }
  0x20   : > { %v186_v54 = vld [vmem:[%s989_s26 + $0x60] sm:$0xff]  ;;  %v187_v58 = vld [vmem:[%s989_s26 + $0x68] sm:$0xff]  ;;  %v188_v62 = vld [vmem:[%s989_s26 + $0x70] sm:$0xff] }
  0x21   : > { %v202_v55 = vld [vmem:[%s989_s26 + $0xe0] sm:$0xff]  ;;  %v203_v59 = vld [vmem:[%s989_s26 + $0xe8] sm:$0xff]  ;;  %v204_v63 = vld [vmem:[%s989_s26 + $0xf0] sm:$0xff] }
  0x22   : > { %v221_v0 = vld [vmem:[%s989_s26 + $0x178] sm:$0xff]  ;;  %v1122_v4 = vld [vmem:[%s1264_s2] ss:$0 sm:$0xff] }
  0x23   : > { %880 = vmatmul.msk.f32.gmra.mxu2 %vm246_vm1, %v208_v12  ;;  %896 = vmatmul.msk.f32.gmra.mxu3 %vm246_vm1, %v224_v13  ;;  %v237_v1 = vld [vmem:[%s989_s26 + $0x1f8] sm:$0xff] }
  0x24   : > { %v189_v2 = vld [vmem:[%s989_s26 + $0x78] sm:$0xff] }
  0x25   : > { %848 = vmatmul.msk.f32.gmra.mxu0 %vm246_vm1, %v176_v14  ;;  %864 = vmatmul.msk.f32.gmra.mxu1 %vm246_vm1, %v192_v15  ;;  %v205_v3 = vld [vmem:[%s989_s26 + $0xf8] sm:$0xff] }
  0x2b   : > { %881 = vmatmul.msk.f32.gmra.mxu2 %vm246_vm1, %v209_v16  ;;  %897 = vmatmul.msk.f32.gmra.mxu3 %vm246_vm1, %v225_v17 }
  0x2d   : > { %849 = vmatmul.msk.f32.gmra.mxu0 %vm246_vm1, %v177_v18  ;;  %865 = vmatmul.msk.f32.gmra.mxu1 %vm246_vm1, %v193_v19 }
  0x33   : > { %882 = vmatmul.msk.f32.gmra.mxu2 %vm246_vm1, %v210_v20  ;;  %898 = vmatmul.msk.f32.gmra.mxu3 %vm246_vm1, %v226_v21 }
  0x35   : > { %850 = vmatmul.msk.f32.gmra.mxu0 %vm246_vm1, %v178_v22  ;;  %866 = vmatmul.msk.f32.gmra.mxu1 %vm246_vm1, %v194_v23 }
  0x3b   : > { %883 = vmatmul.msk.f32.gmra.mxu2 %vm246_vm1, %v211_v24  ;;  %899 = vmatmul.msk.f32.gmra.mxu3 %vm246_vm1, %v227_v25 }
  0x3d   : > { %851 = vmatmul.msk.f32.gmra.mxu0 %vm246_vm1, %v179_v26  ;;  %867 = vmatmul.msk.f32.gmra.mxu1 %vm246_vm1, %v195_v27 }
  0x43   : > { %884 = vmatmul.msk.f32.gmra.mxu2 %vm246_vm1, %v212_v28  ;;  %900 = vmatmul.msk.f32.gmra.mxu3 %vm246_vm1, %v228_v29 }
  0x45   : > { %852 = vmatmul.msk.f32.gmra.mxu0 %vm246_vm1, %v180_v30  ;;  %868 = vmatmul.msk.f32.gmra.mxu1 %vm246_vm1, %v196_v31 }
  0x4b   : > { %885 = vmatmul.msk.f32.gmra.mxu2 %vm246_vm1, %v213_v32  ;;  %901 = vmatmul.msk.f32.gmra.mxu3 %vm246_vm1, %v229_v33 }
  0x4d   : > { %853 = vmatmul.msk.f32.gmra.mxu0 %vm246_vm1, %v181_v34  ;;  %869 = vmatmul.msk.f32.gmra.mxu1 %vm246_vm1, %v197_v35 }
  0x53   : > { %886 = vmatmul.msk.f32.gmra.mxu2 %vm246_vm1, %v214_v36  ;;  %902 = vmatmul.msk.f32.gmra.mxu3 %vm246_vm1, %v230_v37 }
  0x55   : > { %854 = vmatmul.msk.f32.gmra.mxu0 %vm246_vm1, %v182_v38  ;;  %870 = vmatmul.msk.f32.gmra.mxu1 %vm246_vm1, %v198_v39 }
  0x5b   : > { %887 = vmatmul.msk.f32.gmra.mxu2 %vm246_vm1, %v215_v40  ;;  %903 = vmatmul.msk.f32.gmra.mxu3 %vm246_vm1, %v231_v41 }
  0x5d   : > { %855 = vmatmul.msk.f32.gmra.mxu0 %vm246_vm1, %v183_v42  ;;  %871 = vmatmul.msk.f32.gmra.mxu1 %vm246_vm1, %v199_v43 }
  0x63   : > { %888 = vmatmul.msk.f32.gmra.mxu2 %vm246_vm1, %v216_v44  ;;  %904 = vmatmul.msk.f32.gmra.mxu3 %vm246_vm1, %v232_v45 }
  0x65   : > { %856 = vmatmul.msk.f32.gmra.mxu0 %vm246_vm1, %v184_v46  ;;  %872 = vmatmul.msk.f32.gmra.mxu1 %vm246_vm1, %v200_v47 }
  0x6b   : > { %889 = vmatmul.msk.f32.gmra.mxu2 %vm246_vm1, %v217_v48  ;;  %905 = vmatmul.msk.f32.gmra.mxu3 %vm246_vm1, %v233_v49 }
  0x6d   : > { %857 = vmatmul.msk.f32.gmra.mxu0 %vm246_vm1, %v185_v50  ;;  %873 = vmatmul.msk.f32.gmra.mxu1 %vm246_vm1, %v201_v51 }
  0x73   : > { %890 = vmatmul.msk.f32.gmra.mxu2 %vm246_vm1, %v218_v52  ;;  %906 = vmatmul.msk.f32.gmra.mxu3 %vm246_vm1, %v234_v53 }
  0x75   : > { %858 = vmatmul.msk.f32.gmra.mxu0 %vm246_vm1, %v186_v54  ;;  %874 = vmatmul.msk.f32.gmra.mxu1 %vm246_vm1, %v202_v55 }
  0x7b   : > { %891 = vmatmul.msk.f32.gmra.mxu2 %vm246_vm1, %v219_v56  ;;  %907 = vmatmul.msk.f32.gmra.mxu3 %vm246_vm1, %v235_v57 }
  0x7d   : > { %859 = vmatmul.msk.f32.gmra.mxu0 %vm246_vm1, %v187_v58  ;;  %875 = vmatmul.msk.f32.gmra.mxu1 %vm246_vm1, %v203_v59 }
  0x83   : > { %892 = vmatmul.msk.f32.gmra.mxu2 %vm246_vm1, %v220_v60  ;;  %908 = vmatmul.msk.f32.gmra.mxu3 %vm246_vm1, %v236_v61 }
  0x85   : > { %860 = vmatmul.msk.f32.gmra.mxu0 %vm246_vm1, %v188_v62  ;;  %876 = vmatmul.msk.f32.gmra.mxu1 %vm246_vm1, %v204_v63 }
  0x8b   : > { %893 = vmatmul.msk.f32.gmra.mxu2 %vm246_vm1, %v221_v0  ;;  %909 = vmatmul.msk.f32.gmra.mxu3 %vm246_vm1, %v237_v1 }
  0x8d   : > { %861 = vmatmul.msk.f32.gmra.mxu0 %vm246_vm1, %v189_v2  ;;  %877 = vmatmul.msk.f32.gmra.mxu1 %vm246_vm1, %v205_v3 }
  0x92   : > { %v460_v5 = vpop.f32.mrf.mxu0  ;;  %v508_v6 = vpop.f32.mrf.mxu1 }
  0x93   : > { %v461_v7 = vadd.f32 %v1122_v4, %v460_v5  ;;  %v509_v8 = vadd.f32 %v1122_v4, %v508_v6 }
  0x95   : > { %v652_v9 = vmax.f32 %v461_v7, 0.0  ;;  %v668_v10 = vmax.f32 %v509_v8, 0.0 }
  0x96   : > { %v556_v11 = vpop.f32.mrf.mxu2  ;;  %v604_v12 = vpop.f32.mrf.mxu3 }
  0x97   : > { %716 = vst [vmem:[%s1131_s4] sm:$0xff] %v652_v9  ;;  %v557_v13 = vadd.f32 %v1122_v4, %v556_v11  ;;  %v605_v14 = vadd.f32 %v1122_v4, %v604_v12 }
  0x98   : > { %732 = vst [vmem:[%s1131_s4 + $0x80] sm:$0xff] %v668_v10 }
  0x99   : > { %v684_v15 = vmax.f32 %v557_v13, 0.0  ;;  %v700_v16 = vmax.f32 %v605_v14, 0.0 }
  0x9a   : > { %v463_v17 = vpop.f32.mrf.mxu0  ;;  %v511_v18 = vpop.f32.mrf.mxu1 }
  0x9b   : > { %748 = vst [vmem:[%s1131_s4 + $0x100] sm:$0xff] %v684_v15  ;;  %v464_v19 = vadd.f32 %v1122_v4, %v463_v17  ;;  %v512_v20 = vadd.f32 %v1122_v4, %v511_v18 }
  0x9c   : > { %764 = vst [vmem:[%s1131_s4 + $0x180] sm:$0xff] %v700_v16 }
  0x9d   : > { %v653_v21 = vmax.f32 %v464_v19, 0.0  ;;  %v669_v22 = vmax.f32 %v512_v20, 0.0 }
  0x9e   : > { %v559_v23 = vpop.f32.mrf.mxu2  ;;  %v607_v24 = vpop.f32.mrf.mxu3 }
  0x9f   : > { %717 = vst [vmem:[%s1131_s4 + $0x8] sm:$0xff] %v653_v21  ;;  %v560_v25 = vadd.f32 %v1122_v4, %v559_v23  ;;  %v608_v26 = vadd.f32 %v1122_v4, %v607_v24 }
  0xa0   : > { %733 = vst [vmem:[%s1131_s4 + $0x88] sm:$0xff] %v669_v22 }
  0xa1   : > { %v685_v27 = vmax.f32 %v560_v25, 0.0  ;;  %v701_v28 = vmax.f32 %v608_v26, 0.0 }
  0xa2   : > { %v466_v29 = vpop.f32.mrf.mxu0  ;;  %v514_v30 = vpop.f32.mrf.mxu1 }
  0xa3   : > { %749 = vst [vmem:[%s1131_s4 + $0x108] sm:$0xff] %v685_v27  ;;  %v467_v31 = vadd.f32 %v1122_v4, %v466_v29  ;;  %v515_v32 = vadd.f32 %v1122_v4, %v514_v30 }
  0xa4   : > { %765 = vst [vmem:[%s1131_s4 + $0x188] sm:$0xff] %v701_v28 }
  0xa5   : > { %v654_v33 = vmax.f32 %v467_v31, 0.0  ;;  %v670_v34 = vmax.f32 %v515_v32, 0.0 }
  0xa6   : > { %v562_v35 = vpop.f32.mrf.mxu2  ;;  %v610_v36 = vpop.f32.mrf.mxu3 }
  0xa7   : > { %718 = vst [vmem:[%s1131_s4 + $0x10] sm:$0xff] %v654_v33  ;;  %v563_v37 = vadd.f32 %v1122_v4, %v562_v35  ;;  %v611_v38 = vadd.f32 %v1122_v4, %v610_v36 }
  0xa8   : > { %734 = vst [vmem:[%s1131_s4 + $0x90] sm:$0xff] %v670_v34 }
  0xa9   : > { %v686_v39 = vmax.f32 %v563_v37, 0.0  ;;  %v702_v40 = vmax.f32 %v611_v38, 0.0 }
  0xaa   : > { %v469_v41 = vpop.f32.mrf.mxu0  ;;  %v517_v42 = vpop.f32.mrf.mxu1 }
  0xab   : > { %750 = vst [vmem:[%s1131_s4 + $0x110] sm:$0xff] %v686_v39  ;;  %v470_v43 = vadd.f32 %v1122_v4, %v469_v41  ;;  %v518_v44 = vadd.f32 %v1122_v4, %v517_v42 }
  0xac   : > { %766 = vst [vmem:[%s1131_s4 + $0x190] sm:$0xff] %v702_v40 }
  0xad   : > { %v655_v45 = vmax.f32 %v470_v43, 0.0  ;;  %v671_v46 = vmax.f32 %v518_v44, 0.0 }
  0xae   : > { %v565_v47 = vpop.f32.mrf.mxu2  ;;  %v613_v48 = vpop.f32.mrf.mxu3 }
  0xaf   : > { %719 = vst [vmem:[%s1131_s4 + $0x18] sm:$0xff] %v655_v45  ;;  %v566_v49 = vadd.f32 %v1122_v4, %v565_v47  ;;  %v614_v50 = vadd.f32 %v1122_v4, %v613_v48 }
  0xb0   : > { %735 = vst [vmem:[%s1131_s4 + $0x98] sm:$0xff] %v671_v46 }
  0xb1   : > { %v687_v51 = vmax.f32 %v566_v49, 0.0  ;;  %v703_v52 = vmax.f32 %v614_v50, 0.0 }
  0xb2   : > { %v472_v53 = vpop.f32.mrf.mxu0  ;;  %v520_v54 = vpop.f32.mrf.mxu1 }
  0xb3   : > { %751 = vst [vmem:[%s1131_s4 + $0x118] sm:$0xff] %v687_v51  ;;  %v473_v55 = vadd.f32 %v1122_v4, %v472_v53  ;;  %v521_v56 = vadd.f32 %v1122_v4, %v520_v54 }
  0xb4   : > { %767 = vst [vmem:[%s1131_s4 + $0x198] sm:$0xff] %v703_v52 }
  0xb5   : > { %v656_v57 = vmax.f32 %v473_v55, 0.0  ;;  %v672_v58 = vmax.f32 %v521_v56, 0.0 }
  0xb6   : > { %v568_v59 = vpop.f32.mrf.mxu2  ;;  %v616_v60 = vpop.f32.mrf.mxu3 }
  0xb7   : > { %720 = vst [vmem:[%s1131_s4 + $0x20] sm:$0xff] %v656_v57  ;;  %v569_v61 = vadd.f32 %v1122_v4, %v568_v59  ;;  %v617_v62 = vadd.f32 %v1122_v4, %v616_v60 }
  0xb8   : > { %736 = vst [vmem:[%s1131_s4 + $0xa0] sm:$0xff] %v672_v58 }
  0xb9   : > { %v688_v63 = vmax.f32 %v569_v61, 0.0  ;;  %v704_v0 = vmax.f32 %v617_v62, 0.0 }
  0xba   : > { %v475_v1 = vpop.f32.mrf.mxu0  ;;  %v523_v2 = vpop.f32.mrf.mxu1 }
  0xbb   : > { %752 = vst [vmem:[%s1131_s4 + $0x120] sm:$0xff] %v688_v63  ;;  %v476_v3 = vadd.f32 %v1122_v4, %v475_v1  ;;  %v524_v5 = vadd.f32 %v1122_v4, %v523_v2 }
  0xbc   : > { %768 = vst [vmem:[%s1131_s4 + $0x1a0] sm:$0xff] %v704_v0 }
  0xbd   : > { %v657_v6 = vmax.f32 %v476_v3, 0.0  ;;  %v673_v7 = vmax.f32 %v524_v5, 0.0 }
  0xbe   : > { %v571_v8 = vpop.f32.mrf.mxu2  ;;  %v619_v9 = vpop.f32.mrf.mxu3 }
  0xbf   : > { %721 = vst [vmem:[%s1131_s4 + $0x28] sm:$0xff] %v657_v6  ;;  %v572_v10 = vadd.f32 %v1122_v4, %v571_v8  ;;  %v620_v11 = vadd.f32 %v1122_v4, %v619_v9 }
  0xc0   : > { %737 = vst [vmem:[%s1131_s4 + $0xa8] sm:$0xff] %v673_v7 }
  0xc1   : > { %v689_v12 = vmax.f32 %v572_v10, 0.0  ;;  %v705_v13 = vmax.f32 %v620_v11, 0.0 }
  0xc2   : > { %v478_v14 = vpop.f32.mrf.mxu0  ;;  %v526_v15 = vpop.f32.mrf.mxu1 }
  0xc3   : > { %753 = vst [vmem:[%s1131_s4 + $0x128] sm:$0xff] %v689_v12  ;;  %v479_v16 = vadd.f32 %v1122_v4, %v478_v14  ;;  %v527_v17 = vadd.f32 %v1122_v4, %v526_v15 }
  0xc4   : > { %769 = vst [vmem:[%s1131_s4 + $0x1a8] sm:$0xff] %v705_v13 }
  0xc5   : > { %v658_v18 = vmax.f32 %v479_v16, 0.0  ;;  %v674_v19 = vmax.f32 %v527_v17, 0.0 }
  0xc6   : > { %v574_v20 = vpop.f32.mrf.mxu2  ;;  %v622_v21 = vpop.f32.mrf.mxu3 }
  0xc7   : > { %722 = vst [vmem:[%s1131_s4 + $0x30] sm:$0xff] %v658_v18  ;;  %v575_v22 = vadd.f32 %v1122_v4, %v574_v20  ;;  %v623_v23 = vadd.f32 %v1122_v4, %v622_v21 }
  0xc8   : > { %738 = vst [vmem:[%s1131_s4 + $0xb0] sm:$0xff] %v674_v19 }
  0xc9   : > { %v690_v24 = vmax.f32 %v575_v22, 0.0  ;;  %v706_v25 = vmax.f32 %v623_v23, 0.0 }
  0xca   : > { %v481_v26 = vpop.f32.mrf.mxu0  ;;  %v529_v27 = vpop.f32.mrf.mxu1 }
  0xcb   : > { %754 = vst [vmem:[%s1131_s4 + $0x130] sm:$0xff] %v690_v24  ;;  %v482_v28 = vadd.f32 %v1122_v4, %v481_v26  ;;  %v530_v29 = vadd.f32 %v1122_v4, %v529_v27 }
  0xcc   : > { %770 = vst [vmem:[%s1131_s4 + $0x1b0] sm:$0xff] %v706_v25 }
  0xcd   : > { %v659_v30 = vmax.f32 %v482_v28, 0.0  ;;  %v675_v31 = vmax.f32 %v530_v29, 0.0 }
  0xce   : > { %v577_v32 = vpop.f32.mrf.mxu2  ;;  %v625_v33 = vpop.f32.mrf.mxu3 }
  0xcf   : > { %723 = vst [vmem:[%s1131_s4 + $0x38] sm:$0xff] %v659_v30  ;;  %v578_v34 = vadd.f32 %v1122_v4, %v577_v32  ;;  %v626_v35 = vadd.f32 %v1122_v4, %v625_v33 }
  0xd0   : > { %739 = vst [vmem:[%s1131_s4 + $0xb8] sm:$0xff] %v675_v31 }
  0xd1   : > { %v691_v36 = vmax.f32 %v578_v34, 0.0  ;;  %v707_v37 = vmax.f32 %v626_v35, 0.0 }
  0xd2   : > { %v484_v38 = vpop.f32.mrf.mxu0  ;;  %v532_v39 = vpop.f32.mrf.mxu1 }
  0xd3   : > { %755 = vst [vmem:[%s1131_s4 + $0x138] sm:$0xff] %v691_v36  ;;  %v485_v40 = vadd.f32 %v1122_v4, %v484_v38  ;;  %v533_v41 = vadd.f32 %v1122_v4, %v532_v39 }
  0xd4   : > { %771 = vst [vmem:[%s1131_s4 + $0x1b8] sm:$0xff] %v707_v37 }
  0xd5   : > { %v660_v42 = vmax.f32 %v485_v40, 0.0  ;;  %v676_v43 = vmax.f32 %v533_v41, 0.0 }
  0xd6   : > { %v580_v44 = vpop.f32.mrf.mxu2  ;;  %v628_v45 = vpop.f32.mrf.mxu3 }
  0xd7   : > { %724 = vst [vmem:[%s1131_s4 + $0x40] sm:$0xff] %v660_v42  ;;  %v581_v46 = vadd.f32 %v1122_v4, %v580_v44  ;;  %v629_v47 = vadd.f32 %v1122_v4, %v628_v45 }
  0xd8   : > { %740 = vst [vmem:[%s1131_s4 + $0xc0] sm:$0xff] %v676_v43 }
  0xd9   : > { %v692_v48 = vmax.f32 %v581_v46, 0.0  ;;  %v708_v49 = vmax.f32 %v629_v47, 0.0 }
  0xda   : > { %v487_v50 = vpop.f32.mrf.mxu0  ;;  %v535_v51 = vpop.f32.mrf.mxu1 }
  0xdb   : > { %756 = vst [vmem:[%s1131_s4 + $0x140] sm:$0xff] %v692_v48  ;;  %v488_v52 = vadd.f32 %v1122_v4, %v487_v50  ;;  %v536_v53 = vadd.f32 %v1122_v4, %v535_v51 }
  0xdc   : > { %772 = vst [vmem:[%s1131_s4 + $0x1c0] sm:$0xff] %v708_v49 }
  0xdd   : > { %v661_v54 = vmax.f32 %v488_v52, 0.0  ;;  %v677_v55 = vmax.f32 %v536_v53, 0.0 }
  0xde   : > { %v583_v56 = vpop.f32.mrf.mxu2  ;;  %v631_v57 = vpop.f32.mrf.mxu3 }
  0xdf   : > { %725 = vst [vmem:[%s1131_s4 + $0x48] sm:$0xff] %v661_v54  ;;  %v584_v58 = vadd.f32 %v1122_v4, %v583_v56  ;;  %v632_v59 = vadd.f32 %v1122_v4, %v631_v57 }
  0xe0   : > { %741 = vst [vmem:[%s1131_s4 + $0xc8] sm:$0xff] %v677_v55 }
  0xe1   : > { %v693_v60 = vmax.f32 %v584_v58, 0.0  ;;  %v709_v61 = vmax.f32 %v632_v59, 0.0 }
  0xe2   : > { %v490_v62 = vpop.f32.mrf.mxu0  ;;  %v538_v63 = vpop.f32.mrf.mxu1 }
  0xe3   : > { %757 = vst [vmem:[%s1131_s4 + $0x148] sm:$0xff] %v693_v60  ;;  %v491_v0 = vadd.f32 %v1122_v4, %v490_v62  ;;  %v539_v1 = vadd.f32 %v1122_v4, %v538_v63 }
  0xe4   : > { %773 = vst [vmem:[%s1131_s4 + $0x1c8] sm:$0xff] %v709_v61 }
  0xe5   : > { %v662_v2 = vmax.f32 %v491_v0, 0.0  ;;  %v678_v3 = vmax.f32 %v539_v1, 0.0 }
  0xe6   : > { %v586_v5 = vpop.f32.mrf.mxu2  ;;  %v634_v6 = vpop.f32.mrf.mxu3 }
  0xe7   : > { %726 = vst [vmem:[%s1131_s4 + $0x50] sm:$0xff] %v662_v2  ;;  %v587_v7 = vadd.f32 %v1122_v4, %v586_v5  ;;  %v635_v8 = vadd.f32 %v1122_v4, %v634_v6 }
  0xe8   : > { %742 = vst [vmem:[%s1131_s4 + $0xd0] sm:$0xff] %v678_v3 }
  0xe9   : > { %v694_v9 = vmax.f32 %v587_v7, 0.0  ;;  %v710_v10 = vmax.f32 %v635_v8, 0.0 }
  0xea   : > { %v493_v11 = vpop.f32.mrf.mxu0  ;;  %v541_v12 = vpop.f32.mrf.mxu1 }
  0xeb   : > { %758 = vst [vmem:[%s1131_s4 + $0x150] sm:$0xff] %v694_v9  ;;  %v494_v13 = vadd.f32 %v1122_v4, %v493_v11  ;;  %v542_v14 = vadd.f32 %v1122_v4, %v541_v12 }
  0xec   : > { %774 = vst [vmem:[%s1131_s4 + $0x1d0] sm:$0xff] %v710_v10 }
  0xed   : > { %v663_v15 = vmax.f32 %v494_v13, 0.0  ;;  %v679_v16 = vmax.f32 %v542_v14, 0.0 }
  0xee   : > { %v589_v17 = vpop.f32.mrf.mxu2  ;;  %v637_v18 = vpop.f32.mrf.mxu3 }
  0xef   : > { %727 = vst [vmem:[%s1131_s4 + $0x58] sm:$0xff] %v663_v15  ;;  %v590_v19 = vadd.f32 %v1122_v4, %v589_v17  ;;  %v638_v20 = vadd.f32 %v1122_v4, %v637_v18 }
  0xf0   : > { %743 = vst [vmem:[%s1131_s4 + $0xd8] sm:$0xff] %v679_v16 }
  0xf1   : > { %v695_v21 = vmax.f32 %v590_v19, 0.0  ;;  %v711_v22 = vmax.f32 %v638_v20, 0.0 }
  0xf2   : > { %v496_v23 = vpop.f32.mrf.mxu0  ;;  %v544_v24 = vpop.f32.mrf.mxu1 }
  0xf3   : > { %759 = vst [vmem:[%s1131_s4 + $0x158] sm:$0xff] %v695_v21  ;;  %v497_v25 = vadd.f32 %v1122_v4, %v496_v23  ;;  %v545_v26 = vadd.f32 %v1122_v4, %v544_v24 }
  0xf4   : > { %775 = vst [vmem:[%s1131_s4 + $0x1d8] sm:$0xff] %v711_v22 }
  0xf5   : > { %v664_v27 = vmax.f32 %v497_v25, 0.0  ;;  %v680_v28 = vmax.f32 %v545_v26, 0.0 }
  0xf6   : > { %v592_v29 = vpop.f32.mrf.mxu2  ;;  %v640_v30 = vpop.f32.mrf.mxu3 }
  0xf7   : > { %728 = vst [vmem:[%s1131_s4 + $0x60] sm:$0xff] %v664_v27  ;;  %v593_v31 = vadd.f32 %v1122_v4, %v592_v29  ;;  %v641_v32 = vadd.f32 %v1122_v4, %v640_v30 }
  0xf8   : > { %744 = vst [vmem:[%s1131_s4 + $0xe0] sm:$0xff] %v680_v28 }
  0xf9   : > { %v696_v33 = vmax.f32 %v593_v31, 0.0  ;;  %v712_v34 = vmax.f32 %v641_v32, 0.0 }
  0xfa   : > { %v499_v35 = vpop.f32.mrf.mxu0  ;;  %v547_v36 = vpop.f32.mrf.mxu1 }
  0xfb   : > { %760 = vst [vmem:[%s1131_s4 + $0x160] sm:$0xff] %v696_v33  ;;  %v500_v37 = vadd.f32 %v1122_v4, %v499_v35  ;;  %v548_v38 = vadd.f32 %v1122_v4, %v547_v36 }
  0xfc   : > { %776 = vst [vmem:[%s1131_s4 + $0x1e0] sm:$0xff] %v712_v34 }
  0xfd   : > { %v665_v39 = vmax.f32 %v500_v37, 0.0  ;;  %v681_v40 = vmax.f32 %v548_v38, 0.0 }
  0xfe   : > { %v595_v41 = vpop.f32.mrf.mxu2  ;;  %v643_v42 = vpop.f32.mrf.mxu3 }
  0xff   : > { %729 = vst [vmem:[%s1131_s4 + $0x68] sm:$0xff] %v665_v39  ;;  %v596_v43 = vadd.f32 %v1122_v4, %v595_v41  ;;  %v644_v44 = vadd.f32 %v1122_v4, %v643_v42 }
 0x100   : > { %745 = vst [vmem:[%s1131_s4 + $0xe8] sm:$0xff] %v681_v40 }
 0x101   : > { %v697_v45 = vmax.f32 %v596_v43, 0.0  ;;  %v713_v46 = vmax.f32 %v644_v44, 0.0 }
 0x102   : > { %v502_v47 = vpop.f32.mrf.mxu0  ;;  %v550_v48 = vpop.f32.mrf.mxu1 }
 0x103   : > { %761 = vst [vmem:[%s1131_s4 + $0x168] sm:$0xff] %v697_v45  ;;  %v503_v49 = vadd.f32 %v1122_v4, %v502_v47  ;;  %v551_v50 = vadd.f32 %v1122_v4, %v550_v48 }
 0x104   : > { %777 = vst [vmem:[%s1131_s4 + $0x1e8] sm:$0xff] %v713_v46 }
 0x105   : > { %v666_v51 = vmax.f32 %v503_v49, 0.0  ;;  %v682_v52 = vmax.f32 %v551_v50, 0.0 }
 0x106   : > { %v598_v53 = vpop.f32.mrf.mxu2  ;;  %v646_v54 = vpop.f32.mrf.mxu3 }
 0x107   : > { %730 = vst [vmem:[%s1131_s4 + $0x70] sm:$0xff] %v666_v51  ;;  %v599_v55 = vadd.f32 %v1122_v4, %v598_v53  ;;  %v647_v56 = vadd.f32 %v1122_v4, %v646_v54 }
 0x108   : > { %746 = vst [vmem:[%s1131_s4 + $0xf0] sm:$0xff] %v682_v52 }
 0x109   : > { %v698_v57 = vmax.f32 %v599_v55, 0.0  ;;  %v714_v58 = vmax.f32 %v647_v56, 0.0 }
 0x10a   : > { %v505_v59 = vpop.f32.mrf.mxu0  ;;  %v553_v60 = vpop.f32.mrf.mxu1 }
 0x10b   : > { %762 = vst [vmem:[%s1131_s4 + $0x170] sm:$0xff] %v698_v57  ;;  %v506_v61 = vadd.f32 %v1122_v4, %v505_v59  ;;  %v554_v62 = vadd.f32 %v1122_v4, %v553_v60 }
 0x10c   : > { %778 = vst [vmem:[%s1131_s4 + $0x1f0] sm:$0xff] %v714_v58 }
 0x10d   : > { %v667_v63 = vmax.f32 %v506_v61, 0.0  ;;  %v683_v0 = vmax.f32 %v554_v62, 0.0 }
 0x10e   : > { %v601_v1 = vpop.f32.mrf.mxu2  ;;  %v649_v2 = vpop.f32.mrf.mxu3 }
 0x10f   : > { %731 = vst [vmem:[%s1131_s4 + $0x78] sm:$0xff] %v667_v63  ;;  %v602_v3 = vadd.f32 %v1122_v4, %v601_v1  ;;  %v650_v5 = vadd.f32 %v1122_v4, %v649_v2 }
 0x110   : > { %747 = vst [vmem:[%s1131_s4 + $0xf8] sm:$0xff] %v683_v0 }
 0x111   : > { %v699_v6 = vmax.f32 %v602_v3, 0.0  ;;  %v715_v7 = vmax.f32 %v650_v5, 0.0 }
 0x113   : > { %763 = vst [vmem:[%s1131_s4 + $0x178] sm:$0xff] %v699_v6 }
 0x114   : > { %779 = vst [vmem:[%s1131_s4 + $0x1f8] sm:$0xff] %v715_v7 }
 0x115 PF: > { %s13_s12 = sadd.s32 1, %s939_s12  }
 0x116   : > { %p10_p4 = scmp.ge.s32.totalorder %s13_s12, 6  }
 0x118   :  { %12 = sbr.rel (!%p10_p4) target bundleno = 1 (0x1), region = 62 }

// kernel: _lenet5_forward.6
= control target key start
LH: loop header
LB: loop body
LE: loop exit
PB: predicated region body
PF: predicated region fallthrough
CT: control target
= control target key end

     0   :  { %s1310_s0 = inlined_call_operand.vmem [shape: f32[28,2,14,256], index: 0, kind: input, shape index: {}]   ;;  %s1311_s1 = inlined_call_operand.vmem [shape: f32[28,14,128], index: 1, kind: output, shape index: {}]  }
   0x1   :  { %v8_v0 = vld [vmem:[%s1310_s0] sm:$0xff]  ;;  %v9_v1 = vld [vmem:[%s1310_s0 + $0x8] sm:$0xff]  ;;  %v10_v5 = vld [vmem:[%s1310_s0 + $0x10] sm:$0x3f] }
   0x2   :  { %v12_v2 = vld [vmem:[%s1310_s0 + $0x20] sm:$0xff]  ;;  %v13_v3 = vld [vmem:[%s1310_s0 + $0x28] sm:$0xff]  ;;  %v11_v6 = vld [vmem:[%s1310_s0 + $0x18] sm:$0x3f] }
   0x3   :  { %v232_v4 = vmax.f32 %v8_v0, %v12_v2  ;;  %v233_v7 = vmax.f32 %v9_v1, %v13_v3  ;;  %v14_v8 = vld [vmem:[%s1310_s0 + $0x30] sm:$0x3f]  ;;  %v15_v9 = vld [vmem:[%s1310_s0 + $0x38] sm:$0x3f]  ;;  %v16_v10 = vld [vmem:[%s1310_s0 + $0x40] sm:$0xff] }
   0x4   :  { %v234_v11 = vmax.f32 %v10_v5, %v14_v8  ;;  %v235_v12 = vmax.f32 %v11_v6, %v15_v9  ;;  %v17_v13 = vld [vmem:[%s1310_s0 + $0x48] sm:$0xff]  ;;  %v20_v14 = vld [vmem:[%s1310_s0 + $0x60] sm:$0xff]  ;;  %v18_v19 = vld [vmem:[%s1310_s0 + $0x50] sm:$0x3f] }
   0x5   :  { %v21_v15 = vld [vmem:[%s1310_s0 + $0x68] sm:$0xff]  ;;  %v344_v16 = vmax.f32 %v232_v4, %v233_v7  ;;  %v236_v17 = vmax.f32 %v16_v10, %v20_v14  ;;  %v19_v20 = vld [vmem:[%s1310_s0 + $0x58] sm:$0x3f]  ;;  %v22_v21 = vld [vmem:[%s1310_s0 + $0x70] sm:$0x3f] }
   0x6   :  { %v237_v18 = vmax.f32 %v17_v13, %v21_v15  ;;  %v345_v22 = vmax.f32 %v234_v11, %v235_v12  ;;  %v23_v23 = vld [vmem:[%s1310_s0 + $0x78] sm:$0x3f]  ;;  %v238_v24 = vmax.f32 %v18_v19, %v22_v21  ;;  %v24_v25 = vld [vmem:[%s1310_s0 + $0x80] sm:$0xff]  ;;  %v25_v26 = vld [vmem:[%s1310_s0 + $0x88] sm:$0xff] }
   0x7   :  { %400 = vst [vmem:[%s1311_s1] sm:$0xff] %v344_v16  ;;  %v239_v28 = vmax.f32 %v19_v20, %v23_v23  ;;  %v28_v29 = vld [vmem:[%s1310_s0 + $0xa0] sm:$0xff]  ;;  %v29_v30 = vld [vmem:[%s1310_s0 + $0xa8] sm:$0xff]  ;;  %v26_v31 = vld [vmem:[%s1310_s0 + $0x90] sm:$0x3f] }
   0x8   :  { %v346_v27 = vmax.f32 %v236_v17, %v237_v18  ;;  %401 = vst [vmem:[%s1311_s1 + $0x8] sm:$0x3f] %v345_v22  ;;  %v240_v32 = vmax.f32 %v24_v25, %v28_v29  ;;  %v241_v33 = vmax.f32 %v25_v26, %v29_v30  ;;  %v27_v34 = vld [vmem:[%s1310_s0 + $0x98] sm:$0x3f]  ;;  %v30_v35 = vld [vmem:[%s1310_s0 + $0xb0] sm:$0x3f] }
   0x9   :  { %v347_v36 = vmax.f32 %v238_v24, %v239_v28  ;;  %v31_v37 = vld [vmem:[%s1310_s0 + $0xb8] sm:$0x3f]  ;;  %v242_v38 = vmax.f32 %v26_v31, %v30_v35  ;;  %v32_v39 = vld [vmem:[%s1310_s0 + $0xc0] sm:$0xff]  ;;  %v33_v40 = vld [vmem:[%s1310_s0 + $0xc8] sm:$0xff] }
   0xa   :  { %402 = vst [vmem:[%s1311_s1 + $0x10] sm:$0xff] %v346_v27  ;;  %v348_v41 = vmax.f32 %v240_v32, %v241_v33  ;;  %v243_v42 = vmax.f32 %v27_v34, %v31_v37  ;;  %v36_v43 = vld [vmem:[%s1310_s0 + $0xe0] sm:$0xff]  ;;  %v37_v44 = vld [vmem:[%s1310_s0 + $0xe8] sm:$0xff]  ;;  %v34_v45 = vld [vmem:[%s1310_s0 + $0xd0] sm:$0x3f] }
   0xb   :  { %403 = vst [vmem:[%s1311_s1 + $0x18] sm:$0x3f] %v347_v36  ;;  %v244_v46 = vmax.f32 %v32_v39, %v36_v43  ;;  %v245_v47 = vmax.f32 %v33_v40, %v37_v44  ;;  %v35_v48 = vld [vmem:[%s1310_s0 + $0xd8] sm:$0x3f]  ;;  %v38_v49 = vld [vmem:[%s1310_s0 + $0xf0] sm:$0x3f] }
   0xc   :  { %404 = vst [vmem:[%s1311_s1 + $0x20] sm:$0xff] %v348_v41  ;;  %v349_v50 = vmax.f32 %v242_v38, %v243_v42  ;;  %v39_v51 = vld [vmem:[%s1310_s0 + $0xf8] sm:$0x3f]  ;;  %v246_v52 = vmax.f32 %v34_v45, %v38_v49  ;;  %v40_v53 = vld [vmem:[%s1310_s0 + $0x100] sm:$0xff]  ;;  %v41_v54 = vld [vmem:[%s1310_s0 + $0x108] sm:$0xff] }
   0xd   :  { %v350_v55 = vmax.f32 %v244_v46, %v245_v47  ;;  %v247_v56 = vmax.f32 %v35_v48, %v39_v51  ;;  %v44_v57 = vld [vmem:[%s1310_s0 + $0x120] sm:$0xff]  ;;  %v45_v58 = vld [vmem:[%s1310_s0 + $0x128] sm:$0xff]  ;;  %v42_v59 = vld [vmem:[%s1310_s0 + $0x110] sm:$0x3f] }
   0xe   :  { %405 = vst [vmem:[%s1311_s1 + $0x28] sm:$0x3f] %v349_v50  ;;  %v248_v60 = vmax.f32 %v40_v53, %v44_v57  ;;  %v249_v61 = vmax.f32 %v41_v54, %v45_v58  ;;  %v43_v62 = vld [vmem:[%s1310_s0 + $0x118] sm:$0x3f]  ;;  %v46_v63 = vld [vmem:[%s1310_s0 + $0x130] sm:$0x3f] }
   0xf   :  { %406 = vst [vmem:[%s1311_s1 + $0x30] sm:$0xff] %v350_v55  ;;  %v351_v0 = vmax.f32 %v246_v52, %v247_v56  ;;  %v47_v1 = vld [vmem:[%s1310_s0 + $0x138] sm:$0x3f]  ;;  %v250_v2 = vmax.f32 %v42_v59, %v46_v63  ;;  %v48_v3 = vld [vmem:[%s1310_s0 + $0x140] sm:$0xff]  ;;  %v49_v4 = vld [vmem:[%s1310_s0 + $0x148] sm:$0xff] }
  0x10   :  { %v352_v5 = vmax.f32 %v248_v60, %v249_v61  ;;  %v251_v6 = vmax.f32 %v43_v62, %v47_v1  ;;  %v52_v7 = vld [vmem:[%s1310_s0 + $0x160] sm:$0xff]  ;;  %v53_v8 = vld [vmem:[%s1310_s0 + $0x168] sm:$0xff]  ;;  %v50_v9 = vld [vmem:[%s1310_s0 + $0x150] sm:$0x3f] }
  0x11   :  { %407 = vst [vmem:[%s1311_s1 + $0x38] sm:$0x3f] %v351_v0  ;;  %v252_v10 = vmax.f32 %v48_v3, %v52_v7  ;;  %v253_v11 = vmax.f32 %v49_v4, %v53_v8  ;;  %v51_v12 = vld [vmem:[%s1310_s0 + $0x158] sm:$0x3f]  ;;  %v54_v13 = vld [vmem:[%s1310_s0 + $0x170] sm:$0x3f] }
  0x12   :  { %408 = vst [vmem:[%s1311_s1 + $0x40] sm:$0xff] %v352_v5  ;;  %v353_v14 = vmax.f32 %v250_v2, %v251_v6  ;;  %v55_v15 = vld [vmem:[%s1310_s0 + $0x178] sm:$0x3f]  ;;  %v254_v16 = vmax.f32 %v50_v9, %v54_v13  ;;  %v56_v17 = vld [vmem:[%s1310_s0 + $0x180] sm:$0xff]  ;;  %v57_v18 = vld [vmem:[%s1310_s0 + $0x188] sm:$0xff] }
  0x13   :  { %v354_v19 = vmax.f32 %v252_v10, %v253_v11  ;;  %v255_v20 = vmax.f32 %v51_v12, %v55_v15  ;;  %v60_v21 = vld [vmem:[%s1310_s0 + $0x1a0] sm:$0xff]  ;;  %v61_v22 = vld [vmem:[%s1310_s0 + $0x1a8] sm:$0xff]  ;;  %v58_v23 = vld [vmem:[%s1310_s0 + $0x190] sm:$0x3f] }
  0x14   :  { %409 = vst [vmem:[%s1311_s1 + $0x48] sm:$0x3f] %v353_v14  ;;  %v256_v24 = vmax.f32 %v56_v17, %v60_v21  ;;  %v257_v25 = vmax.f32 %v57_v18, %v61_v22  ;;  %v59_v26 = vld [vmem:[%s1310_s0 + $0x198] sm:$0x3f]  ;;  %v62_v27 = vld [vmem:[%s1310_s0 + $0x1b0] sm:$0x3f] }
  0x15   :  { %410 = vst [vmem:[%s1311_s1 + $0x50] sm:$0xff] %v354_v19  ;;  %v355_v28 = vmax.f32 %v254_v16, %v255_v20  ;;  %v63_v29 = vld [vmem:[%s1310_s0 + $0x1b8] sm:$0x3f]  ;;  %v258_v30 = vmax.f32 %v58_v23, %v62_v27  ;;  %v64_v31 = vld [vmem:[%s1310_s0 + $0x1c0] sm:$0xff]  ;;  %v65_v32 = vld [vmem:[%s1310_s0 + $0x1c8] sm:$0xff] }
  0x16   :  { %v356_v33 = vmax.f32 %v256_v24, %v257_v25  ;;  %v259_v34 = vmax.f32 %v59_v26, %v63_v29  ;;  %v68_v35 = vld [vmem:[%s1310_s0 + $0x1e0] sm:$0xff]  ;;  %v69_v36 = vld [vmem:[%s1310_s0 + $0x1e8] sm:$0xff]  ;;  %v66_v37 = vld [vmem:[%s1310_s0 + $0x1d0] sm:$0x3f] }
  0x17   :  { %411 = vst [vmem:[%s1311_s1 + $0x58] sm:$0x3f] %v355_v28  ;;  %v260_v38 = vmax.f32 %v64_v31, %v68_v35  ;;  %v261_v39 = vmax.f32 %v65_v32, %v69_v36  ;;  %v67_v40 = vld [vmem:[%s1310_s0 + $0x1d8] sm:$0x3f]  ;;  %v70_v41 = vld [vmem:[%s1310_s0 + $0x1f0] sm:$0x3f] }
  0x18   :  { %412 = vst [vmem:[%s1311_s1 + $0x60] sm:$0xff] %v356_v33  ;;  %v357_v42 = vmax.f32 %v258_v30, %v259_v34  ;;  %v71_v43 = vld [vmem:[%s1310_s0 + $0x1f8] sm:$0x3f]  ;;  %v262_v44 = vmax.f32 %v66_v37, %v70_v41  ;;  %v72_v45 = vld [vmem:[%s1310_s0 + $0x200] sm:$0xff]  ;;  %v73_v46 = vld [vmem:[%s1310_s0 + $0x208] sm:$0xff] }
  0x19   :  { %v358_v47 = vmax.f32 %v260_v38, %v261_v39  ;;  %v263_v48 = vmax.f32 %v67_v40, %v71_v43  ;;  %v76_v49 = vld [vmem:[%s1310_s0 + $0x220] sm:$0xff]  ;;  %v77_v50 = vld [vmem:[%s1310_s0 + $0x228] sm:$0xff]  ;;  %v74_v51 = vld [vmem:[%s1310_s0 + $0x210] sm:$0x3f] }
  0x1a   :  { %413 = vst [vmem:[%s1311_s1 + $0x68] sm:$0x3f] %v357_v42  ;;  %v264_v52 = vmax.f32 %v72_v45, %v76_v49  ;;  %v265_v53 = vmax.f32 %v73_v46, %v77_v50  ;;  %v75_v54 = vld [vmem:[%s1310_s0 + $0x218] sm:$0x3f]  ;;  %v78_v55 = vld [vmem:[%s1310_s0 + $0x230] sm:$0x3f] }
  0x1b   :  { %414 = vst [vmem:[%s1311_s1 + $0x70] sm:$0xff] %v358_v47  ;;  %v359_v56 = vmax.f32 %v262_v44, %v263_v48  ;;  %v79_v57 = vld [vmem:[%s1310_s0 + $0x238] sm:$0x3f]  ;;  %v266_v58 = vmax.f32 %v74_v51, %v78_v55  ;;  %v80_v59 = vld [vmem:[%s1310_s0 + $0x240] sm:$0xff]  ;;  %v81_v60 = vld [vmem:[%s1310_s0 + $0x248] sm:$0xff] }
  0x1c   :  { %v360_v61 = vmax.f32 %v264_v52, %v265_v53  ;;  %v267_v62 = vmax.f32 %v75_v54, %v79_v57  ;;  %v84_v63 = vld [vmem:[%s1310_s0 + $0x260] sm:$0xff]  ;;  %v85_v0 = vld [vmem:[%s1310_s0 + $0x268] sm:$0xff]  ;;  %v82_v1 = vld [vmem:[%s1310_s0 + $0x250] sm:$0x3f] }
  0x1d   :  { %415 = vst [vmem:[%s1311_s1 + $0x78] sm:$0x3f] %v359_v56  ;;  %v268_v2 = vmax.f32 %v80_v59, %v84_v63  ;;  %v269_v3 = vmax.f32 %v81_v60, %v85_v0  ;;  %v83_v4 = vld [vmem:[%s1310_s0 + $0x258] sm:$0x3f]  ;;  %v86_v5 = vld [vmem:[%s1310_s0 + $0x270] sm:$0x3f] }
  0x1e   :  { %416 = vst [vmem:[%s1311_s1 + $0x80] sm:$0xff] %v360_v61  ;;  %v361_v6 = vmax.f32 %v266_v58, %v267_v62  ;;  %v87_v7 = vld [vmem:[%s1310_s0 + $0x278] sm:$0x3f]  ;;  %v270_v8 = vmax.f32 %v82_v1, %v86_v5  ;;  %v88_v9 = vld [vmem:[%s1310_s0 + $0x280] sm:$0xff]  ;;  %v89_v10 = vld [vmem:[%s1310_s0 + $0x288] sm:$0xff] }
  0x1f   :  { %v362_v11 = vmax.f32 %v268_v2, %v269_v3  ;;  %v271_v12 = vmax.f32 %v83_v4, %v87_v7  ;;  %v92_v13 = vld [vmem:[%s1310_s0 + $0x2a0] sm:$0xff]  ;;  %v93_v14 = vld [vmem:[%s1310_s0 + $0x2a8] sm:$0xff]  ;;  %v90_v15 = vld [vmem:[%s1310_s0 + $0x290] sm:$0x3f] }
  0x20   :  { %417 = vst [vmem:[%s1311_s1 + $0x88] sm:$0x3f] %v361_v6  ;;  %v272_v16 = vmax.f32 %v88_v9, %v92_v13  ;;  %v273_v17 = vmax.f32 %v89_v10, %v93_v14  ;;  %v91_v18 = vld [vmem:[%s1310_s0 + $0x298] sm:$0x3f]  ;;  %v94_v19 = vld [vmem:[%s1310_s0 + $0x2b0] sm:$0x3f] }
  0x21   :  { %418 = vst [vmem:[%s1311_s1 + $0x90] sm:$0xff] %v362_v11  ;;  %v363_v20 = vmax.f32 %v270_v8, %v271_v12  ;;  %v95_v21 = vld [vmem:[%s1310_s0 + $0x2b8] sm:$0x3f]  ;;  %v274_v22 = vmax.f32 %v90_v15, %v94_v19  ;;  %v96_v23 = vld [vmem:[%s1310_s0 + $0x2c0] sm:$0xff]  ;;  %v97_v24 = vld [vmem:[%s1310_s0 + $0x2c8] sm:$0xff] }
  0x22   :  { %v364_v25 = vmax.f32 %v272_v16, %v273_v17  ;;  %v275_v26 = vmax.f32 %v91_v18, %v95_v21  ;;  %v100_v27 = vld [vmem:[%s1310_s0 + $0x2e0] sm:$0xff]  ;;  %v101_v28 = vld [vmem:[%s1310_s0 + $0x2e8] sm:$0xff]  ;;  %v98_v29 = vld [vmem:[%s1310_s0 + $0x2d0] sm:$0x3f] }
  0x23   :  { %419 = vst [vmem:[%s1311_s1 + $0x98] sm:$0x3f] %v363_v20  ;;  %v276_v30 = vmax.f32 %v96_v23, %v100_v27  ;;  %v277_v31 = vmax.f32 %v97_v24, %v101_v28  ;;  %v99_v32 = vld [vmem:[%s1310_s0 + $0x2d8] sm:$0x3f]  ;;  %v102_v33 = vld [vmem:[%s1310_s0 + $0x2f0] sm:$0x3f] }
  0x24   :  { %420 = vst [vmem:[%s1311_s1 + $0xa0] sm:$0xff] %v364_v25  ;;  %v365_v34 = vmax.f32 %v274_v22, %v275_v26  ;;  %v103_v35 = vld [vmem:[%s1310_s0 + $0x2f8] sm:$0x3f]  ;;  %v278_v36 = vmax.f32 %v98_v29, %v102_v33  ;;  %v104_v37 = vld [vmem:[%s1310_s0 + $0x300] sm:$0xff]  ;;  %v105_v38 = vld [vmem:[%s1310_s0 + $0x308] sm:$0xff] }
  0x25   :  { %v366_v39 = vmax.f32 %v276_v30, %v277_v31  ;;  %v279_v40 = vmax.f32 %v99_v32, %v103_v35  ;;  %v108_v41 = vld [vmem:[%s1310_s0 + $0x320] sm:$0xff]  ;;  %v109_v42 = vld [vmem:[%s1310_s0 + $0x328] sm:$0xff]  ;;  %v106_v43 = vld [vmem:[%s1310_s0 + $0x310] sm:$0x3f] }
  0x26   :  { %421 = vst [vmem:[%s1311_s1 + $0xa8] sm:$0x3f] %v365_v34  ;;  %v280_v44 = vmax.f32 %v104_v37, %v108_v41  ;;  %v281_v45 = vmax.f32 %v105_v38, %v109_v42  ;;  %v107_v46 = vld [vmem:[%s1310_s0 + $0x318] sm:$0x3f]  ;;  %v110_v47 = vld [vmem:[%s1310_s0 + $0x330] sm:$0x3f] }
  0x27   :  { %422 = vst [vmem:[%s1311_s1 + $0xb0] sm:$0xff] %v366_v39  ;;  %v367_v48 = vmax.f32 %v278_v36, %v279_v40  ;;  %v111_v49 = vld [vmem:[%s1310_s0 + $0x338] sm:$0x3f]  ;;  %v282_v50 = vmax.f32 %v106_v43, %v110_v47  ;;  %v112_v51 = vld [vmem:[%s1310_s0 + $0x340] sm:$0xff]  ;;  %v113_v52 = vld [vmem:[%s1310_s0 + $0x348] sm:$0xff] }
  0x28   :  { %v368_v53 = vmax.f32 %v280_v44, %v281_v45  ;;  %v283_v54 = vmax.f32 %v107_v46, %v111_v49  ;;  %v116_v55 = vld [vmem:[%s1310_s0 + $0x360] sm:$0xff]  ;;  %v117_v56 = vld [vmem:[%s1310_s0 + $0x368] sm:$0xff]  ;;  %v114_v57 = vld [vmem:[%s1310_s0 + $0x350] sm:$0x3f] }
  0x29   :  { %423 = vst [vmem:[%s1311_s1 + $0xb8] sm:$0x3f] %v367_v48  ;;  %v284_v58 = vmax.f32 %v112_v51, %v116_v55  ;;  %v285_v59 = vmax.f32 %v113_v52, %v117_v56  ;;  %v115_v60 = vld [vmem:[%s1310_s0 + $0x358] sm:$0x3f]  ;;  %v118_v61 = vld [vmem:[%s1310_s0 + $0x370] sm:$0x3f] }
  0x2a   :  { %424 = vst [vmem:[%s1311_s1 + $0xc0] sm:$0xff] %v368_v53  ;;  %v369_v62 = vmax.f32 %v282_v50, %v283_v54  ;;  %v119_v63 = vld [vmem:[%s1310_s0 + $0x378] sm:$0x3f]  ;;  %v286_v0 = vmax.f32 %v114_v57, %v118_v61  ;;  %v120_v1 = vld [vmem:[%s1310_s0 + $0x380] sm:$0xff]  ;;  %v121_v2 = vld [vmem:[%s1310_s0 + $0x388] sm:$0xff] }
  0x2b   :  { %v370_v3 = vmax.f32 %v284_v58, %v285_v59  ;;  %v287_v4 = vmax.f32 %v115_v60, %v119_v63  ;;  %v124_v5 = vld [vmem:[%s1310_s0 + $0x3a0] sm:$0xff]  ;;  %v125_v6 = vld [vmem:[%s1310_s0 + $0x3a8] sm:$0xff]  ;;  %v122_v7 = vld [vmem:[%s1310_s0 + $0x390] sm:$0x3f] }
  0x2c   :  { %425 = vst [vmem:[%s1311_s1 + $0xc8] sm:$0x3f] %v369_v62  ;;  %v288_v8 = vmax.f32 %v120_v1, %v124_v5  ;;  %v289_v9 = vmax.f32 %v121_v2, %v125_v6  ;;  %v123_v10 = vld [vmem:[%s1310_s0 + $0x398] sm:$0x3f]  ;;  %v126_v11 = vld [vmem:[%s1310_s0 + $0x3b0] sm:$0x3f] }
  0x2d   :  { %426 = vst [vmem:[%s1311_s1 + $0xd0] sm:$0xff] %v370_v3  ;;  %v371_v12 = vmax.f32 %v286_v0, %v287_v4  ;;  %v127_v13 = vld [vmem:[%s1310_s0 + $0x3b8] sm:$0x3f]  ;;  %v290_v14 = vmax.f32 %v122_v7, %v126_v11  ;;  %v128_v15 = vld [vmem:[%s1310_s0 + $0x3c0] sm:$0xff]  ;;  %v129_v16 = vld [vmem:[%s1310_s0 + $0x3c8] sm:$0xff] }
  0x2e   :  { %v372_v17 = vmax.f32 %v288_v8, %v289_v9  ;;  %v291_v18 = vmax.f32 %v123_v10, %v127_v13  ;;  %v132_v19 = vld [vmem:[%s1310_s0 + $0x3e0] sm:$0xff]  ;;  %v133_v20 = vld [vmem:[%s1310_s0 + $0x3e8] sm:$0xff]  ;;  %v130_v21 = vld [vmem:[%s1310_s0 + $0x3d0] sm:$0x3f] }
  0x2f   :  { %427 = vst [vmem:[%s1311_s1 + $0xd8] sm:$0x3f] %v371_v12  ;;  %v292_v22 = vmax.f32 %v128_v15, %v132_v19  ;;  %v293_v23 = vmax.f32 %v129_v16, %v133_v20  ;;  %v131_v24 = vld [vmem:[%s1310_s0 + $0x3d8] sm:$0x3f]  ;;  %v134_v25 = vld [vmem:[%s1310_s0 + $0x3f0] sm:$0x3f] }
  0x30   :  { %428 = vst [vmem:[%s1311_s1 + $0xe0] sm:$0xff] %v372_v17  ;;  %v373_v26 = vmax.f32 %v290_v14, %v291_v18  ;;  %v135_v27 = vld [vmem:[%s1310_s0 + $0x3f8] sm:$0x3f]  ;;  %v294_v28 = vmax.f32 %v130_v21, %v134_v25  ;;  %v136_v29 = vld [vmem:[%s1310_s0 + $0x400] sm:$0xff]  ;;  %v137_v30 = vld [vmem:[%s1310_s0 + $0x408] sm:$0xff] }
  0x31   :  { %v374_v31 = vmax.f32 %v292_v22, %v293_v23  ;;  %v295_v32 = vmax.f32 %v131_v24, %v135_v27  ;;  %v140_v33 = vld [vmem:[%s1310_s0 + $0x420] sm:$0xff]  ;;  %v141_v34 = vld [vmem:[%s1310_s0 + $0x428] sm:$0xff]  ;;  %v138_v35 = vld [vmem:[%s1310_s0 + $0x410] sm:$0x3f] }
  0x32   :  { %429 = vst [vmem:[%s1311_s1 + $0xe8] sm:$0x3f] %v373_v26  ;;  %v296_v36 = vmax.f32 %v136_v29, %v140_v33  ;;  %v297_v37 = vmax.f32 %v137_v30, %v141_v34  ;;  %v139_v38 = vld [vmem:[%s1310_s0 + $0x418] sm:$0x3f]  ;;  %v142_v39 = vld [vmem:[%s1310_s0 + $0x430] sm:$0x3f] }
  0x33   :  { %430 = vst [vmem:[%s1311_s1 + $0xf0] sm:$0xff] %v374_v31  ;;  %v375_v40 = vmax.f32 %v294_v28, %v295_v32  ;;  %v143_v41 = vld [vmem:[%s1310_s0 + $0x438] sm:$0x3f]  ;;  %v298_v42 = vmax.f32 %v138_v35, %v142_v39  ;;  %v144_v43 = vld [vmem:[%s1310_s0 + $0x440] sm:$0xff]  ;;  %v145_v44 = vld [vmem:[%s1310_s0 + $0x448] sm:$0xff] }
  0x34   :  { %v376_v45 = vmax.f32 %v296_v36, %v297_v37  ;;  %v299_v46 = vmax.f32 %v139_v38, %v143_v41  ;;  %v148_v47 = vld [vmem:[%s1310_s0 + $0x460] sm:$0xff]  ;;  %v149_v48 = vld [vmem:[%s1310_s0 + $0x468] sm:$0xff]  ;;  %v146_v49 = vld [vmem:[%s1310_s0 + $0x450] sm:$0x3f] }
  0x35   :  { %431 = vst [vmem:[%s1311_s1 + $0xf8] sm:$0x3f] %v375_v40  ;;  %v300_v50 = vmax.f32 %v144_v43, %v148_v47  ;;  %v301_v51 = vmax.f32 %v145_v44, %v149_v48  ;;  %v147_v52 = vld [vmem:[%s1310_s0 + $0x458] sm:$0x3f]  ;;  %v150_v53 = vld [vmem:[%s1310_s0 + $0x470] sm:$0x3f] }
  0x36   :  { %432 = vst [vmem:[%s1311_s1 + $0x100] sm:$0xff] %v376_v45  ;;  %v377_v54 = vmax.f32 %v298_v42, %v299_v46  ;;  %v151_v55 = vld [vmem:[%s1310_s0 + $0x478] sm:$0x3f]  ;;  %v302_v56 = vmax.f32 %v146_v49, %v150_v53  ;;  %v152_v57 = vld [vmem:[%s1310_s0 + $0x480] sm:$0xff]  ;;  %v153_v58 = vld [vmem:[%s1310_s0 + $0x488] sm:$0xff] }
  0x37   :  { %v378_v59 = vmax.f32 %v300_v50, %v301_v51  ;;  %v303_v60 = vmax.f32 %v147_v52, %v151_v55  ;;  %v156_v61 = vld [vmem:[%s1310_s0 + $0x4a0] sm:$0xff]  ;;  %v157_v62 = vld [vmem:[%s1310_s0 + $0x4a8] sm:$0xff]  ;;  %v154_v63 = vld [vmem:[%s1310_s0 + $0x490] sm:$0x3f] }
  0x38   :  { %433 = vst [vmem:[%s1311_s1 + $0x108] sm:$0x3f] %v377_v54  ;;  %v304_v0 = vmax.f32 %v152_v57, %v156_v61  ;;  %v305_v1 = vmax.f32 %v153_v58, %v157_v62  ;;  %v155_v2 = vld [vmem:[%s1310_s0 + $0x498] sm:$0x3f]  ;;  %v158_v3 = vld [vmem:[%s1310_s0 + $0x4b0] sm:$0x3f] }
  0x39   :  { %434 = vst [vmem:[%s1311_s1 + $0x110] sm:$0xff] %v378_v59  ;;  %v379_v4 = vmax.f32 %v302_v56, %v303_v60  ;;  %v159_v5 = vld [vmem:[%s1310_s0 + $0x4b8] sm:$0x3f]  ;;  %v306_v6 = vmax.f32 %v154_v63, %v158_v3  ;;  %v160_v7 = vld [vmem:[%s1310_s0 + $0x4c0] sm:$0xff]  ;;  %v161_v8 = vld [vmem:[%s1310_s0 + $0x4c8] sm:$0xff] }
  0x3a   :  { %v380_v9 = vmax.f32 %v304_v0, %v305_v1  ;;  %v307_v10 = vmax.f32 %v155_v2, %v159_v5  ;;  %v164_v11 = vld [vmem:[%s1310_s0 + $0x4e0] sm:$0xff]  ;;  %v165_v12 = vld [vmem:[%s1310_s0 + $0x4e8] sm:$0xff]  ;;  %v162_v13 = vld [vmem:[%s1310_s0 + $0x4d0] sm:$0x3f] }
  0x3b   :  { %435 = vst [vmem:[%s1311_s1 + $0x118] sm:$0x3f] %v379_v4  ;;  %v308_v14 = vmax.f32 %v160_v7, %v164_v11  ;;  %v309_v15 = vmax.f32 %v161_v8, %v165_v12  ;;  %v163_v16 = vld [vmem:[%s1310_s0 + $0x4d8] sm:$0x3f]  ;;  %v166_v17 = vld [vmem:[%s1310_s0 + $0x4f0] sm:$0x3f] }
  0x3c   :  { %436 = vst [vmem:[%s1311_s1 + $0x120] sm:$0xff] %v380_v9  ;;  %v381_v18 = vmax.f32 %v306_v6, %v307_v10  ;;  %v167_v19 = vld [vmem:[%s1310_s0 + $0x4f8] sm:$0x3f]  ;;  %v310_v20 = vmax.f32 %v162_v13, %v166_v17  ;;  %v168_v21 = vld [vmem:[%s1310_s0 + $0x500] sm:$0xff]  ;;  %v169_v22 = vld [vmem:[%s1310_s0 + $0x508] sm:$0xff] }
  0x3d   :  { %v382_v23 = vmax.f32 %v308_v14, %v309_v15  ;;  %v311_v24 = vmax.f32 %v163_v16, %v167_v19  ;;  %v172_v25 = vld [vmem:[%s1310_s0 + $0x520] sm:$0xff]  ;;  %v173_v26 = vld [vmem:[%s1310_s0 + $0x528] sm:$0xff]  ;;  %v170_v27 = vld [vmem:[%s1310_s0 + $0x510] sm:$0x3f] }
  0x3e   :  { %437 = vst [vmem:[%s1311_s1 + $0x128] sm:$0x3f] %v381_v18  ;;  %v312_v28 = vmax.f32 %v168_v21, %v172_v25  ;;  %v313_v29 = vmax.f32 %v169_v22, %v173_v26  ;;  %v171_v30 = vld [vmem:[%s1310_s0 + $0x518] sm:$0x3f]  ;;  %v174_v31 = vld [vmem:[%s1310_s0 + $0x530] sm:$0x3f] }
  0x3f   :  { %438 = vst [vmem:[%s1311_s1 + $0x130] sm:$0xff] %v382_v23  ;;  %v383_v32 = vmax.f32 %v310_v20, %v311_v24  ;;  %v175_v33 = vld [vmem:[%s1310_s0 + $0x538] sm:$0x3f]  ;;  %v314_v34 = vmax.f32 %v170_v27, %v174_v31  ;;  %v176_v35 = vld [vmem:[%s1310_s0 + $0x540] sm:$0xff]  ;;  %v177_v36 = vld [vmem:[%s1310_s0 + $0x548] sm:$0xff] }
  0x40   :  { %v384_v37 = vmax.f32 %v312_v28, %v313_v29  ;;  %v315_v38 = vmax.f32 %v171_v30, %v175_v33  ;;  %v180_v39 = vld [vmem:[%s1310_s0 + $0x560] sm:$0xff]  ;;  %v181_v40 = vld [vmem:[%s1310_s0 + $0x568] sm:$0xff]  ;;  %v178_v41 = vld [vmem:[%s1310_s0 + $0x550] sm:$0x3f] }
  0x41   :  { %439 = vst [vmem:[%s1311_s1 + $0x138] sm:$0x3f] %v383_v32  ;;  %v316_v42 = vmax.f32 %v176_v35, %v180_v39  ;;  %v317_v43 = vmax.f32 %v177_v36, %v181_v40  ;;  %v179_v44 = vld [vmem:[%s1310_s0 + $0x558] sm:$0x3f]  ;;  %v182_v45 = vld [vmem:[%s1310_s0 + $0x570] sm:$0x3f] }
  0x42   :  { %440 = vst [vmem:[%s1311_s1 + $0x140] sm:$0xff] %v384_v37  ;;  %v385_v46 = vmax.f32 %v314_v34, %v315_v38  ;;  %v183_v47 = vld [vmem:[%s1310_s0 + $0x578] sm:$0x3f]  ;;  %v318_v48 = vmax.f32 %v178_v41, %v182_v45  ;;  %v184_v49 = vld [vmem:[%s1310_s0 + $0x580] sm:$0xff]  ;;  %v185_v50 = vld [vmem:[%s1310_s0 + $0x588] sm:$0xff] }
  0x43   :  { %v386_v51 = vmax.f32 %v316_v42, %v317_v43  ;;  %v319_v52 = vmax.f32 %v179_v44, %v183_v47  ;;  %v188_v53 = vld [vmem:[%s1310_s0 + $0x5a0] sm:$0xff]  ;;  %v189_v54 = vld [vmem:[%s1310_s0 + $0x5a8] sm:$0xff]  ;;  %v186_v55 = vld [vmem:[%s1310_s0 + $0x590] sm:$0x3f] }
  0x44   :  { %441 = vst [vmem:[%s1311_s1 + $0x148] sm:$0x3f] %v385_v46  ;;  %v320_v56 = vmax.f32 %v184_v49, %v188_v53  ;;  %v321_v57 = vmax.f32 %v185_v50, %v189_v54  ;;  %v187_v58 = vld [vmem:[%s1310_s0 + $0x598] sm:$0x3f]  ;;  %v190_v59 = vld [vmem:[%s1310_s0 + $0x5b0] sm:$0x3f] }
  0x45   :  { %442 = vst [vmem:[%s1311_s1 + $0x150] sm:$0xff] %v386_v51  ;;  %v387_v60 = vmax.f32 %v318_v48, %v319_v52  ;;  %v191_v61 = vld [vmem:[%s1310_s0 + $0x5b8] sm:$0x3f]  ;;  %v322_v62 = vmax.f32 %v186_v55, %v190_v59  ;;  %v192_v63 = vld [vmem:[%s1310_s0 + $0x5c0] sm:$0xff]  ;;  %v193_v0 = vld [vmem:[%s1310_s0 + $0x5c8] sm:$0xff] }
  0x46   :  { %v388_v1 = vmax.f32 %v320_v56, %v321_v57  ;;  %v323_v2 = vmax.f32 %v187_v58, %v191_v61  ;;  %v196_v3 = vld [vmem:[%s1310_s0 + $0x5e0] sm:$0xff]  ;;  %v197_v4 = vld [vmem:[%s1310_s0 + $0x5e8] sm:$0xff]  ;;  %v194_v5 = vld [vmem:[%s1310_s0 + $0x5d0] sm:$0x3f] }
  0x47   :  { %443 = vst [vmem:[%s1311_s1 + $0x158] sm:$0x3f] %v387_v60  ;;  %v324_v6 = vmax.f32 %v192_v63, %v196_v3  ;;  %v325_v7 = vmax.f32 %v193_v0, %v197_v4  ;;  %v195_v8 = vld [vmem:[%s1310_s0 + $0x5d8] sm:$0x3f]  ;;  %v198_v9 = vld [vmem:[%s1310_s0 + $0x5f0] sm:$0x3f] }
  0x48   :  { %444 = vst [vmem:[%s1311_s1 + $0x160] sm:$0xff] %v388_v1  ;;  %v389_v10 = vmax.f32 %v322_v62, %v323_v2  ;;  %v199_v11 = vld [vmem:[%s1310_s0 + $0x5f8] sm:$0x3f]  ;;  %v326_v12 = vmax.f32 %v194_v5, %v198_v9  ;;  %v200_v13 = vld [vmem:[%s1310_s0 + $0x600] sm:$0xff]  ;;  %v201_v14 = vld [vmem:[%s1310_s0 + $0x608] sm:$0xff] }
  0x49   :  { %v390_v15 = vmax.f32 %v324_v6, %v325_v7  ;;  %v327_v16 = vmax.f32 %v195_v8, %v199_v11  ;;  %v204_v17 = vld [vmem:[%s1310_s0 + $0x620] sm:$0xff]  ;;  %v205_v18 = vld [vmem:[%s1310_s0 + $0x628] sm:$0xff]  ;;  %v202_v19 = vld [vmem:[%s1310_s0 + $0x610] sm:$0x3f] }
  0x4a   :  { %445 = vst [vmem:[%s1311_s1 + $0x168] sm:$0x3f] %v389_v10  ;;  %v328_v20 = vmax.f32 %v200_v13, %v204_v17  ;;  %v329_v21 = vmax.f32 %v201_v14, %v205_v18  ;;  %v203_v22 = vld [vmem:[%s1310_s0 + $0x618] sm:$0x3f]  ;;  %v206_v23 = vld [vmem:[%s1310_s0 + $0x630] sm:$0x3f] }
  0x4b   :  { %446 = vst [vmem:[%s1311_s1 + $0x170] sm:$0xff] %v390_v15  ;;  %v391_v24 = vmax.f32 %v326_v12, %v327_v16  ;;  %v207_v25 = vld [vmem:[%s1310_s0 + $0x638] sm:$0x3f]  ;;  %v330_v26 = vmax.f32 %v202_v19, %v206_v23  ;;  %v208_v27 = vld [vmem:[%s1310_s0 + $0x640] sm:$0xff]  ;;  %v209_v28 = vld [vmem:[%s1310_s0 + $0x648] sm:$0xff] }
  0x4c   :  { %v392_v29 = vmax.f32 %v328_v20, %v329_v21  ;;  %v331_v30 = vmax.f32 %v203_v22, %v207_v25  ;;  %v212_v31 = vld [vmem:[%s1310_s0 + $0x660] sm:$0xff]  ;;  %v213_v32 = vld [vmem:[%s1310_s0 + $0x668] sm:$0xff]  ;;  %v210_v33 = vld [vmem:[%s1310_s0 + $0x650] sm:$0x3f] }
  0x4d   :  { %447 = vst [vmem:[%s1311_s1 + $0x178] sm:$0x3f] %v391_v24  ;;  %v332_v34 = vmax.f32 %v208_v27, %v212_v31  ;;  %v333_v35 = vmax.f32 %v209_v28, %v213_v32  ;;  %v211_v36 = vld [vmem:[%s1310_s0 + $0x658] sm:$0x3f]  ;;  %v214_v37 = vld [vmem:[%s1310_s0 + $0x670] sm:$0x3f] }
  0x4e   :  { %448 = vst [vmem:[%s1311_s1 + $0x180] sm:$0xff] %v392_v29  ;;  %v393_v38 = vmax.f32 %v330_v26, %v331_v30  ;;  %v215_v39 = vld [vmem:[%s1310_s0 + $0x678] sm:$0x3f]  ;;  %v334_v40 = vmax.f32 %v210_v33, %v214_v37  ;;  %v216_v41 = vld [vmem:[%s1310_s0 + $0x680] sm:$0xff]  ;;  %v217_v42 = vld [vmem:[%s1310_s0 + $0x688] sm:$0xff] }
  0x4f   :  { %v394_v43 = vmax.f32 %v332_v34, %v333_v35  ;;  %v335_v44 = vmax.f32 %v211_v36, %v215_v39  ;;  %v220_v45 = vld [vmem:[%s1310_s0 + $0x6a0] sm:$0xff]  ;;  %v221_v46 = vld [vmem:[%s1310_s0 + $0x6a8] sm:$0xff]  ;;  %v218_v47 = vld [vmem:[%s1310_s0 + $0x690] sm:$0x3f] }
  0x50   :  { %449 = vst [vmem:[%s1311_s1 + $0x188] sm:$0x3f] %v393_v38  ;;  %v336_v48 = vmax.f32 %v216_v41, %v220_v45  ;;  %v337_v49 = vmax.f32 %v217_v42, %v221_v46  ;;  %v219_v50 = vld [vmem:[%s1310_s0 + $0x698] sm:$0x3f]  ;;  %v222_v51 = vld [vmem:[%s1310_s0 + $0x6b0] sm:$0x3f] }
  0x51   :  { %450 = vst [vmem:[%s1311_s1 + $0x190] sm:$0xff] %v394_v43  ;;  %v395_v52 = vmax.f32 %v334_v40, %v335_v44  ;;  %v223_v53 = vld [vmem:[%s1310_s0 + $0x6b8] sm:$0x3f]  ;;  %v338_v54 = vmax.f32 %v218_v47, %v222_v51  ;;  %v224_v55 = vld [vmem:[%s1310_s0 + $0x6c0] sm:$0xff]  ;;  %v225_v56 = vld [vmem:[%s1310_s0 + $0x6c8] sm:$0xff] }
  0x52   :  { %v396_v57 = vmax.f32 %v336_v48, %v337_v49  ;;  %v339_v58 = vmax.f32 %v219_v50, %v223_v53  ;;  %v228_v59 = vld [vmem:[%s1310_s0 + $0x6e0] sm:$0xff]  ;;  %v229_v60 = vld [vmem:[%s1310_s0 + $0x6e8] sm:$0xff]  ;;  %v226_v61 = vld [vmem:[%s1310_s0 + $0x6d0] sm:$0x3f] }
  0x53   :  { %451 = vst [vmem:[%s1311_s1 + $0x198] sm:$0x3f] %v395_v52  ;;  %v340_v62 = vmax.f32 %v224_v55, %v228_v59  ;;  %v341_v63 = vmax.f32 %v225_v56, %v229_v60  ;;  %v227_v0 = vld [vmem:[%s1310_s0 + $0x6d8] sm:$0x3f]  ;;  %v230_v1 = vld [vmem:[%s1310_s0 + $0x6f0] sm:$0x3f] }
  0x54   :  { %452 = vst [vmem:[%s1311_s1 + $0x1a0] sm:$0xff] %v396_v57  ;;  %v397_v2 = vmax.f32 %v338_v54, %v339_v58  ;;  %v231_v3 = vld [vmem:[%s1310_s0 + $0x6f8] sm:$0x3f]  ;;  %v342_v4 = vmax.f32 %v226_v61, %v230_v1 }
  0x55   :  { %v398_v5 = vmax.f32 %v340_v62, %v341_v63  ;;  %v343_v6 = vmax.f32 %v227_v0, %v231_v3 }
  0x56   :  { %453 = vst [vmem:[%s1311_s1 + $0x1a8] sm:$0x3f] %v397_v2 }
  0x57   :  { %454 = vst [vmem:[%s1311_s1 + $0x1b0] sm:$0xff] %v398_v5  ;;  %v399_v7 = vmax.f32 %v342_v4, %v343_v6 }
  0x59   :  { %455 = vst [vmem:[%s1311_s1 + $0x1b8] sm:$0x3f] %v399_v7 }

// kernel: _lenet5_forward.7
= control target key start
LH: loop header
LB: loop body
LE: loop exit
PB: predicated region body
PF: predicated region fallthrough
CT: control target
= control target key end

     0   :  { %vm257_vm0 = vcmask 1043456   ;;  %vm181_vm1 = vcmask 949248   ;;  %s1349_s1 = inlined_call_operand.vmem [shape: f32[500,128], index: 1, kind: input, shape index: {}]   ;;  %s1350_s0 = inlined_call_operand.vmem [shape: f32[200,500], index: 0, kind: input, shape index: {}]   ;;  %s1351_s2 = inlined_call_operand.vmem [shape: f32[1,128], index: 2, kind: input, shape index: {}]   ;;  %s1352_s3 = inlined_call_operand.vmem [shape: f32[200,128], index: 3, kind: output, shape index: {}]  }
   0x1   :  { %v161_v0 = vld [vmem:[%s1349_s1 + $0x178] sm:$0xff]  ;;  %v160_v2 = vld [vmem:[%s1349_s1 + $0x170] sm:$0xff]  ;;  %v159_v5 = vld [vmem:[%s1349_s1 + $0x168] sm:$0xff] }
   0x2   :  { %v129_v1 = vld [vmem:[%s1349_s1 + $0x78] sm:$0xff]  ;;  %445 = vmatpush.msra.mxu2 %v161_v0  ;;  %v128_v3 = vld [vmem:[%s1349_s1 + $0x70] sm:$0xff]  ;;  %v127_v7 = vld [vmem:[%s1349_s1 + $0x68] sm:$0xff] }
   0x3   :  { %261 = vmatpush.msra.mxu0 %v129_v1  ;;  %v145_v4 = vld [vmem:[%s1349_s1 + $0xf8] sm:$0xff]  ;;  %v176_v6 = vld [vmem:[%s1349_s1 + $0x1f0] sm:$0xf]  ;;  %v175_v9 = vld [vmem:[%s1349_s1 + $0x1e8] sm:$0xff] }
   0x4   :  { %353 = vmatpush.msra.mxu1 %v145_v4  ;;  %v144_v8 = vld [vmem:[%s1349_s1 + $0xf0] sm:$0xff]  ;;  %446 = vmatpush.msra.mxu2 %v160_v2  ;;  %v158_v10 = vld [vmem:[%s1349_s1 + $0x160] sm:$0xff]  ;;  %v143_v12 = vld [vmem:[%s1349_s1 + $0xe8] sm:$0xff] }
   0x5   :  { %262 = vmatpush.msra.mxu0 %v128_v3  ;;  %683 = vmatpush.msk.msra.mxu3 %vm257_vm0, %v176_v6  ;;  %v126_v11 = vld [vmem:[%s1349_s1 + $0x60] sm:$0xff]  ;;  %v157_v15 = vld [vmem:[%s1349_s1 + $0x158] sm:$0xff]  ;;  %v156_v19 = vld [vmem:[%s1349_s1 + $0x150] sm:$0xff] }
   0x6   :  { %354 = vmatpush.msra.mxu1 %v144_v8  ;;  %447 = vmatpush.msra.mxu2 %v159_v5  ;;  %v174_v13 = vld [vmem:[%s1349_s1 + $0x1e0] sm:$0xff]  ;;  %v125_v16 = vld [vmem:[%s1349_s1 + $0x58] sm:$0xff]  ;;  %v124_v20 = vld [vmem:[%s1349_s1 + $0x50] sm:$0xff] }
   0x7   :  { %263 = vmatpush.msra.mxu0 %v127_v7  ;;  %v142_v14 = vld [vmem:[%s1349_s1 + $0xe0] sm:$0xff]  ;;  %539 = vmatpush.msra.mxu3 %v175_v9  ;;  %v173_v17 = vld [vmem:[%s1349_s1 + $0x1d8] sm:$0xff]  ;;  %v172_v21 = vld [vmem:[%s1349_s1 + $0x1d0] sm:$0xff] }
   0x8   :  { %355 = vmatpush.msra.mxu1 %v143_v12  ;;  %448 = vmatpush.msra.mxu2 %v158_v10  ;;  %v141_v18 = vld [vmem:[%s1349_s1 + $0xd8] sm:$0xff]  ;;  %v140_v22 = vld [vmem:[%s1349_s1 + $0xd0] sm:$0xff]  ;;  %v155_v23 = vld [vmem:[%s1349_s1 + $0x148] sm:$0xff] }
   0x9   :  { %264 = vmatpush.msra.mxu0 %v126_v11  ;;  %540 = vmatpush.msra.mxu3 %v174_v13  ;;  %v123_v24 = vld [vmem:[%s1349_s1 + $0x48] sm:$0xff]  ;;  %v154_v27 = vld [vmem:[%s1349_s1 + $0x140] sm:$0xff]  ;;  %v153_v31 = vld [vmem:[%s1349_s1 + $0x138] sm:$0xff] }
   0xa   :  { %356 = vmatpush.msra.mxu1 %v142_v14  ;;  %449 = vmatpush.msra.mxu2 %v157_v15  ;;  %v171_v25 = vld [vmem:[%s1349_s1 + $0x1c8] sm:$0xff]  ;;  %v122_v28 = vld [vmem:[%s1349_s1 + $0x40] sm:$0xff]  ;;  %v121_v32 = vld [vmem:[%s1349_s1 + $0x38] sm:$0xff] }
   0xb   :  { %265 = vmatpush.msra.mxu0 %v125_v16  ;;  %541 = vmatpush.msra.mxu3 %v173_v17  ;;  %v139_v26 = vld [vmem:[%s1349_s1 + $0xc8] sm:$0xff]  ;;  %v170_v29 = vld [vmem:[%s1349_s1 + $0x1c0] sm:$0xff]  ;;  %v169_v33 = vld [vmem:[%s1349_s1 + $0x1b8] sm:$0xff] }
   0xc   :  { %357 = vmatpush.msra.mxu1 %v141_v18  ;;  %450 = vmatpush.msra.mxu2 %v156_v19  ;;  %v138_v30 = vld [vmem:[%s1349_s1 + $0xc0] sm:$0xff]  ;;  %v137_v34 = vld [vmem:[%s1349_s1 + $0xb8] sm:$0xff]  ;;  %v152_v35 = vld [vmem:[%s1349_s1 + $0x130] sm:$0xff] }
   0xd   :  { %266 = vmatpush.msra.mxu0 %v124_v20  ;;  %542 = vmatpush.msra.mxu3 %v172_v21  ;;  %v120_v36 = vld [vmem:[%s1349_s1 + $0x30] sm:$0xff]  ;;  %v151_v39 = vld [vmem:[%s1349_s1 + $0x128] sm:$0xff]  ;;  %v150_v43 = vld [vmem:[%s1349_s1 + $0x120] sm:$0xff] }
   0xe   :  { %358 = vmatpush.msra.mxu1 %v140_v22  ;;  %451 = vmatpush.msra.mxu2 %v155_v23  ;;  %v168_v37 = vld [vmem:[%s1349_s1 + $0x1b0] sm:$0xff]  ;;  %v119_v40 = vld [vmem:[%s1349_s1 + $0x28] sm:$0xff]  ;;  %v118_v44 = vld [vmem:[%s1349_s1 + $0x20] sm:$0xff] }
   0xf   :  { %267 = vmatpush.msra.mxu0 %v123_v24  ;;  %543 = vmatpush.msra.mxu3 %v171_v25  ;;  %v136_v38 = vld [vmem:[%s1349_s1 + $0xb0] sm:$0xff]  ;;  %v167_v41 = vld [vmem:[%s1349_s1 + $0x1a8] sm:$0xff]  ;;  %v166_v45 = vld [vmem:[%s1349_s1 + $0x1a0] sm:$0xff] }
  0x10   :  { %359 = vmatpush.msra.mxu1 %v139_v26  ;;  %452 = vmatpush.msra.mxu2 %v154_v27  ;;  %v135_v42 = vld [vmem:[%s1349_s1 + $0xa8] sm:$0xff]  ;;  %v134_v46 = vld [vmem:[%s1349_s1 + $0xa0] sm:$0xff]  ;;  %v149_v47 = vld [vmem:[%s1349_s1 + $0x118] sm:$0xff] }
  0x11   :  { %268 = vmatpush.msra.mxu0 %v122_v28  ;;  %544 = vmatpush.msra.mxu3 %v170_v29  ;;  %v117_v48 = vld [vmem:[%s1349_s1 + $0x18] sm:$0xff]  ;;  %v148_v51 = vld [vmem:[%s1349_s1 + $0x110] sm:$0xff]  ;;  %v147_v55 = vld [vmem:[%s1349_s1 + $0x108] sm:$0xff] }
  0x12   :  { %360 = vmatpush.msra.mxu1 %v138_v30  ;;  %453 = vmatpush.msra.mxu2 %v153_v31  ;;  %v165_v49 = vld [vmem:[%s1349_s1 + $0x198] sm:$0xff]  ;;  %v116_v52 = vld [vmem:[%s1349_s1 + $0x10] sm:$0xff]  ;;  %v115_v56 = vld [vmem:[%s1349_s1 + $0x8] sm:$0xff] }
  0x13   :  { %269 = vmatpush.msra.mxu0 %v121_v32  ;;  %545 = vmatpush.msra.mxu3 %v169_v33  ;;  %v133_v50 = vld [vmem:[%s1349_s1 + $0x98] sm:$0xff]  ;;  %v164_v53 = vld [vmem:[%s1349_s1 + $0x190] sm:$0xff]  ;;  %v163_v57 = vld [vmem:[%s1349_s1 + $0x188] sm:$0xff] }
  0x14   :  { %361 = vmatpush.msra.mxu1 %v137_v34  ;;  %454 = vmatpush.msra.mxu2 %v152_v35  ;;  %v132_v54 = vld [vmem:[%s1349_s1 + $0x90] sm:$0xff]  ;;  %v131_v58 = vld [vmem:[%s1349_s1 + $0x88] sm:$0xff]  ;;  %v146_v59 = vld [vmem:[%s1349_s1 + $0x100] sm:$0xff] }
  0x15   :  { %270 = vmatpush.msra.mxu0 %v120_v36  ;;  %546 = vmatpush.msra.mxu3 %v168_v37  ;;  %v114_v60 = vld [vmem:[%s1349_s1] sm:$0xff]  ;;  %v16_v61 = vld [vmem:[%s1350_s0 + $0x10] sm:$0xff]  ;;  %v17_v0 = vld [vmem:[%s1350_s0 + $0x18] sm:$0xff] }
  0x16   :  { %362 = vmatpush.msra.mxu1 %v136_v38  ;;  %455 = vmatpush.msra.mxu2 %v151_v39  ;;  %v162_v62 = vld [vmem:[%s1349_s1 + $0x180] sm:$0xff]  ;;  %v15_v2 = vld [vmem:[%s1350_s0 + $0x8] sm:$0xff]  ;;  %v20_v3 = vld [vmem:[%s1350_s0 + $0x30] sm:$0xff] }
  0x17   :  { %271 = vmatpush.msra.mxu0 %v119_v40  ;;  %547 = vmatpush.msra.mxu3 %v167_v41  ;;  %v14_v63 = vld [vmem:[%s1350_s0] sm:$0xff]  ;;  %v21_v5 = vld [vmem:[%s1350_s0 + $0x38] sm:$0xff]  ;;  %v19_v6 = vld [vmem:[%s1350_s0 + $0x28] sm:$0xff] }
  0x18   :  { %363 = vmatpush.msra.mxu1 %v135_v42  ;;  %456 = vmatpush.msra.mxu2 %v150_v43  ;;  %v130_v1 = vld [vmem:[%s1349_s1 + $0x80] sm:$0xff]  ;;  %v24_v7 = vld [vmem:[%s1350_s0 + $0x50] sm:$0xff]  ;;  %v25_v9 = vld [vmem:[%s1350_s0 + $0x58] sm:$0xff] }
  0x19   :  { %272 = vmatpush.msra.mxu0 %v118_v44  ;;  %548 = vmatpush.msra.mxu3 %v166_v45  ;;  %v18_v4 = vld [vmem:[%s1350_s0 + $0x20] sm:$0xff]  ;;  %v23_v10 = vld [vmem:[%s1350_s0 + $0x48] sm:$0xff]  ;;  %v28_v11 = vld [vmem:[%s1350_s0 + $0x70] sm:$0xff] }
  0x1a   :  { %364 = vmatpush.msra.mxu1 %v134_v46  ;;  %457 = vmatpush.msra.mxu2 %v149_v47  ;;  %v22_v8 = vld [vmem:[%s1350_s0 + $0x40] sm:$0xff]  ;;  %v29_v13 = vld [vmem:[%s1350_s0 + $0x78] sm:$0xff]  ;;  %v27_v14 = vld [vmem:[%s1350_s0 + $0x68] sm:$0xff] }
  0x1b   :  { %273 = vmatpush.msra.mxu0 %v117_v48  ;;  %549 = vmatpush.msra.mxu3 %v165_v49  ;;  %v26_v12 = vld [vmem:[%s1350_s0 + $0x60] sm:$0xff]  ;;  %v32_v15 = vld [vmem:[%s1350_s0 + $0x90] sm:$0xff]  ;;  %v33_v17 = vld [vmem:[%s1350_s0 + $0x98] sm:$0xff] }
  0x1c   :  { %365 = vmatpush.msra.mxu1 %v133_v50  ;;  %458 = vmatpush.msra.mxu2 %v148_v51  ;;  %v30_v16 = vld [vmem:[%s1350_s0 + $0x80] sm:$0xff]  ;;  %v31_v18 = vld [vmem:[%s1350_s0 + $0x88] sm:$0xff]  ;;  %v36_v19 = vld [vmem:[%s1350_s0 + $0xb0] sm:$0xff] }
  0x1d   :  { %274 = vmatpush.msra.mxu0 %v116_v52  ;;  %550 = vmatpush.msra.mxu3 %v164_v53  ;;  %v34_v20 = vld [vmem:[%s1350_s0 + $0xa0] sm:$0xff]  ;;  %v37_v21 = vld [vmem:[%s1350_s0 + $0xb8] sm:$0xff]  ;;  %v35_v22 = vld [vmem:[%s1350_s0 + $0xa8] sm:$0xff] }
  0x1e   :  { %366 = vmatpush.msra.mxu1 %v132_v54  ;;  %459 = vmatpush.msra.mxu2 %v147_v55  ;;  %v40_v23 = vld [vmem:[%s1350_s0 + $0xd0] sm:$0xff]  ;;  %v38_v24 = vld [vmem:[%s1350_s0 + $0xc0] sm:$0xff]  ;;  %v41_v25 = vld [vmem:[%s1350_s0 + $0xd8] sm:$0xff] }
  0x1f   :  { %275 = vmatpush.msra.mxu0 %v115_v56  ;;  %551 = vmatpush.msra.mxu3 %v163_v57  ;;  %v39_v26 = vld [vmem:[%s1350_s0 + $0xc8] sm:$0xff]  ;;  %v44_v27 = vld [vmem:[%s1350_s0 + $0xf0] sm:$0xff]  ;;  %v42_v28 = vld [vmem:[%s1350_s0 + $0xe0] sm:$0xff] }
  0x20   :  { %367 = vmatpush.msra.mxu1 %v131_v58  ;;  %460 = vmatpush.msra.mxu2 %v146_v59  ;;  %v45_v29 = vld [vmem:[%s1350_s0 + $0xf8] sm:$0xff]  ;;  %v43_v30 = vld [vmem:[%s1350_s0 + $0xe8] sm:$0xff]  ;;  %v48_v31 = vld [vmem:[%s1350_s0 + $0x110] sm:$0xff] }
  0x21   :  { %276 = vmatpush.msra.mxu0 %v114_v60  ;;  %461 = vmatmul.f32.vlgmr.msra.gmra.mxu2 %v16_v61  ;;  %v46_v32 = vld [vmem:[%s1350_s0 + $0x100] sm:$0xff]  ;;  %v49_v33 = vld [vmem:[%s1350_s0 + $0x118] sm:$0xff]  ;;  %v47_v34 = vld [vmem:[%s1350_s0 + $0x108] sm:$0xff] }
  0x22   :  { %552 = vmatpush.msra.mxu3 %v162_v62  ;;  %277 = vmatmul.f32.vlgmr.msra.gmra.mxu0 %v14_v63  ;;  %v52_v35 = vld [vmem:[%s1350_s0 + $0x130] sm:$0xff]  ;;  %v50_v36 = vld [vmem:[%s1350_s0 + $0x120] sm:$0xff]  ;;  %v53_v37 = vld [vmem:[%s1350_s0 + $0x138] sm:$0xff] }
  0x23   :  { %684 = vmatmul.msk.f32.vlgmr.msra.gmra.mxu3 %vm181_vm1, %v17_v0  ;;  %368 = vmatpush.msra.mxu1 %v130_v1  ;;  %v51_v38 = vld [vmem:[%s1350_s0 + $0x128] sm:$0xff]  ;;  %v56_v39 = vld [vmem:[%s1350_s0 + $0x150] sm:$0xff]  ;;  %v54_v40 = vld [vmem:[%s1350_s0 + $0x140] sm:$0xff] }
  0x24   :  { %369 = vmatmul.f32.vlgmr.msra.gmra.mxu1 %v15_v2  ;;  %v57_v41 = vld [vmem:[%s1350_s0 + $0x158] sm:$0xff]  ;;  %v55_v42 = vld [vmem:[%s1350_s0 + $0x148] sm:$0xff]  ;;  %v60_v43 = vld [vmem:[%s1350_s0 + $0x170] sm:$0xff] }
  0x25   :  { %v58_v44 = vld [vmem:[%s1350_s0 + $0x160] sm:$0xff]  ;;  %v61_v45 = vld [vmem:[%s1350_s0 + $0x178] sm:$0xff]  ;;  %v59_v46 = vld [vmem:[%s1350_s0 + $0x168] sm:$0xff] }
  0x26   :  { %v64_v47 = vld [vmem:[%s1350_s0 + $0x190] sm:$0xff]  ;;  %v62_v48 = vld [vmem:[%s1350_s0 + $0x180] sm:$0xff]  ;;  %v65_v49 = vld [vmem:[%s1350_s0 + $0x198] sm:$0xff] }
  0x27   :  { %v63_v50 = vld [vmem:[%s1350_s0 + $0x188] sm:$0xff]  ;;  %v68_v51 = vld [vmem:[%s1350_s0 + $0x1b0] sm:$0xff]  ;;  %v66_v52 = vld [vmem:[%s1350_s0 + $0x1a0] sm:$0xff] }
  0x28   :  { %v69_v53 = vld [vmem:[%s1350_s0 + $0x1b8] sm:$0xff]  ;;  %v67_v54 = vld [vmem:[%s1350_s0 + $0x1a8] sm:$0xff]  ;;  %v72_v55 = vld [vmem:[%s1350_s0 + $0x1d0] sm:$0xff] }
  0x29   :  { %464 = vmatmul.f32.gmra.mxu2 %v20_v3  ;;  %v70_v56 = vld [vmem:[%s1350_s0 + $0x1c0] sm:$0xff]  ;;  %v73_v57 = vld [vmem:[%s1350_s0 + $0x1d8] sm:$0xff]  ;;  %v71_v58 = vld [vmem:[%s1350_s0 + $0x1c8] sm:$0xff] }
  0x2a   :  { %280 = vmatmul.f32.gmra.mxu0 %v18_v4  ;;  %v76_v59 = vld [vmem:[%s1350_s0 + $0x1f0] sm:$0xff]  ;;  %v74_v60 = vld [vmem:[%s1350_s0 + $0x1e0] sm:$0xff]  ;;  %v77_v61 = vld [vmem:[%s1350_s0 + $0x1f8] sm:$0xff] }
  0x2b   :  { %685 = vmatmul.msk.f32.gmra.mxu3 %vm181_vm1, %v21_v5  ;;  %v75_v62 = vld [vmem:[%s1350_s0 + $0x1e8] sm:$0xff]  ;;  %v1130_v63 = vld [vmem:[%s1351_s2] ss:$0 sm:$0xff]  ;;  %v80_v0 = vld [vmem:[%s1350_s0 + $0x210] sm:$0xff] }
  0x2c   :  { %372 = vmatmul.f32.gmra.mxu1 %v19_v6  ;;  %v78_v2 = vld [vmem:[%s1350_s0 + $0x200] sm:$0xff]  ;;  %v81_v3 = vld [vmem:[%s1350_s0 + $0x218] sm:$0xff]  ;;  %v79_v6 = vld [vmem:[%s1350_s0 + $0x208] sm:$0xff] }
  0x31   :  { %467 = vmatmul.f32.gmra.mxu2 %v24_v7 }
  0x32   :  { %283 = vmatmul.f32.gmra.mxu0 %v22_v8 }
  0x33   :  { %686 = vmatmul.msk.f32.gmra.mxu3 %vm181_vm1, %v25_v9 }
  0x34   :  { %375 = vmatmul.f32.gmra.mxu1 %v23_v10 }
  0x39   :  { %470 = vmatmul.f32.gmra.mxu2 %v28_v11  ;;  %v84_v11 = vld [vmem:[%s1350_s0 + $0x230] sm:$0xff] }
  0x3a   :  { %286 = vmatmul.f32.gmra.mxu0 %v26_v12 }
  0x3b   :  { %687 = vmatmul.msk.f32.gmra.mxu3 %vm181_vm1, %v29_v13 }
  0x3c   :  { %378 = vmatmul.f32.gmra.mxu1 %v27_v14  ;;  %v82_v14 = vld [vmem:[%s1350_s0 + $0x220] sm:$0xff] }
  0x41   :  { %473 = vmatmul.f32.gmra.mxu2 %v32_v15  ;;  %v85_v15 = vld [vmem:[%s1350_s0 + $0x238] sm:$0xff] }
  0x42   :  { %289 = vmatmul.f32.gmra.mxu0 %v30_v16 }
  0x43   :  { %688 = vmatmul.msk.f32.gmra.mxu3 %vm181_vm1, %v33_v17 }
  0x44   :  { %381 = vmatmul.f32.gmra.mxu1 %v31_v18 }
  0x49   :  { %476 = vmatmul.f32.gmra.mxu2 %v36_v19  ;;  %v83_v19 = vld [vmem:[%s1350_s0 + $0x228] sm:$0xff] }
  0x4a   :  { %292 = vmatmul.f32.gmra.mxu0 %v34_v20 }
  0x4b   :  { %689 = vmatmul.msk.f32.gmra.mxu3 %vm181_vm1, %v37_v21 }
  0x4c   :  { %384 = vmatmul.f32.gmra.mxu1 %v35_v22 }
  0x51   :  { %479 = vmatmul.f32.gmra.mxu2 %v40_v23 }
  0x52   :  { %295 = vmatmul.f32.gmra.mxu0 %v38_v24  ;;  %v88_v24 = vld [vmem:[%s1350_s0 + $0x250] sm:$0xff] }
  0x53   :  { %690 = vmatmul.msk.f32.gmra.mxu3 %vm181_vm1, %v41_v25 }
  0x54   :  { %387 = vmatmul.f32.gmra.mxu1 %v39_v26 }
  0x59   :  { %482 = vmatmul.f32.gmra.mxu2 %v44_v27  ;;  %v86_v27 = vld [vmem:[%s1350_s0 + $0x240] sm:$0xff] }
  0x5a   :  { %298 = vmatmul.f32.gmra.mxu0 %v42_v28  ;;  %v89_v28 = vld [vmem:[%s1350_s0 + $0x258] sm:$0xff] }
  0x5b   :  { %691 = vmatmul.msk.f32.gmra.mxu3 %vm181_vm1, %v45_v29 }
  0x5c   :  { %390 = vmatmul.f32.gmra.mxu1 %v43_v30 }
  0x61   :  { %485 = vmatmul.f32.gmra.mxu2 %v48_v31 }
  0x62   :  { %301 = vmatmul.f32.gmra.mxu0 %v46_v32  ;;  %v87_v32 = vld [vmem:[%s1350_s0 + $0x248] sm:$0xff] }
  0x63   :  { %692 = vmatmul.msk.f32.gmra.mxu3 %vm181_vm1, %v49_v33 }
  0x64   :  { %393 = vmatmul.f32.gmra.mxu1 %v47_v34 }
  0x69   :  { %488 = vmatmul.f32.gmra.mxu2 %v52_v35 }
  0x6a   :  { %304 = vmatmul.f32.gmra.mxu0 %v50_v36 }
  0x6b   :  { %693 = vmatmul.msk.f32.gmra.mxu3 %vm181_vm1, %v53_v37  ;;  %v92_v37 = vld [vmem:[%s1350_s0 + $0x270] sm:$0xff] }
  0x6c   :  { %396 = vmatmul.f32.gmra.mxu1 %v51_v38 }
  0x71   :  { %491 = vmatmul.f32.gmra.mxu2 %v56_v39 }
  0x72   :  { %307 = vmatmul.f32.gmra.mxu0 %v54_v40  ;;  %v90_v40 = vld [vmem:[%s1350_s0 + $0x260] sm:$0xff] }
  0x73   :  { %694 = vmatmul.msk.f32.gmra.mxu3 %vm181_vm1, %v57_v41  ;;  %v93_v41 = vld [vmem:[%s1350_s0 + $0x278] sm:$0xff] }
  0x74   :  { %399 = vmatmul.f32.gmra.mxu1 %v55_v42 }
  0x79   :  { %494 = vmatmul.f32.gmra.mxu2 %v60_v43 }
  0x7a   :  { %310 = vmatmul.f32.gmra.mxu0 %v58_v44 }
  0x7b   :  { %695 = vmatmul.msk.f32.gmra.mxu3 %vm181_vm1, %v61_v45  ;;  %v91_v45 = vld [vmem:[%s1350_s0 + $0x268] sm:$0xff] }
  0x7c   :  { %402 = vmatmul.f32.gmra.mxu1 %v59_v46 }
  0x81   :  { %497 = vmatmul.f32.gmra.mxu2 %v64_v47 }
  0x82   :  { %313 = vmatmul.f32.gmra.mxu0 %v62_v48 }
  0x83   :  { %696 = vmatmul.msk.f32.gmra.mxu3 %vm181_vm1, %v65_v49 }
  0x84   :  { %405 = vmatmul.f32.gmra.mxu1 %v63_v50  ;;  %v96_v50 = vld [vmem:[%s1350_s0 + $0x290] sm:$0xff] }
  0x89   :  { %500 = vmatmul.f32.gmra.mxu2 %v68_v51 }
  0x8a   :  { %316 = vmatmul.f32.gmra.mxu0 %v66_v52 }
  0x8b   :  { %697 = vmatmul.msk.f32.gmra.mxu3 %vm181_vm1, %v69_v53  ;;  %v94_v53 = vld [vmem:[%s1350_s0 + $0x280] sm:$0xff] }
  0x8c   :  { %408 = vmatmul.f32.gmra.mxu1 %v67_v54  ;;  %v97_v54 = vld [vmem:[%s1350_s0 + $0x298] sm:$0xff] }
  0x91   :  { %503 = vmatmul.f32.gmra.mxu2 %v72_v55 }
  0x92   :  { %319 = vmatmul.f32.gmra.mxu0 %v70_v56 }
  0x93   :  { %698 = vmatmul.msk.f32.gmra.mxu3 %vm181_vm1, %v73_v57 }
  0x94   :  { %411 = vmatmul.f32.gmra.mxu1 %v71_v58  ;;  %v95_v58 = vld [vmem:[%s1350_s0 + $0x288] sm:$0xff] }
  0x99   :  { %506 = vmatmul.f32.gmra.mxu2 %v76_v59 }
  0x9a   :  { %322 = vmatmul.f32.gmra.mxu0 %v74_v60 }
  0x9b   :  { %699 = vmatmul.msk.f32.gmra.mxu3 %vm181_vm1, %v77_v61 }
  0x9c   :  { %414 = vmatmul.f32.gmra.mxu1 %v75_v62 }
  0x9f   :  { %v278_v1 = vpop.f32.mrf.mxu0 }
  0xa0   :  { %v279_v4 = vadd.f32 %v1130_v63, %v278_v1 }
  0xa1   :  { %509 = vmatmul.f32.gmra.mxu2 %v80_v0  ;;  %v370_v5 = vpop.f32.mrf.mxu1  ;;  %v100_v0 = vld [vmem:[%s1350_s0 + $0x2b0] sm:$0xff] }
  0xa2   :  { %v371_v7 = vadd.f32 %v370_v5, %v279_v4  ;;  %325 = vmatmul.f32.gmra.mxu0 %v78_v2  ;;  %v101_v4 = vld [vmem:[%s1350_s0 + $0x2b8] sm:$0xff] }
  0xa3   :  { %700 = vmatmul.msk.f32.gmra.mxu3 %vm181_vm1, %v81_v3  ;;  %v98_v3 = vld [vmem:[%s1350_s0 + $0x2a0] sm:$0xff] }
  0xa4   :  { %v462_v8 = vpop.f32.mrf.mxu2  ;;  %417 = vmatmul.f32.gmra.mxu1 %v79_v6 }
  0xa5   :  { %v463_v9 = vadd.f32 %v462_v8, %v371_v7  ;;  %v99_v8 = vld [vmem:[%s1350_s0 + $0x2a8] sm:$0xff] }
  0xa6   :  { %v554_v10 = vpop.f32.mrf.mxu3 }
  0xa7   :  { %v555_v12 = vadd.f32 %v554_v10, %v463_v9  ;;  %v281_v13 = vpop.f32.mrf.mxu0 }
  0xa8   :  { %v282_v16 = vadd.f32 %v1130_v63, %v281_v13  ;;  %v104_v13 = vld [vmem:[%s1350_s0 + $0x2d0] sm:$0xff] }
  0xa9   :  { %v629_v17 = vmax.f32 %v555_v12, 0.0  ;;  %512 = vmatmul.f32.gmra.mxu2 %v84_v11  ;;  %v373_v18 = vpop.f32.mrf.mxu1 }
  0xaa   :  { %v374_v20 = vadd.f32 %v373_v18, %v282_v16  ;;  %328 = vmatmul.f32.gmra.mxu0 %v82_v14  ;;  %v102_v16 = vld [vmem:[%s1350_s0 + $0x2c0] sm:$0xff] }
  0xab   :  { %701 = vmatmul.msk.f32.gmra.mxu3 %vm181_vm1, %v85_v15  ;;  %654 = vst [vmem:[%s1352_s3] sm:$0xff] %v629_v17  ;;  %v105_v17 = vld [vmem:[%s1350_s0 + $0x2d8] sm:$0xff] }
  0xac   :  { %v465_v21 = vpop.f32.mrf.mxu2  ;;  %420 = vmatmul.f32.gmra.mxu1 %v83_v19 }
  0xad   :  { %v466_v22 = vadd.f32 %v465_v21, %v374_v20  ;;  %v103_v21 = vld [vmem:[%s1350_s0 + $0x2c8] sm:$0xff] }
  0xae   :  { %v557_v23 = vpop.f32.mrf.mxu3 }
  0xaf   :  { %v558_v25 = vadd.f32 %v557_v23, %v466_v22  ;;  %v284_v26 = vpop.f32.mrf.mxu0 }
  0xb0   :  { %v285_v29 = vadd.f32 %v1130_v63, %v284_v26  ;;  %v108_v26 = vld [vmem:[%s1350_s0 + $0x2f0] sm:$0xff] }
  0xb1   :  { %v630_v30 = vmax.f32 %v558_v25, 0.0  ;;  %515 = vmatmul.f32.gmra.mxu2 %v88_v24  ;;  %v376_v31 = vpop.f32.mrf.mxu1 }
  0xb2   :  { %v377_v33 = vadd.f32 %v376_v31, %v285_v29  ;;  %331 = vmatmul.f32.gmra.mxu0 %v86_v27  ;;  %v106_v29 = vld [vmem:[%s1350_s0 + $0x2e0] sm:$0xff] }
  0xb3   :  { %702 = vmatmul.msk.f32.gmra.mxu3 %vm181_vm1, %v89_v28  ;;  %655 = vst [vmem:[%s1352_s3 + $0x8] sm:$0xff] %v630_v30  ;;  %v109_v30 = vld [vmem:[%s1350_s0 + $0x2f8] sm:$0xff] }
  0xb4   :  { %v468_v34 = vpop.f32.mrf.mxu2  ;;  %423 = vmatmul.f32.gmra.mxu1 %v87_v32 }
  0xb5   :  { %v469_v35 = vadd.f32 %v468_v34, %v377_v33  ;;  %v107_v34 = vld [vmem:[%s1350_s0 + $0x2e8] sm:$0xff] }
  0xb6   :  { %v560_v36 = vpop.f32.mrf.mxu3 }
  0xb7   :  { %v561_v38 = vadd.f32 %v560_v36, %v469_v35  ;;  %v287_v39 = vpop.f32.mrf.mxu0 }
  0xb8   :  { %v288_v42 = vadd.f32 %v1130_v63, %v287_v39  ;;  %v112_v39 = vld [vmem:[%s1350_s0 + $0x310] sm:$0xff] }
  0xb9   :  { %v631_v43 = vmax.f32 %v561_v38, 0.0  ;;  %518 = vmatmul.f32.gmra.mxu2 %v92_v37  ;;  %v379_v44 = vpop.f32.mrf.mxu1 }
  0xba   :  { %v380_v46 = vadd.f32 %v379_v44, %v288_v42  ;;  %334 = vmatmul.f32.gmra.mxu0 %v90_v40  ;;  %v110_v42 = vld [vmem:[%s1350_s0 + $0x300] sm:$0xff] }
  0xbb   :  { %703 = vmatmul.msk.f32.gmra.mxu3 %vm181_vm1, %v93_v41  ;;  %656 = vst [vmem:[%s1352_s3 + $0x10] sm:$0xff] %v631_v43  ;;  %v113_v43 = vld [vmem:[%s1350_s0 + $0x318] sm:$0xff] }
  0xbc   :  { %v471_v47 = vpop.f32.mrf.mxu2  ;;  %426 = vmatmul.f32.gmra.mxu1 %v91_v45 }
  0xbd   :  { %v472_v48 = vadd.f32 %v471_v47, %v380_v46  ;;  %v111_v47 = vld [vmem:[%s1350_s0 + $0x308] sm:$0xff] }
  0xbe   :  { %v563_v49 = vpop.f32.mrf.mxu3 }
  0xbf   :  { %v564_v51 = vadd.f32 %v563_v49, %v472_v48  ;;  %v290_v52 = vpop.f32.mrf.mxu0 }
  0xc0   :  { %v291_v55 = vadd.f32 %v1130_v63, %v290_v52 }
  0xc1   :  { %v632_v56 = vmax.f32 %v564_v51, 0.0  ;;  %521 = vmatmul.f32.gmra.mxu2 %v96_v50  ;;  %v382_v57 = vpop.f32.mrf.mxu1 }
  0xc2   :  { %v383_v59 = vadd.f32 %v382_v57, %v291_v55  ;;  %337 = vmatmul.f32.gmra.mxu0 %v94_v53 }
  0xc3   :  { %704 = vmatmul.msk.f32.gmra.mxu3 %vm181_vm1, %v97_v54  ;;  %657 = vst [vmem:[%s1352_s3 + $0x18] sm:$0xff] %v632_v56 }
  0xc4   :  { %v474_v60 = vpop.f32.mrf.mxu2  ;;  %429 = vmatmul.f32.gmra.mxu1 %v95_v58 }
  0xc5   :  { %v475_v61 = vadd.f32 %v474_v60, %v383_v59 }
  0xc6   :  { %v566_v62 = vpop.f32.mrf.mxu3 }
  0xc7   :  { %v567_v1 = vadd.f32 %v566_v62, %v475_v61  ;;  %v293_v2 = vpop.f32.mrf.mxu0 }
  0xc8   :  { %v294_v5 = vadd.f32 %v1130_v63, %v293_v2 }
  0xc9   :  { %v633_v6 = vmax.f32 %v567_v1, 0.0  ;;  %524 = vmatmul.f32.gmra.mxu2 %v100_v0  ;;  %v385_v7 = vpop.f32.mrf.mxu1 }
  0xca   :  { %v386_v9 = vadd.f32 %v385_v7, %v294_v5  ;;  %340 = vmatmul.f32.gmra.mxu0 %v98_v3 }
  0xcb   :  { %705 = vmatmul.msk.f32.gmra.mxu3 %vm181_vm1, %v101_v4  ;;  %658 = vst [vmem:[%s1352_s3 + $0x20] sm:$0xff] %v633_v6 }
  0xcc   :  { %v477_v10 = vpop.f32.mrf.mxu2  ;;  %432 = vmatmul.f32.gmra.mxu1 %v99_v8 }
  0xcd   :  { %v478_v11 = vadd.f32 %v477_v10, %v386_v9 }
  0xce   :  { %v569_v12 = vpop.f32.mrf.mxu3 }
  0xcf   :  { %v570_v14 = vadd.f32 %v569_v12, %v478_v11  ;;  %v296_v15 = vpop.f32.mrf.mxu0 }
  0xd0   :  { %v297_v18 = vadd.f32 %v1130_v63, %v296_v15 }
  0xd1   :  { %v634_v19 = vmax.f32 %v570_v14, 0.0  ;;  %527 = vmatmul.f32.gmra.mxu2 %v104_v13  ;;  %v388_v20 = vpop.f32.mrf.mxu1 }
  0xd2   :  { %v389_v22 = vadd.f32 %v388_v20, %v297_v18  ;;  %343 = vmatmul.f32.gmra.mxu0 %v102_v16 }
  0xd3   :  { %706 = vmatmul.msk.f32.gmra.mxu3 %vm181_vm1, %v105_v17  ;;  %659 = vst [vmem:[%s1352_s3 + $0x28] sm:$0xff] %v634_v19 }
  0xd4   :  { %v480_v23 = vpop.f32.mrf.mxu2  ;;  %435 = vmatmul.f32.gmra.mxu1 %v103_v21 }
  0xd5   :  { %v481_v24 = vadd.f32 %v480_v23, %v389_v22 }
  0xd6   :  { %v572_v25 = vpop.f32.mrf.mxu3 }
  0xd7   :  { %v573_v27 = vadd.f32 %v572_v25, %v481_v24  ;;  %v299_v28 = vpop.f32.mrf.mxu0 }
  0xd8   :  { %v300_v31 = vadd.f32 %v1130_v63, %v299_v28 }
  0xd9   :  { %v635_v32 = vmax.f32 %v573_v27, 0.0  ;;  %530 = vmatmul.f32.gmra.mxu2 %v108_v26  ;;  %v391_v33 = vpop.f32.mrf.mxu1 }
  0xda   :  { %v392_v35 = vadd.f32 %v391_v33, %v300_v31  ;;  %346 = vmatmul.f32.gmra.mxu0 %v106_v29 }
  0xdb   :  { %707 = vmatmul.msk.f32.gmra.mxu3 %vm181_vm1, %v109_v30  ;;  %660 = vst [vmem:[%s1352_s3 + $0x30] sm:$0xff] %v635_v32 }
  0xdc   :  { %v483_v36 = vpop.f32.mrf.mxu2  ;;  %438 = vmatmul.f32.gmra.mxu1 %v107_v34 }
  0xdd   :  { %v484_v37 = vadd.f32 %v483_v36, %v392_v35 }
  0xde   :  { %v575_v38 = vpop.f32.mrf.mxu3 }
  0xdf   :  { %v576_v40 = vadd.f32 %v575_v38, %v484_v37  ;;  %v302_v41 = vpop.f32.mrf.mxu0 }
  0xe0   :  { %v303_v44 = vadd.f32 %v1130_v63, %v302_v41 }
  0xe1   :  { %v636_v45 = vmax.f32 %v576_v40, 0.0  ;;  %533 = vmatmul.f32.gmra.mxu2 %v112_v39  ;;  %v394_v46 = vpop.f32.mrf.mxu1 }
  0xe2   :  { %v395_v48 = vadd.f32 %v394_v46, %v303_v44  ;;  %349 = vmatmul.f32.gmra.mxu0 %v110_v42 }
  0xe3   :  { %708 = vmatmul.msk.f32.gmra.mxu3 %vm181_vm1, %v113_v43  ;;  %661 = vst [vmem:[%s1352_s3 + $0x38] sm:$0xff] %v636_v45 }
  0xe4   :  { %v486_v49 = vpop.f32.mrf.mxu2  ;;  %441 = vmatmul.f32.gmra.mxu1 %v111_v47 }
  0xe5   :  { %v487_v50 = vadd.f32 %v486_v49, %v395_v48 }
  0xe6   :  { %v578_v51 = vpop.f32.mrf.mxu3 }
  0xe7   :  { %v579_v52 = vadd.f32 %v578_v51, %v487_v50  ;;  %v305_v53 = vpop.f32.mrf.mxu0 }
  0xe8   :  { %v306_v54 = vadd.f32 %v1130_v63, %v305_v53 }
  0xe9   :  { %v637_v55 = vmax.f32 %v579_v52, 0.0  ;;  %v397_v56 = vpop.f32.mrf.mxu1 }
  0xea   :  { %v398_v57 = vadd.f32 %v397_v56, %v306_v54 }
  0xeb   :  { %662 = vst [vmem:[%s1352_s3 + $0x40] sm:$0xff] %v637_v55 }
  0xec   :  { %v489_v58 = vpop.f32.mrf.mxu2 }
  0xed   :  { %v490_v59 = vadd.f32 %v489_v58, %v398_v57 }
  0xee   :  { %v581_v60 = vpop.f32.mrf.mxu3 }
  0xef   :  { %v582_v61 = vadd.f32 %v581_v60, %v490_v59  ;;  %v308_v62 = vpop.f32.mrf.mxu0 }
  0xf0   :  { %v309_v0 = vadd.f32 %v1130_v63, %v308_v62 }
  0xf1   :  { %v638_v1 = vmax.f32 %v582_v61, 0.0  ;;  %v400_v2 = vpop.f32.mrf.mxu1 }
  0xf2   :  { %v401_v3 = vadd.f32 %v400_v2, %v309_v0 }
  0xf3   :  { %663 = vst [vmem:[%s1352_s3 + $0x48] sm:$0xff] %v638_v1 }
  0xf4   :  { %v492_v4 = vpop.f32.mrf.mxu2 }
  0xf5   :  { %v493_v5 = vadd.f32 %v492_v4, %v401_v3 }
  0xf6   :  { %v584_v6 = vpop.f32.mrf.mxu3 }
  0xf7   :  { %v585_v7 = vadd.f32 %v584_v6, %v493_v5  ;;  %v311_v8 = vpop.f32.mrf.mxu0 }
  0xf8   :  { %v312_v9 = vadd.f32 %v1130_v63, %v311_v8 }
  0xf9   :  { %v639_v10 = vmax.f32 %v585_v7, 0.0  ;;  %v403_v11 = vpop.f32.mrf.mxu1 }
  0xfa   :  { %v404_v12 = vadd.f32 %v403_v11, %v312_v9 }
  0xfb   :  { %664 = vst [vmem:[%s1352_s3 + $0x50] sm:$0xff] %v639_v10 }
  0xfc   :  { %v495_v13 = vpop.f32.mrf.mxu2 }
  0xfd   :  { %v496_v14 = vadd.f32 %v495_v13, %v404_v12 }
  0xfe   :  { %v587_v15 = vpop.f32.mrf.mxu3 }
  0xff   :  { %v588_v16 = vadd.f32 %v587_v15, %v496_v14  ;;  %v314_v17 = vpop.f32.mrf.mxu0 }
 0x100   :  { %v315_v18 = vadd.f32 %v1130_v63, %v314_v17 }
 0x101   :  { %v640_v19 = vmax.f32 %v588_v16, 0.0  ;;  %v406_v20 = vpop.f32.mrf.mxu1 }
 0x102   :  { %v407_v21 = vadd.f32 %v406_v20, %v315_v18 }
 0x103   :  { %665 = vst [vmem:[%s1352_s3 + $0x58] sm:$0xff] %v640_v19 }
 0x104   :  { %v498_v22 = vpop.f32.mrf.mxu2 }
 0x105   :  { %v499_v23 = vadd.f32 %v498_v22, %v407_v21 }
 0x106   :  { %v590_v24 = vpop.f32.mrf.mxu3 }
 0x107   :  { %v591_v25 = vadd.f32 %v590_v24, %v499_v23  ;;  %v317_v26 = vpop.f32.mrf.mxu0 }
 0x108   :  { %v318_v27 = vadd.f32 %v1130_v63, %v317_v26 }
 0x109   :  { %v641_v28 = vmax.f32 %v591_v25, 0.0  ;;  %v409_v29 = vpop.f32.mrf.mxu1 }
 0x10a   :  { %v410_v30 = vadd.f32 %v409_v29, %v318_v27 }
 0x10b   :  { %666 = vst [vmem:[%s1352_s3 + $0x60] sm:$0xff] %v641_v28 }
 0x10c   :  { %v501_v31 = vpop.f32.mrf.mxu2 }
 0x10d   :  { %v502_v32 = vadd.f32 %v501_v31, %v410_v30 }
 0x10e   :  { %v593_v33 = vpop.f32.mrf.mxu3 }
 0x10f   :  { %v594_v34 = vadd.f32 %v593_v33, %v502_v32  ;;  %v320_v35 = vpop.f32.mrf.mxu0 }
 0x110   :  { %v321_v36 = vadd.f32 %v1130_v63, %v320_v35 }
 0x111   :  { %v642_v37 = vmax.f32 %v594_v34, 0.0  ;;  %v412_v38 = vpop.f32.mrf.mxu1 }
 0x112   :  { %v413_v39 = vadd.f32 %v412_v38, %v321_v36 }
 0x113   :  { %667 = vst [vmem:[%s1352_s3 + $0x68] sm:$0xff] %v642_v37 }
 0x114   :  { %v504_v40 = vpop.f32.mrf.mxu2 }
 0x115   :  { %v505_v41 = vadd.f32 %v504_v40, %v413_v39 }
 0x116   :  { %v596_v42 = vpop.f32.mrf.mxu3 }
 0x117   :  { %v597_v43 = vadd.f32 %v596_v42, %v505_v41  ;;  %v323_v44 = vpop.f32.mrf.mxu0 }
 0x118   :  { %v324_v45 = vadd.f32 %v1130_v63, %v323_v44 }
 0x119   :  { %v643_v46 = vmax.f32 %v597_v43, 0.0  ;;  %v415_v47 = vpop.f32.mrf.mxu1 }
 0x11a   :  { %v416_v48 = vadd.f32 %v415_v47, %v324_v45 }
 0x11b   :  { %668 = vst [vmem:[%s1352_s3 + $0x70] sm:$0xff] %v643_v46 }
 0x11c   :  { %v507_v49 = vpop.f32.mrf.mxu2 }
 0x11d   :  { %v508_v50 = vadd.f32 %v507_v49, %v416_v48 }
 0x11e   :  { %v599_v51 = vpop.f32.mrf.mxu3 }
 0x11f   :  { %v600_v52 = vadd.f32 %v599_v51, %v508_v50  ;;  %v326_v53 = vpop.f32.mrf.mxu0 }
 0x120   :  { %v327_v54 = vadd.f32 %v1130_v63, %v326_v53 }
 0x121   :  { %v644_v55 = vmax.f32 %v600_v52, 0.0  ;;  %v418_v56 = vpop.f32.mrf.mxu1 }
 0x122   :  { %v419_v57 = vadd.f32 %v418_v56, %v327_v54 }
 0x123   :  { %669 = vst [vmem:[%s1352_s3 + $0x78] sm:$0xff] %v644_v55 }
 0x124   :  { %v510_v58 = vpop.f32.mrf.mxu2 }
 0x125   :  { %v511_v59 = vadd.f32 %v510_v58, %v419_v57 }
 0x126   :  { %v602_v60 = vpop.f32.mrf.mxu3 }
 0x127   :  { %v603_v61 = vadd.f32 %v602_v60, %v511_v59  ;;  %v329_v62 = vpop.f32.mrf.mxu0 }
 0x128   :  { %v330_v0 = vadd.f32 %v1130_v63, %v329_v62 }
 0x129   :  { %v645_v1 = vmax.f32 %v603_v61, 0.0  ;;  %v421_v2 = vpop.f32.mrf.mxu1 }
 0x12a   :  { %v422_v3 = vadd.f32 %v421_v2, %v330_v0 }
 0x12b   :  { %670 = vst [vmem:[%s1352_s3 + $0x80] sm:$0xff] %v645_v1 }
 0x12c   :  { %v513_v4 = vpop.f32.mrf.mxu2 }
 0x12d   :  { %v514_v5 = vadd.f32 %v513_v4, %v422_v3 }
 0x12e   :  { %v605_v6 = vpop.f32.mrf.mxu3 }
 0x12f   :  { %v606_v7 = vadd.f32 %v605_v6, %v514_v5  ;;  %v332_v8 = vpop.f32.mrf.mxu0 }
 0x130   :  { %v333_v9 = vadd.f32 %v1130_v63, %v332_v8 }
 0x131   :  { %v646_v10 = vmax.f32 %v606_v7, 0.0  ;;  %v424_v11 = vpop.f32.mrf.mxu1 }
 0x132   :  { %v425_v12 = vadd.f32 %v424_v11, %v333_v9 }
 0x133   :  { %671 = vst [vmem:[%s1352_s3 + $0x88] sm:$0xff] %v646_v10 }
 0x134   :  { %v516_v13 = vpop.f32.mrf.mxu2 }
 0x135   :  { %v517_v14 = vadd.f32 %v516_v13, %v425_v12 }
 0x136   :  { %v608_v15 = vpop.f32.mrf.mxu3 }
 0x137   :  { %v609_v16 = vadd.f32 %v608_v15, %v517_v14  ;;  %v335_v17 = vpop.f32.mrf.mxu0 }
 0x138   :  { %v336_v18 = vadd.f32 %v1130_v63, %v335_v17 }
 0x139   :  { %v647_v19 = vmax.f32 %v609_v16, 0.0  ;;  %v427_v20 = vpop.f32.mrf.mxu1 }
 0x13a   :  { %v428_v21 = vadd.f32 %v427_v20, %v336_v18 }
 0x13b   :  { %672 = vst [vmem:[%s1352_s3 + $0x90] sm:$0xff] %v647_v19 }
 0x13c   :  { %v519_v22 = vpop.f32.mrf.mxu2 }
 0x13d   :  { %v520_v23 = vadd.f32 %v519_v22, %v428_v21 }
 0x13e   :  { %v611_v24 = vpop.f32.mrf.mxu3 }
 0x13f   :  { %v612_v25 = vadd.f32 %v611_v24, %v520_v23  ;;  %v338_v26 = vpop.f32.mrf.mxu0 }
 0x140   :  { %v339_v27 = vadd.f32 %v1130_v63, %v338_v26 }
 0x141   :  { %v648_v28 = vmax.f32 %v612_v25, 0.0  ;;  %v430_v29 = vpop.f32.mrf.mxu1 }
 0x142   :  { %v431_v30 = vadd.f32 %v430_v29, %v339_v27 }
 0x143   :  { %673 = vst [vmem:[%s1352_s3 + $0x98] sm:$0xff] %v648_v28 }
 0x144   :  { %v522_v31 = vpop.f32.mrf.mxu2 }
 0x145   :  { %v523_v32 = vadd.f32 %v522_v31, %v431_v30 }
 0x146   :  { %v614_v33 = vpop.f32.mrf.mxu3 }
 0x147   :  { %v615_v34 = vadd.f32 %v614_v33, %v523_v32  ;;  %v341_v35 = vpop.f32.mrf.mxu0 }
 0x148   :  { %v342_v36 = vadd.f32 %v1130_v63, %v341_v35 }
 0x149   :  { %v649_v37 = vmax.f32 %v615_v34, 0.0  ;;  %v433_v38 = vpop.f32.mrf.mxu1 }
 0x14a   :  { %v434_v39 = vadd.f32 %v433_v38, %v342_v36 }
 0x14b   :  { %674 = vst [vmem:[%s1352_s3 + $0xa0] sm:$0xff] %v649_v37 }
 0x14c   :  { %v525_v40 = vpop.f32.mrf.mxu2 }
 0x14d   :  { %v526_v41 = vadd.f32 %v525_v40, %v434_v39 }
 0x14e   :  { %v617_v42 = vpop.f32.mrf.mxu3 }
 0x14f   :  { %v618_v43 = vadd.f32 %v617_v42, %v526_v41  ;;  %v344_v44 = vpop.f32.mrf.mxu0 }
 0x150   :  { %v345_v45 = vadd.f32 %v1130_v63, %v344_v44 }
 0x151   :  { %v650_v46 = vmax.f32 %v618_v43, 0.0  ;;  %v436_v47 = vpop.f32.mrf.mxu1 }
 0x152   :  { %v437_v48 = vadd.f32 %v436_v47, %v345_v45 }
 0x153   :  { %675 = vst [vmem:[%s1352_s3 + $0xa8] sm:$0xff] %v650_v46 }
 0x154   :  { %v528_v49 = vpop.f32.mrf.mxu2 }
 0x155   :  { %v529_v50 = vadd.f32 %v528_v49, %v437_v48 }
 0x156   :  { %v620_v51 = vpop.f32.mrf.mxu3 }
 0x157   :  { %v621_v52 = vadd.f32 %v620_v51, %v529_v50  ;;  %v347_v53 = vpop.f32.mrf.mxu0 }
 0x158   :  { %v348_v54 = vadd.f32 %v1130_v63, %v347_v53 }
 0x159   :  { %v651_v55 = vmax.f32 %v621_v52, 0.0  ;;  %v439_v56 = vpop.f32.mrf.mxu1 }
 0x15a   :  { %v440_v57 = vadd.f32 %v439_v56, %v348_v54 }
 0x15b   :  { %676 = vst [vmem:[%s1352_s3 + $0xb0] sm:$0xff] %v651_v55 }
 0x15c   :  { %v531_v58 = vpop.f32.mrf.mxu2 }
 0x15d   :  { %v532_v59 = vadd.f32 %v531_v58, %v440_v57 }
 0x15e   :  { %v623_v60 = vpop.f32.mrf.mxu3 }
 0x15f   :  { %v624_v61 = vadd.f32 %v623_v60, %v532_v59  ;;  %v350_v62 = vpop.f32.mrf.mxu0 }
 0x160   :  { %v351_v0 = vadd.f32 %v1130_v63, %v350_v62 }
 0x161   :  { %v652_v1 = vmax.f32 %v624_v61, 0.0  ;;  %v442_v2 = vpop.f32.mrf.mxu1 }
 0x162   :  { %v443_v3 = vadd.f32 %v442_v2, %v351_v0 }
 0x163   :  { %677 = vst [vmem:[%s1352_s3 + $0xb8] sm:$0xff] %v652_v1 }
 0x164   :  { %v534_v4 = vpop.f32.mrf.mxu2 }
 0x165   :  { %v535_v5 = vadd.f32 %v534_v4, %v443_v3 }
 0x166   :  { %v626_v6 = vpop.f32.mrf.mxu3 }
 0x167   :  { %v627_v7 = vadd.f32 %v626_v6, %v535_v5 }
 0x169   :  { %v653_v8 = vmax.f32 %v627_v7, 0.0 }
 0x16b   :  { %678 = vst [vmem:[%s1352_s3 + $0xc0] sm:$0xff] %v653_v8 }

// kernel: _lenet5_forward.8
= control target key start
LH: loop header
LB: loop body
LE: loop exit
PB: predicated region body
PF: predicated region fallthrough
CT: control target
= control target key end

     0   :  { %s252_s0 = inlined_call_operand.vmem [shape: f32[10,2,5,256], index: 0, kind: input, shape index: {}]   ;;  %s253_s1 = inlined_call_operand.vmem [shape: f32[10,5,128], index: 1, kind: output, shape index: {}]  }
   0x1   :  { %v8_v0 = vld [vmem:[%s252_s0] sm:$0x1f]  ;;  %v9_v1 = vld [vmem:[%s252_s0 + $0x8] sm:$0x1f]  ;;  %v10_v2 = vld [vmem:[%s252_s0 + $0x10] sm:$0x1f] }
   0x2   :  { %v11_v3 = vld [vmem:[%s252_s0 + $0x18] sm:$0x1f]  ;;  %v48_v4 = vmax.f32 %v8_v0, %v10_v2  ;;  %v12_v5 = vld [vmem:[%s252_s0 + $0x20] sm:$0x1f]  ;;  %v13_v6 = vld [vmem:[%s252_s0 + $0x28] sm:$0x1f] }
   0x3   :  { %v49_v7 = vmax.f32 %v9_v1, %v11_v3  ;;  %v14_v8 = vld [vmem:[%s252_s0 + $0x30] sm:$0x1f]  ;;  %v15_v9 = vld [vmem:[%s252_s0 + $0x38] sm:$0x1f]  ;;  %v16_v10 = vld [vmem:[%s252_s0 + $0x40] sm:$0x1f] }
   0x4   :  { %v50_v11 = vmax.f32 %v12_v5, %v14_v8  ;;  %v51_v12 = vmax.f32 %v13_v6, %v15_v9  ;;  %v17_v13 = vld [vmem:[%s252_s0 + $0x48] sm:$0x1f]  ;;  %v18_v14 = vld [vmem:[%s252_s0 + $0x50] sm:$0x1f]  ;;  %v19_v15 = vld [vmem:[%s252_s0 + $0x58] sm:$0x1f] }
   0x5   :  { %v68_v16 = vmax.f32 %v48_v4, %v49_v7  ;;  %v52_v17 = vmax.f32 %v16_v10, %v18_v14  ;;  %v53_v18 = vmax.f32 %v17_v13, %v19_v15  ;;  %v20_v19 = vld [vmem:[%s252_s0 + $0x60] sm:$0x1f]  ;;  %v21_v20 = vld [vmem:[%s252_s0 + $0x68] sm:$0x1f]  ;;  %v22_v21 = vld [vmem:[%s252_s0 + $0x70] sm:$0x1f] }
   0x6   :  { %v69_v22 = vmax.f32 %v50_v11, %v51_v12  ;;  %v23_v23 = vld [vmem:[%s252_s0 + $0x78] sm:$0x1f]  ;;  %v54_v24 = vmax.f32 %v20_v19, %v22_v21  ;;  %v24_v25 = vld [vmem:[%s252_s0 + $0x80] sm:$0x1f]  ;;  %v25_v26 = vld [vmem:[%s252_s0 + $0x88] sm:$0x1f] }
   0x7   :  { %78 = vst [vmem:[%s253_s1] sm:$0x1f] %v68_v16  ;;  %v70_v27 = vmax.f32 %v52_v17, %v53_v18  ;;  %v55_v28 = vmax.f32 %v21_v20, %v23_v23  ;;  %v26_v29 = vld [vmem:[%s252_s0 + $0x90] sm:$0x1f]  ;;  %v27_v30 = vld [vmem:[%s252_s0 + $0x98] sm:$0x1f] }
   0x8   :  { %79 = vst [vmem:[%s253_s1 + $0x8] sm:$0x1f] %v69_v22  ;;  %v56_v31 = vmax.f32 %v24_v25, %v26_v29  ;;  %v57_v32 = vmax.f32 %v25_v26, %v27_v30  ;;  %v28_v33 = vld [vmem:[%s252_s0 + $0xa0] sm:$0x1f]  ;;  %v29_v34 = vld [vmem:[%s252_s0 + $0xa8] sm:$0x1f] }
   0x9   :  { %80 = vst [vmem:[%s253_s1 + $0x10] sm:$0x1f] %v70_v27  ;;  %v71_v35 = vmax.f32 %v54_v24, %v55_v28  ;;  %v30_v36 = vld [vmem:[%s252_s0 + $0xb0] sm:$0x1f]  ;;  %v31_v37 = vld [vmem:[%s252_s0 + $0xb8] sm:$0x1f] }
   0xa   :  { %v72_v38 = vmax.f32 %v56_v31, %v57_v32  ;;  %v58_v39 = vmax.f32 %v28_v33, %v30_v36  ;;  %v59_v40 = vmax.f32 %v29_v34, %v31_v37  ;;  %v32_v41 = vld [vmem:[%s252_s0 + $0xc0] sm:$0x1f]  ;;  %v33_v42 = vld [vmem:[%s252_s0 + $0xc8] sm:$0x1f]  ;;  %v34_v43 = vld [vmem:[%s252_s0 + $0xd0] sm:$0x1f] }
   0xb   :  { %81 = vst [vmem:[%s253_s1 + $0x18] sm:$0x1f] %v71_v35  ;;  %v35_v44 = vld [vmem:[%s252_s0 + $0xd8] sm:$0x1f]  ;;  %v60_v45 = vmax.f32 %v32_v41, %v34_v43  ;;  %v36_v46 = vld [vmem:[%s252_s0 + $0xe0] sm:$0x1f] }
   0xc   :  { %82 = vst [vmem:[%s253_s1 + $0x20] sm:$0x1f] %v72_v38  ;;  %v73_v47 = vmax.f32 %v58_v39, %v59_v40  ;;  %v61_v48 = vmax.f32 %v33_v42, %v35_v44  ;;  %v37_v49 = vld [vmem:[%s252_s0 + $0xe8] sm:$0x1f]  ;;  %v38_v50 = vld [vmem:[%s252_s0 + $0xf0] sm:$0x1f] }
   0xd   :  { %v39_v51 = vld [vmem:[%s252_s0 + $0xf8] sm:$0x1f]  ;;  %v62_v52 = vmax.f32 %v36_v46, %v38_v50  ;;  %v40_v53 = vld [vmem:[%s252_s0 + $0x100] sm:$0x1f]  ;;  %v41_v54 = vld [vmem:[%s252_s0 + $0x108] sm:$0x1f] }
   0xe   :  { %83 = vst [vmem:[%s253_s1 + $0x28] sm:$0x1f] %v73_v47  ;;  %v74_v55 = vmax.f32 %v60_v45, %v61_v48  ;;  %v63_v56 = vmax.f32 %v37_v49, %v39_v51  ;;  %v42_v57 = vld [vmem:[%s252_s0 + $0x110] sm:$0x1f]  ;;  %v43_v58 = vld [vmem:[%s252_s0 + $0x118] sm:$0x1f] }
   0xf   :  { %v64_v59 = vmax.f32 %v40_v53, %v42_v57  ;;  %v65_v60 = vmax.f32 %v41_v54, %v43_v58  ;;  %v44_v61 = vld [vmem:[%s252_s0 + $0x120] sm:$0x1f]  ;;  %v45_v62 = vld [vmem:[%s252_s0 + $0x128] sm:$0x1f]  ;;  %v46_v63 = vld [vmem:[%s252_s0 + $0x130] sm:$0x1f] }
  0x10   :  { %84 = vst [vmem:[%s253_s1 + $0x30] sm:$0x1f] %v74_v55  ;;  %v75_v0 = vmax.f32 %v62_v52, %v63_v56  ;;  %v47_v1 = vld [vmem:[%s252_s0 + $0x138] sm:$0x1f]  ;;  %v66_v2 = vmax.f32 %v44_v61, %v46_v63 }
  0x11   :  { %v76_v3 = vmax.f32 %v64_v59, %v65_v60  ;;  %v67_v4 = vmax.f32 %v45_v62, %v47_v1 }
  0x12   :  { %85 = vst [vmem:[%s253_s1 + $0x38] sm:$0x1f] %v75_v0 }
  0x13   :  { %86 = vst [vmem:[%s253_s1 + $0x40] sm:$0x1f] %v76_v3  ;;  %v77_v5 = vmax.f32 %v66_v2, %v67_v4 }
  0x15   :  { %87 = vst [vmem:[%s253_s1 + $0x48] sm:$0x1f] %v77_v5 }

// kernel: _lenet5_forward.9
= control target key start
LH: loop header
LB: loop body
LE: loop exit
PB: predicated region body
PF: predicated region fallthrough
CT: control target
= control target key end

     0   :  { %vm513_vm0 = vcmask 1041408   ;;  %vm509_vm1 = vcmask 801792   ;;  %s2967_s1 = inlined_call_operand.vmem [shape: f32[1250,384], index: 1, kind: input, shape index: {}]   ;;  %s2968_s0 = inlined_call_operand.vmem [shape: f32[8,1250], index: 0, kind: input, shape index: {}]   ;;  %s2969_s2 = inlined_call_operand.vmem [shape: f32[1,384], index: 2, kind: input, shape index: {}]   ;;  %s2970_s3 = inlined_call_operand.vmem [shape: f32[384,128], index: 3, kind: input, shape index: {}]   ;;  %s2971_s4 = inlined_call_operand.vmem [shape: f32[1,128], index: 4, kind: input, shape index: {}]   ;;  %s2972_s5 = inlined_call_operand.vmem [shape: f32[8,128], index: 5, kind: output, shape index: {}]  }
   0x1   :  { %v75_v0 = vld [vmem:[%s2967_s1 + $0x168] sm:$0xff]  ;;  %v72_v3 = vld [vmem:[%s2967_s1 + $0x150] sm:$0xff]  ;;  %v69_v7 = vld [vmem:[%s2967_s1 + $0x138] sm:$0xff] }
   0x2   :  { %v123_v1 = vld [vmem:[%s2967_s1 + $0x2e8] sm:$0xff]  ;;  %523 = vmatpush.msra.mxu0 %v75_v0  ;;  %v120_v4 = vld [vmem:[%s2967_s1 + $0x2d0] sm:$0xff]  ;;  %v117_v8 = vld [vmem:[%s2967_s1 + $0x2b8] sm:$0xff] }
   0x3   :  { %v171_v2 = vld [vmem:[%s2967_s1 + $0x468] sm:$0xff]  ;;  %543 = vmatpush.msra.mxu1 %v123_v1  ;;  %v168_v5 = vld [vmem:[%s2967_s1 + $0x450] sm:$0xff]  ;;  %v165_v9 = vld [vmem:[%s2967_s1 + $0x438] sm:$0xff] }
   0x4   :  { %563 = vmatpush.msra.mxu2 %v171_v2  ;;  %v219_v6 = vld [vmem:[%s2967_s1 + $0x5e8] sm:$0xff]  ;;  %524 = vmatpush.msra.mxu0 %v72_v3  ;;  %v216_v10 = vld [vmem:[%s2967_s1 + $0x5d0] sm:$0xff]  ;;  %v66_v11 = vld [vmem:[%s2967_s1 + $0x120] sm:$0xff] }
   0x5   :  { %544 = vmatpush.msra.mxu1 %v120_v4  ;;  %583 = vmatpush.msra.mxu3 %v219_v6  ;;  %v114_v12 = vld [vmem:[%s2967_s1 + $0x2a0] sm:$0xff]  ;;  %v213_v14 = vld [vmem:[%s2967_s1 + $0x5b8] sm:$0xff]  ;;  %v63_v15 = vld [vmem:[%s2967_s1 + $0x108] sm:$0xff] }
   0x6   :  { %564 = vmatpush.msra.mxu2 %v168_v5  ;;  %525 = vmatpush.msra.mxu0 %v69_v7  ;;  %v162_v13 = vld [vmem:[%s2967_s1 + $0x420] sm:$0xff]  ;;  %v111_v16 = vld [vmem:[%s2967_s1 + $0x288] sm:$0xff]  ;;  %v60_v19 = vld [vmem:[%s2967_s1 + $0xf0] sm:$0xff] }
   0x7   :  { %545 = vmatpush.msra.mxu1 %v117_v8  ;;  %584 = vmatpush.msra.mxu3 %v216_v10  ;;  %v159_v17 = vld [vmem:[%s2967_s1 + $0x408] sm:$0xff]  ;;  %v210_v18 = vld [vmem:[%s2967_s1 + $0x5a0] sm:$0xff]  ;;  %v108_v20 = vld [vmem:[%s2967_s1 + $0x270] sm:$0xff] }
   0x8   :  { %565 = vmatpush.msra.mxu2 %v165_v9  ;;  %526 = vmatpush.msra.mxu0 %v66_v11  ;;  %v156_v21 = vld [vmem:[%s2967_s1 + $0x3f0] sm:$0xff]  ;;  %v207_v22 = vld [vmem:[%s2967_s1 + $0x588] sm:$0xff]  ;;  %v57_v23 = vld [vmem:[%s2967_s1 + $0xd8] sm:$0xff] }
   0x9   :  { %546 = vmatpush.msra.mxu1 %v114_v12  ;;  %585 = vmatpush.msra.mxu3 %v213_v14  ;;  %v105_v24 = vld [vmem:[%s2967_s1 + $0x258] sm:$0xff]  ;;  %v204_v26 = vld [vmem:[%s2967_s1 + $0x570] sm:$0xff]  ;;  %v54_v27 = vld [vmem:[%s2967_s1 + $0xc0] sm:$0xff] }
   0xa   :  { %566 = vmatpush.msra.mxu2 %v162_v13  ;;  %527 = vmatpush.msra.mxu0 %v63_v15  ;;  %v153_v25 = vld [vmem:[%s2967_s1 + $0x3d8] sm:$0xff]  ;;  %v102_v28 = vld [vmem:[%s2967_s1 + $0x240] sm:$0xff]  ;;  %v51_v31 = vld [vmem:[%s2967_s1 + $0xa8] sm:$0xff] }
   0xb   :  { %547 = vmatpush.msra.mxu1 %v111_v16  ;;  %586 = vmatpush.msra.mxu3 %v210_v18  ;;  %v150_v29 = vld [vmem:[%s2967_s1 + $0x3c0] sm:$0xff]  ;;  %v201_v30 = vld [vmem:[%s2967_s1 + $0x558] sm:$0xff]  ;;  %v99_v32 = vld [vmem:[%s2967_s1 + $0x228] sm:$0xff] }
   0xc   :  { %567 = vmatpush.msra.mxu2 %v159_v17  ;;  %528 = vmatpush.msra.mxu0 %v60_v19  ;;  %v147_v33 = vld [vmem:[%s2967_s1 + $0x3a8] sm:$0xff]  ;;  %v198_v34 = vld [vmem:[%s2967_s1 + $0x540] sm:$0xff]  ;;  %v48_v35 = vld [vmem:[%s2967_s1 + $0x90] sm:$0xff] }
   0xd   :  { %548 = vmatpush.msra.mxu1 %v108_v20  ;;  %587 = vmatpush.msra.mxu3 %v207_v22  ;;  %v96_v36 = vld [vmem:[%s2967_s1 + $0x210] sm:$0xff]  ;;  %v195_v38 = vld [vmem:[%s2967_s1 + $0x528] sm:$0xff]  ;;  %v45_v39 = vld [vmem:[%s2967_s1 + $0x78] sm:$0xff] }
   0xe   :  { %568 = vmatpush.msra.mxu2 %v156_v21  ;;  %529 = vmatpush.msra.mxu0 %v57_v23  ;;  %v144_v37 = vld [vmem:[%s2967_s1 + $0x390] sm:$0xff]  ;;  %v93_v40 = vld [vmem:[%s2967_s1 + $0x1f8] sm:$0xff]  ;;  %v42_v43 = vld [vmem:[%s2967_s1 + $0x60] sm:$0xff] }
   0xf   :  { %549 = vmatpush.msra.mxu1 %v105_v24  ;;  %588 = vmatpush.msra.mxu3 %v204_v26  ;;  %v141_v41 = vld [vmem:[%s2967_s1 + $0x378] sm:$0xff]  ;;  %v192_v42 = vld [vmem:[%s2967_s1 + $0x510] sm:$0xff]  ;;  %v90_v44 = vld [vmem:[%s2967_s1 + $0x1e0] sm:$0xff] }
  0x10   :  { %569 = vmatpush.msra.mxu2 %v153_v25  ;;  %530 = vmatpush.msra.mxu0 %v54_v27  ;;  %v138_v45 = vld [vmem:[%s2967_s1 + $0x360] sm:$0xff]  ;;  %v189_v46 = vld [vmem:[%s2967_s1 + $0x4f8] sm:$0xff]  ;;  %v39_v47 = vld [vmem:[%s2967_s1 + $0x48] sm:$0xff] }
  0x11   :  { %550 = vmatpush.msra.mxu1 %v102_v28  ;;  %589 = vmatpush.msra.mxu3 %v201_v30  ;;  %v87_v48 = vld [vmem:[%s2967_s1 + $0x1c8] sm:$0xff]  ;;  %v186_v50 = vld [vmem:[%s2967_s1 + $0x4e0] sm:$0xff]  ;;  %v36_v51 = vld [vmem:[%s2967_s1 + $0x30] sm:$0xff] }
  0x12   :  { %570 = vmatpush.msra.mxu2 %v150_v29  ;;  %531 = vmatpush.msra.mxu0 %v51_v31  ;;  %v135_v49 = vld [vmem:[%s2967_s1 + $0x348] sm:$0xff]  ;;  %v84_v52 = vld [vmem:[%s2967_s1 + $0x1b0] sm:$0xff]  ;;  %v33_v55 = vld [vmem:[%s2967_s1 + $0x18] sm:$0xff] }
  0x13   :  { %551 = vmatpush.msra.mxu1 %v99_v32  ;;  %590 = vmatpush.msra.mxu3 %v198_v34  ;;  %v132_v53 = vld [vmem:[%s2967_s1 + $0x330] sm:$0xff]  ;;  %v183_v54 = vld [vmem:[%s2967_s1 + $0x4c8] sm:$0xff]  ;;  %v81_v56 = vld [vmem:[%s2967_s1 + $0x198] sm:$0xff] }
  0x14   :  { %571 = vmatpush.msra.mxu2 %v147_v33  ;;  %532 = vmatpush.msra.mxu0 %v48_v35  ;;  %v129_v57 = vld [vmem:[%s2967_s1 + $0x318] sm:$0xff]  ;;  %v180_v58 = vld [vmem:[%s2967_s1 + $0x4b0] sm:$0xff]  ;;  %v30_v59 = vld [vmem:[%s2967_s1] sm:$0xff] }
  0x15   :  { %552 = vmatpush.msra.mxu1 %v96_v36  ;;  %591 = vmatpush.msra.mxu3 %v195_v38  ;;  %v78_v60 = vld [vmem:[%s2967_s1 + $0x180] sm:$0xff]  ;;  %v177_v62 = vld [vmem:[%s2967_s1 + $0x498] sm:$0xff]  ;;  %v267_v63 = vld [vmem:[%s2967_s1 + $0x768] sm:$0xff] }
  0x16   :  { %572 = vmatpush.msra.mxu2 %v144_v37  ;;  %533 = vmatpush.msra.mxu0 %v45_v39  ;;  %v126_v61 = vld [vmem:[%s2967_s1 + $0x300] sm:$0xff]  ;;  %v315_v0 = vld [vmem:[%s2967_s1 + $0x8e8] sm:$0xff]  ;;  %v264_v3 = vld [vmem:[%s2967_s1 + $0x750] sm:$0xff] }
  0x17   :  { %553 = vmatpush.msra.mxu1 %v93_v40  ;;  %592 = vmatpush.msra.mxu3 %v192_v42  ;;  %v363_v1 = vld [vmem:[%s2967_s1 + $0xa68] sm:$0xff]  ;;  %v174_v2 = vld [vmem:[%s2967_s1 + $0x480] sm:$0xff]  ;;  %v312_v4 = vld [vmem:[%s2967_s1 + $0x8d0] sm:$0xff] }
  0x18   :  { %573 = vmatpush.msra.mxu2 %v141_v41  ;;  %534 = vmatpush.msra.mxu0 %v42_v43  ;;  %v360_v5 = vld [vmem:[%s2967_s1 + $0xa50] sm:$0xff]  ;;  %v411_v6 = vld [vmem:[%s2967_s1 + $0xbe8] sm:$0xff]  ;;  %v261_v7 = vld [vmem:[%s2967_s1 + $0x738] sm:$0xff] }
  0x19   :  { %554 = vmatpush.msra.mxu1 %v90_v44  ;;  %593 = vmatpush.msra.mxu3 %v189_v46  ;;  %v309_v8 = vld [vmem:[%s2967_s1 + $0x8b8] sm:$0xff]  ;;  %v408_v10 = vld [vmem:[%s2967_s1 + $0xbd0] sm:$0xff]  ;;  %v258_v11 = vld [vmem:[%s2967_s1 + $0x720] sm:$0xff] }
  0x1a   :  { %574 = vmatpush.msra.mxu2 %v138_v45  ;;  %535 = vmatpush.msra.mxu0 %v39_v47  ;;  %v357_v9 = vld [vmem:[%s2967_s1 + $0xa38] sm:$0xff]  ;;  %v306_v12 = vld [vmem:[%s2967_s1 + $0x8a0] sm:$0xff]  ;;  %v255_v15 = vld [vmem:[%s2967_s1 + $0x708] sm:$0xff] }
  0x1b   :  { %555 = vmatpush.msra.mxu1 %v87_v48  ;;  %594 = vmatpush.msra.mxu3 %v186_v50  ;;  %v354_v13 = vld [vmem:[%s2967_s1 + $0xa20] sm:$0xff]  ;;  %v405_v14 = vld [vmem:[%s2967_s1 + $0xbb8] sm:$0xff]  ;;  %v303_v16 = vld [vmem:[%s2967_s1 + $0x888] sm:$0xff] }
  0x1c   :  { %575 = vmatpush.msra.mxu2 %v135_v49  ;;  %536 = vmatpush.msra.mxu0 %v36_v51  ;;  %v351_v17 = vld [vmem:[%s2967_s1 + $0xa08] sm:$0xff]  ;;  %v402_v18 = vld [vmem:[%s2967_s1 + $0xba0] sm:$0xff]  ;;  %v252_v19 = vld [vmem:[%s2967_s1 + $0x6f0] sm:$0xff] }
  0x1d   :  { %556 = vmatpush.msra.mxu1 %v84_v52  ;;  %595 = vmatpush.msra.mxu3 %v183_v54  ;;  %v300_v20 = vld [vmem:[%s2967_s1 + $0x870] sm:$0xff]  ;;  %v399_v22 = vld [vmem:[%s2967_s1 + $0xb88] sm:$0xff]  ;;  %v249_v23 = vld [vmem:[%s2967_s1 + $0x6d8] sm:$0xff] }
  0x1e   :  { %576 = vmatpush.msra.mxu2 %v132_v53  ;;  %537 = vmatpush.msra.mxu0 %v33_v55  ;;  %v348_v21 = vld [vmem:[%s2967_s1 + $0x9f0] sm:$0xff]  ;;  %v297_v24 = vld [vmem:[%s2967_s1 + $0x858] sm:$0xff]  ;;  %v246_v27 = vld [vmem:[%s2967_s1 + $0x6c0] sm:$0xff] }
  0x1f   :  { %557 = vmatpush.msra.mxu1 %v81_v56  ;;  %596 = vmatpush.msra.mxu3 %v180_v58  ;;  %v345_v25 = vld [vmem:[%s2967_s1 + $0x9d8] sm:$0xff]  ;;  %v396_v26 = vld [vmem:[%s2967_s1 + $0xb70] sm:$0xff]  ;;  %v294_v28 = vld [vmem:[%s2967_s1 + $0x840] sm:$0xff] }
  0x20   :  { %577 = vmatpush.msra.mxu2 %v129_v57  ;;  %538 = vmatpush.msra.mxu0 %v30_v59  ;;  %v342_v29 = vld [vmem:[%s2967_s1 + $0x9c0] sm:$0xff]  ;;  %v393_v30 = vld [vmem:[%s2967_s1 + $0xb58] sm:$0xff]  ;;  %v243_v31 = vld [vmem:[%s2967_s1 + $0x6a8] sm:$0xff] }
  0x21   :  { %558 = vmatpush.msra.mxu1 %v78_v60  ;;  %597 = vmatpush.msra.mxu3 %v177_v62  ;;  %v291_v32 = vld [vmem:[%s2967_s1 + $0x828] sm:$0xff]  ;;  %v390_v34 = vld [vmem:[%s2967_s1 + $0xb40] sm:$0xff]  ;;  %v240_v35 = vld [vmem:[%s2967_s1 + $0x690] sm:$0xff] }
  0x22   :  { %578 = vmatpush.msra.mxu2 %v126_v61  ;;  %603 = vmatpush.msrb.mxu0 %v267_v63  ;;  %v339_v33 = vld [vmem:[%s2967_s1 + $0x9a8] sm:$0xff]  ;;  %v288_v36 = vld [vmem:[%s2967_s1 + $0x810] sm:$0xff]  ;;  %v237_v39 = vld [vmem:[%s2967_s1 + $0x678] sm:$0xff] }
  0x23   :  { %623 = vmatpush.msrb.mxu1 %v315_v0  ;;  %598 = vmatpush.msra.mxu3 %v174_v2  ;;  %v336_v37 = vld [vmem:[%s2967_s1 + $0x990] sm:$0xff]  ;;  %v387_v38 = vld [vmem:[%s2967_s1 + $0xb28] sm:$0xff]  ;;  %v285_v40 = vld [vmem:[%s2967_s1 + $0x7f8] sm:$0xff] }
  0x24   :  { %643 = vmatpush.msrb.mxu2 %v363_v1  ;;  %604 = vmatpush.msrb.mxu0 %v264_v3  ;;  %v333_v41 = vld [vmem:[%s2967_s1 + $0x978] sm:$0xff]  ;;  %v384_v42 = vld [vmem:[%s2967_s1 + $0xb10] sm:$0xff]  ;;  %v234_v43 = vld [vmem:[%s2967_s1 + $0x660] sm:$0xff] }
  0x25   :  { %624 = vmatpush.msrb.mxu1 %v312_v4  ;;  %663 = vmatpush.msrb.mxu3 %v411_v6  ;;  %v282_v44 = vld [vmem:[%s2967_s1 + $0x7e0] sm:$0xff]  ;;  %v381_v46 = vld [vmem:[%s2967_s1 + $0xaf8] sm:$0xff]  ;;  %v231_v47 = vld [vmem:[%s2967_s1 + $0x648] sm:$0xff] }
  0x26   :  { %644 = vmatpush.msrb.mxu2 %v360_v5  ;;  %605 = vmatpush.msrb.mxu0 %v261_v7  ;;  %v330_v45 = vld [vmem:[%s2967_s1 + $0x960] sm:$0xff]  ;;  %v279_v48 = vld [vmem:[%s2967_s1 + $0x7c8] sm:$0xff]  ;;  %v228_v51 = vld [vmem:[%s2967_s1 + $0x630] sm:$0xff] }
  0x27   :  { %625 = vmatpush.msrb.mxu1 %v309_v8  ;;  %664 = vmatpush.msrb.mxu3 %v408_v10  ;;  %v327_v49 = vld [vmem:[%s2967_s1 + $0x948] sm:$0xff]  ;;  %v378_v50 = vld [vmem:[%s2967_s1 + $0xae0] sm:$0xff]  ;;  %v276_v52 = vld [vmem:[%s2967_s1 + $0x7b0] sm:$0xff] }
  0x28   :  { %645 = vmatpush.msrb.mxu2 %v357_v9  ;;  %606 = vmatpush.msrb.mxu0 %v258_v11  ;;  %v324_v53 = vld [vmem:[%s2967_s1 + $0x930] sm:$0xff]  ;;  %v375_v54 = vld [vmem:[%s2967_s1 + $0xac8] sm:$0xff]  ;;  %v225_v56 = vld [vmem:[%s2967_s1 + $0x618] sm:$0xff] }
  0x29   :  { %626 = vmatpush.msrb.mxu1 %v306_v12  ;;  %665 = vmatpush.msrb.mxu3 %v405_v14  ;;  %v1650_v55 = vld [vmem:[%s2968_s0 + $0x10] sm:$0xff]  ;;  %v273_v57 = vld [vmem:[%s2967_s1 + $0x798] sm:$0xff]  ;;  %v1667_v60 = vld [vmem:[%s2968_s0] sm:$0xff] }
  0x2a   :  { %646 = vmatpush.msrb.mxu2 %v354_v13  ;;  %607 = vmatpush.msrb.mxu0 %v255_v15  ;;  %v321_v58 = vld [vmem:[%s2967_s1 + $0x918] sm:$0xff]  ;;  %v372_v59 = vld [vmem:[%s2967_s1 + $0xab0] sm:$0xff]  ;;  %v222_v62 = vld [vmem:[%s2967_s1 + $0x600] sm:$0xff] }
  0x2b   :  { %627 = vmatpush.msrb.mxu1 %v303_v16  ;;  %666 = vmatpush.msrb.mxu3 %v402_v18  ;;  %v1673_v61 = vld [vmem:[%s2968_s0 + $0x18] sm:$0xff]  ;;  %v270_v63 = vld [vmem:[%s2967_s1 + $0x780] sm:$0xff]  ;;  %v1691_v2 = vld [vmem:[%s2968_s0 + $0x8] sm:$0xff] }
  0x2c   :  { %647 = vmatpush.msrb.mxu2 %v351_v17  ;;  %608 = vmatpush.msrb.mxu0 %v252_v19  ;;  %v318_v0 = vld [vmem:[%s2967_s1 + $0x900] sm:$0xff]  ;;  %v369_v1 = vld [vmem:[%s2967_s1 + $0xa98] sm:$0xff]  ;;  %v459_v3 = vld [vmem:[%s2967_s1 + $0xd68] sm:$0xff] }
  0x2d   :  { %628 = vmatpush.msrb.mxu1 %v300_v20  ;;  %667 = vmatpush.msrb.mxu3 %v399_v22  ;;  %v498_v4 = vld [vmem:[%s2967_s1 + $0xea0] sm:$0x3]  ;;  %v76_v5 = vld [vmem:[%s2967_s1 + $0x170] sm:$0xff]  ;;  %v495_v8 = vld [vmem:[%s2967_s1 + $0xe88] sm:$0xff] }
  0x2e   :  { %648 = vmatpush.msrb.mxu2 %v348_v21  ;;  %609 = vmatpush.msrb.mxu0 %v249_v23  ;;  %v366_v6 = vld [vmem:[%s2967_s1 + $0xa80] sm:$0xff]  ;;  %v456_v7 = vld [vmem:[%s2967_s1 + $0xd50] sm:$0xff]  ;;  %v73_v9 = vld [vmem:[%s2967_s1 + $0x158] sm:$0xff] }
  0x2f   :  { %629 = vmatpush.msrb.mxu1 %v297_v24  ;;  %668 = vmatpush.msrb.mxu3 %v396_v26  ;;  %v124_v10 = vld [vmem:[%s2967_s1 + $0x2f0] sm:$0xff]  ;;  %v453_v12 = vld [vmem:[%s2967_s1 + $0xd38] sm:$0xff]  ;;  %v70_v14 = vld [vmem:[%s2967_s1 + $0x140] sm:$0xff] }
  0x30   :  { %649 = vmatpush.msrb.mxu2 %v345_v25  ;;  %610 = vmatpush.msrb.mxu0 %v246_v27  ;;  %v1723_v11 = vld [vmem:[%s2968_s0 + $0x30] sm:$0xff]  ;;  %v121_v15 = vld [vmem:[%s2967_s1 + $0x2d8] sm:$0xff]  ;;  %v1740_v16 = vld [vmem:[%s2968_s0 + $0x20] sm:$0xff] }
  0x31   :  { %630 = vmatpush.msrb.mxu1 %v294_v28  ;;  %669 = vmatpush.msrb.mxu3 %v393_v30  ;;  %v492_v13 = vld [vmem:[%s2967_s1 + $0xe70] sm:$0xff]  ;;  %v1746_v17 = vld [vmem:[%s2968_s0 + $0x38] sm:$0xff]  ;;  %v450_v18 = vld [vmem:[%s2967_s1 + $0xd20] sm:$0xff] }
  0x32   :  { %650 = vmatpush.msrb.mxu2 %v342_v29  ;;  %611 = vmatpush.msrb.mxu0 %v243_v31  ;;  %v489_v19 = vld [vmem:[%s2967_s1 + $0xe58] sm:$0xff]  ;;  %v67_v20 = vld [vmem:[%s2967_s1 + $0x128] sm:$0xff]  ;;  %v118_v21 = vld [vmem:[%s2967_s1 + $0x2c0] sm:$0xff] }
  0x33   :  { %631 = vmatpush.msrb.mxu1 %v291_v32  ;;  %670 = vmatpush.msrb.mxu3 %v390_v34  ;;  %v1764_v22 = vld [vmem:[%s2968_s0 + $0x28] sm:$0xff]  ;;  %v486_v24 = vld [vmem:[%s2967_s1 + $0xe40] sm:$0xff]  ;;  %v64_v25 = vld [vmem:[%s2967_s1 + $0x110] sm:$0xff] }
  0x34   :  { %651 = vmatpush.msrb.mxu2 %v339_v33  ;;  %612 = vmatpush.msrb.mxu0 %v240_v35  ;;  %v447_v23 = vld [vmem:[%s2967_s1 + $0xd08] sm:$0xff]  ;;  %v444_v27 = vld [vmem:[%s2967_s1 + $0xcf0] sm:$0xff]  ;;  %v61_v29 = vld [vmem:[%s2967_s1 + $0xf8] sm:$0xff] }
  0x35   :  { %632 = vmatpush.msrb.mxu1 %v288_v36  ;;  %671 = vmatpush.msrb.mxu3 %v387_v38  ;;  %v115_v26 = vld [vmem:[%s2967_s1 + $0x2a8] sm:$0xff]  ;;  %v112_v30 = vld [vmem:[%s2967_s1 + $0x290] sm:$0xff]  ;;  %v441_v31 = vld [vmem:[%s2967_s1 + $0xcd8] sm:$0xff] }
  0x36   :  { %652 = vmatpush.msrb.mxu2 %v336_v37  ;;  %613 = vmatpush.msrb.mxu0 %v237_v39  ;;  %v483_v28 = vld [vmem:[%s2967_s1 + $0xe28] sm:$0xff]  ;;  %v480_v32 = vld [vmem:[%s2967_s1 + $0xe10] sm:$0xff]  ;;  %v58_v33 = vld [vmem:[%s2967_s1 + $0xe0] sm:$0xff] }
  0x37   :  { %633 = vmatpush.msrb.mxu1 %v285_v40  ;;  %672 = vmatpush.msrb.mxu3 %v384_v42  ;;  %v109_v34 = vld [vmem:[%s2967_s1 + $0x278] sm:$0xff]  ;;  %v438_v35 = vld [vmem:[%s2967_s1 + $0xcc0] sm:$0xff]  ;;  %v55_v37 = vld [vmem:[%s2967_s1 + $0xc8] sm:$0xff] }
  0x38   :  { %653 = vmatpush.msrb.mxu2 %v333_v41  ;;  %614 = vmatpush.msrb.mxu0 %v234_v43  ;;  %v477_v36 = vld [vmem:[%s2967_s1 + $0xdf8] sm:$0xff]  ;;  %v106_v38 = vld [vmem:[%s2967_s1 + $0x260] sm:$0xff]  ;;  %v435_v39 = vld [vmem:[%s2967_s1 + $0xca8] sm:$0xff] }
  0x39   :  { %634 = vmatpush.msrb.mxu1 %v282_v44  ;;  %673 = vmatpush.msrb.mxu3 %v381_v46  ;;  %v474_v40 = vld [vmem:[%s2967_s1 + $0xde0] sm:$0xff]  ;;  %v52_v41 = vld [vmem:[%s2967_s1 + $0xb0] sm:$0xff]  ;;  %v103_v42 = vld [vmem:[%s2967_s1 + $0x248] sm:$0xff] }
  0x3a   :  { %654 = vmatpush.msrb.mxu2 %v330_v45  ;;  %615 = vmatpush.msrb.mxu0 %v231_v47  ;;  %v432_v43 = vld [vmem:[%s2967_s1 + $0xc90] sm:$0xff]  ;;  %v471_v44 = vld [vmem:[%s2967_s1 + $0xdc8] sm:$0xff]  ;;  %v49_v45 = vld [vmem:[%s2967_s1 + $0x98] sm:$0xff] }
  0x3b   :  { %635 = vmatpush.msrb.mxu1 %v279_v48  ;;  %674 = vmatpush.msrb.mxu3 %v378_v50  ;;  %v100_v46 = vld [vmem:[%s2967_s1 + $0x230] sm:$0xff]  ;;  %v429_v47 = vld [vmem:[%s2967_s1 + $0xc78] sm:$0xff] }
  0x3c   :  { %655 = vmatpush.msrb.mxu2 %v327_v49  ;;  %616 = vmatpush.msrb.mxu0 %v228_v51  ;;  %v468_v48 = vld [vmem:[%s2967_s1 + $0xdb0] sm:$0xff]  ;;  %v46_v49 = vld [vmem:[%s2967_s1 + $0x80] sm:$0xff]  ;;  %v97_v50 = vld [vmem:[%s2967_s1 + $0x218] sm:$0xff] }
  0x3d   :  { %636 = vmatpush.msrb.mxu1 %v276_v52  ;;  %675 = vmatpush.msrb.mxu3 %v375_v54  ;;  %v426_v51 = vld [vmem:[%s2967_s1 + $0xc60] sm:$0xff]  ;;  %v465_v52 = vld [vmem:[%s2967_s1 + $0xd98] sm:$0xff] }
  0x3e   :  { %656 = vmatpush.msrb.mxu2 %v324_v53  ;;  %617 = vmatpush.msrb.mxu0 %v225_v56  ;;  %v43_v53 = vld [vmem:[%s2967_s1 + $0x68] sm:$0xff]  ;;  %v94_v54 = vld [vmem:[%s2967_s1 + $0x200] sm:$0xff] }
  0x3f   :  { %579 = vmatmul.f32.vlgmr.msra.gmra.mxu2 %v1650_v55  ;;  %637 = vmatpush.msrb.mxu1 %v273_v57  ;;  %v423_v56 = vld [vmem:[%s2967_s1 + $0xc48] sm:$0xff]  ;;  %v462_v57 = vld [vmem:[%s2967_s1 + $0xd80] sm:$0xff] }
  0x40   :  { %657 = vmatpush.msrb.mxu2 %v321_v58  ;;  %676 = vmatpush.msrb.mxu3 %v372_v59  ;;  %v40_v58 = vld [vmem:[%s2967_s1 + $0x50] sm:$0xff]  ;;  %v91_v59 = vld [vmem:[%s2967_s1 + $0x1e8] sm:$0xff] }
  0x41   :  { %539 = vmatmul.f32.vlgmr.msra.gmra.mxu0 %v1667_v60  ;;  %599 = vmatmul.f32.vlgmr.msra.gmra.mxu3 %v1673_v61 }
  0x42   :  { %618 = vmatpush.msrb.mxu0 %v222_v62  ;;  %638 = vmatpush.msrb.mxu1 %v270_v63  ;;  %v172_v62 = vld [vmem:[%s2967_s1 + $0x470] sm:$0xff] }
  0x43   :  { %658 = vmatpush.msrb.mxu2 %v318_v0  ;;  %677 = vmatpush.msrb.mxu3 %v369_v1  ;;  %v420_v63 = vld [vmem:[%s2967_s1 + $0xc30] sm:$0xff]  ;;  %v37_v0 = vld [vmem:[%s2967_s1 + $0x38] sm:$0xff] }
  0x44   :  { %559 = vmatmul.f32.vlgmr.msra.gmra.mxu1 %v1691_v2  ;;  %683 = vmatpush.msra.mxu0 %v459_v3  ;;  %v88_v1 = vld [vmem:[%s2967_s1 + $0x1d0] sm:$0xff]  ;;  %v169_v3 = vld [vmem:[%s2967_s1 + $0x458] sm:$0xff] }
  0x45   :  { %1243 = vmatpush.msk.msra.mxu1 %vm513_vm0, %v498_v4  ;;  %723 = vmatpush.msra.mxu2 %v76_v5  ;;  %v417_v4 = vld [vmem:[%s2967_s1 + $0xc18] sm:$0xff]  ;;  %v34_v5 = vld [vmem:[%s2967_s1 + $0x20] sm:$0xff] }
  0x46   :  { %678 = vmatpush.msrb.mxu3 %v366_v6  ;;  %684 = vmatpush.msra.mxu0 %v456_v7  ;;  %v85_v6 = vld [vmem:[%s2967_s1 + $0x1b8] sm:$0xff]  ;;  %v166_v7 = vld [vmem:[%s2967_s1 + $0x440] sm:$0xff] }
  0x47   :  { %707 = vmatpush.msra.mxu1 %v495_v8  ;;  %724 = vmatpush.msra.mxu2 %v73_v9  ;;  %v414_v8 = vld [vmem:[%s2967_s1 + $0xc00] sm:$0xff]  ;;  %v31_v9 = vld [vmem:[%s2967_s1 + $0x8] sm:$0xff] }
  0x48   :  { %743 = vmatpush.msra.mxu3 %v124_v10  ;;  %659 = vmatmul.f32.vlgmr.msrb.gmra.mxu2 %v1723_v11  ;;  %v82_v10 = vld [vmem:[%s2967_s1 + $0x1a0] sm:$0xff] }
  0x49   :  { %685 = vmatpush.msra.mxu0 %v453_v12  ;;  %708 = vmatpush.msra.mxu1 %v492_v13  ;;  %v1915_v12 = vld [vmem:[%s2968_s0 + $0x40] sm:$0xff]  ;;  %v163_v13 = vld [vmem:[%s2967_s1 + $0x428] sm:$0xff] }
  0x4a   :  { %725 = vmatpush.msra.mxu2 %v70_v14  ;;  %744 = vmatpush.msra.mxu3 %v121_v15  ;;  %v220_v14 = vld [vmem:[%s2967_s1 + $0x5f0] sm:$0xff] }
  0x4b   :  { %619 = vmatmul.f32.vlgmr.msrb.gmra.mxu0 %v1740_v16  ;;  %679 = vmatmul.f32.vlgmr.msrb.gmra.mxu3 %v1746_v17  ;;  %v268_v15 = vld [vmem:[%s2967_s1 + $0x770] sm:$0xff] }
  0x4c   :  { %686 = vmatpush.msra.mxu0 %v450_v18  ;;  %709 = vmatpush.msra.mxu1 %v489_v19  ;;  %v79_v18 = vld [vmem:[%s2967_s1 + $0x188] sm:$0xff] }
  0x4d   :  { %726 = vmatpush.msra.mxu2 %v67_v20  ;;  %745 = vmatpush.msra.mxu3 %v118_v21  ;;  %v1932_v19 = vld [vmem:[%s2968_s0 + $0x48] sm:$0xff]  ;;  %v160_v20 = vld [vmem:[%s2967_s1 + $0x410] sm:$0xff]  ;;  %v217_v21 = vld [vmem:[%s2967_s1 + $0x5d8] sm:$0xff] }
  0x4e   :  { %639 = vmatmul.f32.vlgmr.msrb.gmra.mxu1 %v1764_v22  ;;  %687 = vmatpush.msra.mxu0 %v447_v23  ;;  %v265_v23 = vld [vmem:[%s2967_s1 + $0x758] sm:$0xff] }
  0x4f   :  { %710 = vmatpush.msra.mxu1 %v486_v24  ;;  %727 = vmatpush.msra.mxu2 %v64_v25  ;;  %v316_v24 = vld [vmem:[%s2967_s1 + $0x8f0] sm:$0xff]  ;;  %v157_v25 = vld [vmem:[%s2967_s1 + $0x3f8] sm:$0xff] }
  0x50   :  { %746 = vmatpush.msra.mxu3 %v115_v26  ;;  %688 = vmatpush.msra.mxu0 %v444_v27  ;;  %v214_v26 = vld [vmem:[%s2967_s1 + $0x5c0] sm:$0xff] }
  0x51   :  { %711 = vmatpush.msra.mxu1 %v483_v28  ;;  %728 = vmatpush.msra.mxu2 %v61_v29  ;;  %v262_v27 = vld [vmem:[%s2967_s1 + $0x740] sm:$0xff]  ;;  %v313_v28 = vld [vmem:[%s2967_s1 + $0x8d8] sm:$0xff] }
  0x52   :  { %747 = vmatpush.msra.mxu3 %v112_v30  ;;  %689 = vmatpush.msra.mxu0 %v441_v31  ;;  %v154_v29 = vld [vmem:[%s2967_s1 + $0x3e0] sm:$0xff]  ;;  %v211_v30 = vld [vmem:[%s2967_s1 + $0x5a8] sm:$0xff] }
  0x53   :  { %712 = vmatpush.msra.mxu1 %v480_v32  ;;  %729 = vmatpush.msra.mxu2 %v58_v33  ;;  %v259_v31 = vld [vmem:[%s2967_s1 + $0x728] sm:$0xff]  ;;  %v310_v32 = vld [vmem:[%s2967_s1 + $0x8c0] sm:$0xff] }
  0x54   :  { %748 = vmatpush.msra.mxu3 %v109_v34  ;;  %690 = vmatpush.msra.mxu0 %v438_v35  ;;  %v151_v33 = vld [vmem:[%s2967_s1 + $0x3c8] sm:$0xff]  ;;  %v208_v34 = vld [vmem:[%s2967_s1 + $0x590] sm:$0xff] }
  0x55   :  { %713 = vmatpush.msra.mxu1 %v477_v36  ;;  %730 = vmatpush.msra.mxu2 %v55_v37  ;;  %v256_v35 = vld [vmem:[%s2967_s1 + $0x710] sm:$0xff]  ;;  %v307_v36 = vld [vmem:[%s2967_s1 + $0x8a8] sm:$0xff] }
  0x56   :  { %749 = vmatpush.msra.mxu3 %v106_v38  ;;  %691 = vmatpush.msra.mxu0 %v435_v39  ;;  %v148_v37 = vld [vmem:[%s2967_s1 + $0x3b0] sm:$0xff]  ;;  %v205_v38 = vld [vmem:[%s2967_s1 + $0x578] sm:$0xff] }
  0x57   :  { %714 = vmatpush.msra.mxu1 %v474_v40  ;;  %731 = vmatpush.msra.mxu2 %v52_v41  ;;  %v253_v39 = vld [vmem:[%s2967_s1 + $0x6f8] sm:$0xff]  ;;  %v304_v40 = vld [vmem:[%s2967_s1 + $0x890] sm:$0xff] }
  0x58   :  { %750 = vmatpush.msra.mxu3 %v103_v42  ;;  %692 = vmatpush.msra.mxu0 %v432_v43  ;;  %v145_v41 = vld [vmem:[%s2967_s1 + $0x398] sm:$0xff]  ;;  %v202_v42 = vld [vmem:[%s2967_s1 + $0x560] sm:$0xff] }
  0x59   :  { %715 = vmatpush.msra.mxu1 %v471_v44  ;;  %732 = vmatpush.msra.mxu2 %v49_v45  ;;  %v250_v43 = vld [vmem:[%s2967_s1 + $0x6e0] sm:$0xff]  ;;  %v301_v44 = vld [vmem:[%s2967_s1 + $0x878] sm:$0xff] }
  0x5a   :  { %751 = vmatpush.msra.mxu3 %v100_v46  ;;  %693 = vmatpush.msra.mxu0 %v429_v47  ;;  %v142_v45 = vld [vmem:[%s2967_s1 + $0x380] sm:$0xff]  ;;  %v199_v46 = vld [vmem:[%s2967_s1 + $0x548] sm:$0xff] }
  0x5b   :  { %716 = vmatpush.msra.mxu1 %v468_v48  ;;  %733 = vmatpush.msra.mxu2 %v46_v49  ;;  %v247_v47 = vld [vmem:[%s2967_s1 + $0x6c8] sm:$0xff]  ;;  %v298_v48 = vld [vmem:[%s2967_s1 + $0x860] sm:$0xff] }
  0x5c   :  { %752 = vmatpush.msra.mxu3 %v97_v50  ;;  %694 = vmatpush.msra.mxu0 %v426_v51  ;;  %v139_v49 = vld [vmem:[%s2967_s1 + $0x368] sm:$0xff]  ;;  %v196_v50 = vld [vmem:[%s2967_s1 + $0x530] sm:$0xff] }
  0x5d   :  { %717 = vmatpush.msra.mxu1 %v465_v52  ;;  %734 = vmatpush.msra.mxu2 %v43_v53  ;;  %v244_v51 = vld [vmem:[%s2967_s1 + $0x6b0] sm:$0xff]  ;;  %v295_v52 = vld [vmem:[%s2967_s1 + $0x848] sm:$0xff] }
  0x5e   :  { %753 = vmatpush.msra.mxu3 %v94_v54  ;;  %695 = vmatpush.msra.mxu0 %v423_v56  ;;  %v136_v53 = vld [vmem:[%s2967_s1 + $0x350] sm:$0xff]  ;;  %v193_v54 = vld [vmem:[%s2967_s1 + $0x518] sm:$0xff] }
  0x5f   :  { %718 = vmatpush.msra.mxu1 %v462_v57  ;;  %735 = vmatpush.msra.mxu2 %v40_v58  ;;  %v241_v56 = vld [vmem:[%s2967_s1 + $0x698] sm:$0xff]  ;;  %v292_v57 = vld [vmem:[%s2967_s1 + $0x830] sm:$0xff] }
  0x60   :  { %754 = vmatpush.msra.mxu3 %v91_v59  ;;  %696 = vmatpush.msra.mxu0 %v420_v63  ;;  %v133_v58 = vld [vmem:[%s2967_s1 + $0x338] sm:$0xff]  ;;  %v190_v59 = vld [vmem:[%s2967_s1 + $0x500] sm:$0xff] }
  0x61   :  { %763 = vmatpush.msrb.mxu1 %v172_v62  ;;  %736 = vmatpush.msra.mxu2 %v37_v0  ;;  %v238_v62 = vld [vmem:[%s2967_s1 + $0x680] sm:$0xff]  ;;  %v289_v63 = vld [vmem:[%s2967_s1 + $0x818] sm:$0xff] }
  0x62   :  { %755 = vmatpush.msra.mxu3 %v88_v1  ;;  %697 = vmatpush.msra.mxu0 %v417_v4  ;;  %v130_v0 = vld [vmem:[%s2967_s1 + $0x320] sm:$0xff]  ;;  %v187_v1 = vld [vmem:[%s2967_s1 + $0x4e8] sm:$0xff] }
  0x63   :  { %764 = vmatpush.msrb.mxu1 %v169_v3  ;;  %737 = vmatpush.msra.mxu2 %v34_v5  ;;  %v235_v3 = vld [vmem:[%s2967_s1 + $0x668] sm:$0xff]  ;;  %v286_v4 = vld [vmem:[%s2967_s1 + $0x800] sm:$0xff] }
  0x64   :  { %756 = vmatpush.msra.mxu3 %v85_v6  ;;  %698 = vmatpush.msra.mxu0 %v414_v8  ;;  %v127_v5 = vld [vmem:[%s2967_s1 + $0x308] sm:$0xff]  ;;  %v184_v6 = vld [vmem:[%s2967_s1 + $0x4d0] sm:$0xff] }
  0x65   :  { %765 = vmatpush.msrb.mxu1 %v166_v7  ;;  %738 = vmatpush.msra.mxu2 %v31_v9  ;;  %v232_v7 = vld [vmem:[%s2967_s1 + $0x650] sm:$0xff]  ;;  %v283_v8 = vld [vmem:[%s2967_s1 + $0x7e8] sm:$0xff] }
  0x66   :  { %757 = vmatpush.msra.mxu3 %v82_v10  ;;  %699 = vmatmul.f32.vlgmr.msra.gmra.mxu0 %v1915_v12  ;;  %v364_v9 = vld [vmem:[%s2967_s1 + $0xa70] sm:$0xff]  ;;  %v181_v10 = vld [vmem:[%s2967_s1 + $0x4b8] sm:$0xff] }
  0x67   :  { %766 = vmatpush.msrb.mxu1 %v163_v13  ;;  %783 = vmatpush.msrb.mxu0 %v220_v14  ;;  %v229_v13 = vld [vmem:[%s2967_s1 + $0x638] sm:$0xff]  ;;  %v280_v14 = vld [vmem:[%s2967_s1 + $0x7d0] sm:$0xff] }
  0x68   :  { %803 = vmatpush.msrb.mxu2 %v268_v15  ;;  %758 = vmatpush.msra.mxu3 %v79_v18  ;;  %v361_v15 = vld [vmem:[%s2967_s1 + $0xa58] sm:$0xff]  ;;  %v178_v18 = vld [vmem:[%s2967_s1 + $0x4a0] sm:$0xff] }
  0x69   :  { %1244 = vmatmul.msk.f32.vlgmr.msra.gmra.mxu1 %vm509_vm1, %v1932_v19  ;;  %784 = vmatpush.msrb.mxu0 %v217_v21  ;;  %v277_v21 = vld [vmem:[%s2967_s1 + $0x7b8] sm:$0xff] }
  0x6a   :  { %767 = vmatpush.msrb.mxu1 %v160_v20  ;;  %804 = vmatpush.msrb.mxu2 %v265_v23  ;;  %v226_v20 = vld [vmem:[%s2967_s1 + $0x620] sm:$0xff] }
  0x6b   :  { %823 = vmatpush.msrb.mxu3 %v316_v24  ;;  %785 = vmatpush.msrb.mxu0 %v214_v26  ;;  %v358_v23 = vld [vmem:[%s2967_s1 + $0xa40] sm:$0xff]  ;;  %v175_v24 = vld [vmem:[%s2967_s1 + $0x488] sm:$0xff] }
  0x6c   :  { %768 = vmatpush.msrb.mxu1 %v157_v25  ;;  %805 = vmatpush.msrb.mxu2 %v262_v27  ;;  %v223_v25 = vld [vmem:[%s2967_s1 + $0x608] sm:$0xff]  ;;  %v274_v26 = vld [vmem:[%s2967_s1 + $0x7a0] sm:$0xff] }
  0x6d   :  { %824 = vmatpush.msrb.mxu3 %v313_v28  ;;  %786 = vmatpush.msrb.mxu0 %v211_v30  ;;  %v355_v27 = vld [vmem:[%s2967_s1 + $0xa28] sm:$0xff]  ;;  %v412_v28 = vld [vmem:[%s2967_s1 + $0xbf0] sm:$0xff] }
  0x6e   :  { %769 = vmatpush.msrb.mxu1 %v154_v29  ;;  %806 = vmatpush.msrb.mxu2 %v259_v31  ;;  %v460_v29 = vld [vmem:[%s2967_s1 + $0xd70] sm:$0xff]  ;;  %v271_v30 = vld [vmem:[%s2967_s1 + $0x788] sm:$0xff] }
  0x6f   :  { %825 = vmatpush.msrb.mxu3 %v310_v32  ;;  %787 = vmatpush.msrb.mxu0 %v208_v34  ;;  %v352_v31 = vld [vmem:[%s2967_s1 + $0xa10] sm:$0xff]  ;;  %v409_v32 = vld [vmem:[%s2967_s1 + $0xbd8] sm:$0xff]  ;;  %v499_v34 = vld [vmem:[%s2967_s1 + $0xea8] sm:$0x3] }
  0x70   :  { %770 = vmatpush.msrb.mxu1 %v151_v33  ;;  %807 = vmatpush.msrb.mxu2 %v256_v35  ;;  %v457_v33 = vld [vmem:[%s2967_s1 + $0xd58] sm:$0xff]  ;;  %v406_v35 = vld [vmem:[%s2967_s1 + $0xbc0] sm:$0xff] }
  0x71   :  { %826 = vmatpush.msrb.mxu3 %v307_v36  ;;  %788 = vmatpush.msrb.mxu0 %v205_v38  ;;  %v454_v36 = vld [vmem:[%s2967_s1 + $0xd40] sm:$0xff] }
  0x72   :  { %771 = vmatpush.msrb.mxu1 %v148_v37  ;;  %808 = vmatpush.msrb.mxu2 %v253_v39  ;;  %v496_v37 = vld [vmem:[%s2967_s1 + $0xe90] sm:$0xff]  ;;  %v346_v38 = vld [vmem:[%s2967_s1 + $0x9e0] sm:$0xff]  ;;  %v451_v39 = vld [vmem:[%s2967_s1 + $0xd28] sm:$0xff] }
  0x73   :  { %827 = vmatpush.msrb.mxu3 %v304_v40  ;;  %789 = vmatpush.msrb.mxu0 %v202_v42  ;;  %v493_v40 = vld [vmem:[%s2967_s1 + $0xe78] sm:$0xff]  ;;  %v400_v42 = vld [vmem:[%s2967_s1 + $0xb90] sm:$0xff] }
  0x74   :  { %772 = vmatpush.msrb.mxu1 %v145_v41  ;;  %809 = vmatpush.msrb.mxu2 %v250_v43  ;;  %v343_v41 = vld [vmem:[%s2967_s1 + $0x9c8] sm:$0xff]  ;;  %v448_v43 = vld [vmem:[%s2967_s1 + $0xd10] sm:$0xff] }
  0x75   :  { %828 = vmatpush.msrb.mxu3 %v301_v44  ;;  %790 = vmatpush.msrb.mxu0 %v199_v46  ;;  %v490_v44 = vld [vmem:[%s2967_s1 + $0xe60] sm:$0xff]  ;;  %v397_v46 = vld [vmem:[%s2967_s1 + $0xb78] sm:$0xff] }
  0x76   :  { %773 = vmatpush.msrb.mxu1 %v142_v45  ;;  %810 = vmatpush.msrb.mxu2 %v247_v47  ;;  %v340_v45 = vld [vmem:[%s2967_s1 + $0x9b0] sm:$0xff]  ;;  %v445_v47 = vld [vmem:[%s2967_s1 + $0xcf8] sm:$0xff] }
  0x77   :  { %829 = vmatpush.msrb.mxu3 %v298_v48  ;;  %791 = vmatpush.msrb.mxu0 %v196_v50  ;;  %v337_v48 = vld [vmem:[%s2967_s1 + $0x998] sm:$0xff]  ;;  %v484_v50 = vld [vmem:[%s2967_s1 + $0xe30] sm:$0xff] }
  0x78   :  { %774 = vmatpush.msrb.mxu1 %v139_v49  ;;  %811 = vmatpush.msrb.mxu2 %v244_v51  ;;  %v394_v49 = vld [vmem:[%s2967_s1 + $0xb60] sm:$0xff]  ;;  %v391_v51 = vld [vmem:[%s2967_s1 + $0xb48] sm:$0xff] }
  0x79   :  { %830 = vmatpush.msrb.mxu3 %v295_v52  ;;  %792 = vmatpush.msrb.mxu0 %v193_v54  ;;  %v439_v52 = vld [vmem:[%s2967_s1 + $0xcc8] sm:$0xff]  ;;  %v388_v54 = vld [vmem:[%s2967_s1 + $0xb30] sm:$0xff] }
  0x7a   :  { %775 = vmatpush.msrb.mxu1 %v136_v53  ;;  %812 = vmatpush.msrb.mxu2 %v241_v56  ;;  %v481_v53 = vld [vmem:[%s2967_s1 + $0xe18] sm:$0xff]  ;;  %v436_v56 = vld [vmem:[%s2967_s1 + $0xcb0] sm:$0xff] }
  0x7b   :  { %831 = vmatpush.msrb.mxu3 %v292_v57  ;;  %793 = vmatpush.msrb.mxu0 %v190_v59  ;;  %v478_v57 = vld [vmem:[%s2967_s1 + $0xe00] sm:$0xff]  ;;  %v385_v59 = vld [vmem:[%s2967_s1 + $0xb18] sm:$0xff] }
  0x7c   :  { %776 = vmatpush.msrb.mxu1 %v133_v58  ;;  %813 = vmatpush.msrb.mxu2 %v238_v62  ;;  %v328_v58 = vld [vmem:[%s2967_s1 + $0x950] sm:$0xff]  ;;  %v433_v62 = vld [vmem:[%s2967_s1 + $0xc98] sm:$0xff] }
  0x7d   :  { %832 = vmatpush.msrb.mxu3 %v289_v63  ;;  %794 = vmatpush.msrb.mxu0 %v187_v1  ;;  %v475_v63 = vld [vmem:[%s2967_s1 + $0xde8] sm:$0xff]  ;;  %v382_v1 = vld [vmem:[%s2967_s1 + $0xb00] sm:$0xff] }
  0x7e   :  { %777 = vmatpush.msrb.mxu1 %v130_v0  ;;  %814 = vmatpush.msrb.mxu2 %v235_v3  ;;  %v325_v0 = vld [vmem:[%s2967_s1 + $0x938] sm:$0xff]  ;;  %v430_v3 = vld [vmem:[%s2967_s1 + $0xc80] sm:$0xff] }
  0x7f   :  { %833 = vmatpush.msrb.mxu3 %v286_v4  ;;  %795 = vmatpush.msrb.mxu0 %v184_v6  ;;  %v472_v4 = vld [vmem:[%s2967_s1 + $0xdd0] sm:$0xff]  ;;  %v379_v6 = vld [vmem:[%s2967_s1 + $0xae8] sm:$0xff] }
  0x80   :  { %778 = vmatpush.msrb.mxu1 %v127_v5  ;;  %815 = vmatpush.msrb.mxu2 %v232_v7  ;;  %v322_v5 = vld [vmem:[%s2967_s1 + $0x920] sm:$0xff]  ;;  %v427_v7 = vld [vmem:[%s2967_s1 + $0xc68] sm:$0xff] }
  0x81   :  { %834 = vmatpush.msrb.mxu3 %v283_v8  ;;  %796 = vmatpush.msrb.mxu0 %v181_v10  ;;  %v469_v8 = vld [vmem:[%s2967_s1 + $0xdb8] sm:$0xff]  ;;  %v376_v10 = vld [vmem:[%s2967_s1 + $0xad0] sm:$0xff] }
  0x82   :  { %843 = vmatpush.msra.mxu1 %v364_v9  ;;  %816 = vmatpush.msrb.mxu2 %v229_v13  ;;  %v319_v9 = vld [vmem:[%s2967_s1 + $0x908] sm:$0xff]  ;;  %v424_v13 = vld [vmem:[%s2967_s1 + $0xc50] sm:$0xff] }
  0x83   :  { %835 = vmatpush.msrb.mxu3 %v280_v14  ;;  %797 = vmatpush.msrb.mxu0 %v178_v18  ;;  %v466_v14 = vld [vmem:[%s2967_s1 + $0xda0] sm:$0xff]  ;;  %v77_v18 = vld [vmem:[%s2967_s1 + $0x178] sm:$0xff] }
  0x84   :  { %844 = vmatpush.msra.mxu1 %v361_v15  ;;  %817 = vmatpush.msrb.mxu2 %v226_v20  ;;  %v373_v15 = vld [vmem:[%s2967_s1 + $0xab8] sm:$0xff] }
  0x85   :  { %836 = vmatpush.msrb.mxu3 %v277_v21  ;;  %798 = vmatpush.msrb.mxu0 %v175_v24  ;;  %v421_v20 = vld [vmem:[%s2967_s1 + $0xc38] sm:$0xff]  ;;  %v463_v21 = vld [vmem:[%s2967_s1 + $0xd88] sm:$0xff]  ;;  %v74_v24 = vld [vmem:[%s2967_s1 + $0x160] sm:$0xff] }
  0x86   :  { %845 = vmatpush.msra.mxu1 %v358_v23  ;;  %818 = vmatpush.msrb.mxu2 %v223_v25  ;;  %v370_v23 = vld [vmem:[%s2967_s1 + $0xaa0] sm:$0xff]  ;;  %v125_v25 = vld [vmem:[%s2967_s1 + $0x2f8] sm:$0xff] }
  0x87   :  { %837 = vmatpush.msrb.mxu3 %v274_v26  ;;  %739 = vmatmul.f32.vlgmr.msra.gmra.mxu2 %v1667_v60  ;;  %v349_v60 = vld [vmem:[%s2967_s1 + $0x9f8] sm:$0xff]  ;;  %v418_v26 = vld [vmem:[%s2967_s1 + $0xc20] sm:$0xff] }
  0x88   :  { %846 = vmatpush.msra.mxu1 %v355_v27  ;;  %863 = vmatpush.msra.mxu0 %v412_v28  ;;  %v367_v27 = vld [vmem:[%s2967_s1 + $0xa88] sm:$0xff]  ;;  %v122_v28 = vld [vmem:[%s2967_s1 + $0x2e0] sm:$0xff] }
  0x89   :  { %883 = vmatpush.msra.mxu2 %v460_v29  ;;  %838 = vmatpush.msrb.mxu3 %v271_v30  ;;  %v415_v29 = vld [vmem:[%s2967_s1 + $0xc08] sm:$0xff]  ;;  %v68_v30 = vld [vmem:[%s2967_s1 + $0x130] sm:$0xff] }
  0x8a   :  { %847 = vmatpush.msra.mxu1 %v352_v31  ;;  %759 = vmatmul.f32.vlgmr.msra.gmra.mxu3 %v1691_v2  ;;  %v403_v2 = vld [vmem:[%s2967_s1 + $0xba8] sm:$0xff] }
  0x8b   :  { %864 = vmatpush.msra.mxu0 %v409_v32  ;;  %884 = vmatpush.msra.mxu2 %v457_v33  ;;  %v119_v31 = vld [vmem:[%s2967_s1 + $0x2c8] sm:$0xff]  ;;  %v173_v32 = vld [vmem:[%s2967_s1 + $0x478] sm:$0xff] }
  0x8c   :  { %1245 = vmatpush.msk.msra.mxu3 %vm513_vm0, %v499_v34  ;;  %848 = vmatpush.msra.mxu1 %v349_v60  ;;  %v65_v33 = vld [vmem:[%s2967_s1 + $0x118] sm:$0xff]  ;;  %v116_v34 = vld [vmem:[%s2967_s1 + $0x2b0] sm:$0xff]  ;;  %v170_v60 = vld [vmem:[%s2967_s1 + $0x460] sm:$0xff] }
  0x8d   :  { %865 = vmatpush.msra.mxu0 %v406_v35  ;;  %885 = vmatpush.msra.mxu2 %v454_v36  ;;  %v62_v35 = vld [vmem:[%s2967_s1 + $0x100] sm:$0xff]  ;;  %v167_v36 = vld [vmem:[%s2967_s1 + $0x448] sm:$0xff] }
  0x8e   :  { %907 = vmatpush.msra.mxu3 %v496_v37  ;;  %849 = vmatpush.msra.mxu1 %v346_v38  ;;  %v218_v37 = vld [vmem:[%s2967_s1 + $0x5e0] sm:$0xff]  ;;  %v59_v38 = vld [vmem:[%s2967_s1 + $0xe8] sm:$0xff] }
  0x8f   :  { %866 = vmatpush.msra.mxu0 %v403_v2  ;;  %886 = vmatpush.msra.mxu2 %v451_v39  ;;  %v164_v2 = vld [vmem:[%s2967_s1 + $0x430] sm:$0xff]  ;;  %v215_v39 = vld [vmem:[%s2967_s1 + $0x5c8] sm:$0xff] }
  0x90   :  { %908 = vmatpush.msra.mxu3 %v493_v40  ;;  %819 = vmatmul.f32.vlgmr.msrb.gmra.mxu2 %v1740_v16  ;;  %v487_v16 = vld [vmem:[%s2967_s1 + $0xe48] sm:$0xff]  ;;  %v56_v40 = vld [vmem:[%s2967_s1 + $0xd0] sm:$0xff] }
  0x91   :  { %850 = vmatpush.msra.mxu1 %v343_v41  ;;  %867 = vmatpush.msra.mxu0 %v400_v42  ;;  %v107_v41 = vld [vmem:[%s2967_s1 + $0x268] sm:$0xff]  ;;  %v161_v42 = vld [vmem:[%s2967_s1 + $0x418] sm:$0xff] }
  0x92   :  { %887 = vmatpush.msra.mxu2 %v448_v43  ;;  %909 = vmatpush.msra.mxu3 %v490_v44  ;;  %v212_v43 = vld [vmem:[%s2967_s1 + $0x5b0] sm:$0xff]  ;;  %v53_v44 = vld [vmem:[%s2967_s1 + $0xb8] sm:$0xff] }
  0x93   :  { %779 = vmatmul.f32.vlgmr.msrb.gmra.mxu1 %v1650_v55  ;;  %839 = vmatmul.f32.vlgmr.msrb.gmra.mxu3 %v1764_v22  ;;  %v442_v55 = vld [vmem:[%s2967_s1 + $0xce0] sm:$0xff] }
  0x94   :  { %851 = vmatpush.msra.mxu1 %v340_v45  ;;  %868 = vmatpush.msra.mxu0 %v397_v46  ;;  %v334_v22 = vld [vmem:[%s2967_s1 + $0x980] sm:$0xff]  ;;  %v104_v45 = vld [vmem:[%s2967_s1 + $0x250] sm:$0xff] }
  0x95   :  { %888 = vmatpush.msra.mxu2 %v445_v47  ;;  %910 = vmatpush.msra.mxu3 %v487_v16  ;;  %v158_v46 = vld [vmem:[%s2967_s1 + $0x400] sm:$0xff]  ;;  %v209_v47 = vld [vmem:[%s2967_s1 + $0x598] sm:$0xff] }
  0x96   :  { %799 = vmatmul.f32.vlgmr.msrb.gmra.mxu0 %v1673_v61  ;;  %852 = vmatpush.msra.mxu1 %v337_v48  ;;  %v331_v61 = vld [vmem:[%s2967_s1 + $0x968] sm:$0xff]  ;;  %v50_v16 = vld [vmem:[%s2967_s1 + $0xa0] sm:$0xff]  ;;  %v101_v48 = vld [vmem:[%s2967_s1 + $0x238] sm:$0xff] }
  0x97   :  { %869 = vmatpush.msra.mxu0 %v394_v49  ;;  %889 = vmatpush.msra.mxu2 %v442_v55  ;;  %v155_v49 = vld [vmem:[%s2967_s1 + $0x3e8] sm:$0xff]  ;;  %v206_v55 = vld [vmem:[%s2967_s1 + $0x580] sm:$0xff] }
  0x98   :  { %911 = vmatpush.msra.mxu3 %v484_v50  ;;  %853 = vmatpush.msra.mxu1 %v334_v22  ;;  %v47_v50 = vld [vmem:[%s2967_s1 + $0x88] sm:$0xff]  ;;  %v98_v22 = vld [vmem:[%s2967_s1 + $0x220] sm:$0xff] }
  0x99   :  { %870 = vmatpush.msra.mxu0 %v391_v51  ;;  %890 = vmatpush.msra.mxu2 %v439_v52  ;;  %v152_v51 = vld [vmem:[%s2967_s1 + $0x3d0] sm:$0xff]  ;;  %v203_v52 = vld [vmem:[%s2967_s1 + $0x568] sm:$0xff] }
  0x9a   :  { %912 = vmatpush.msra.mxu3 %v481_v53  ;;  %854 = vmatpush.msra.mxu1 %v331_v61  ;;  %v44_v53 = vld [vmem:[%s2967_s1 + $0x70] sm:$0xff]  ;;  %v95_v61 = vld [vmem:[%s2967_s1 + $0x208] sm:$0xff] }
  0x9b   :  { %871 = vmatpush.msra.mxu0 %v388_v54  ;;  %891 = vmatpush.msra.mxu2 %v436_v56  ;;  %v149_v54 = vld [vmem:[%s2967_s1 + $0x3b8] sm:$0xff]  ;;  %v200_v56 = vld [vmem:[%s2967_s1 + $0x550] sm:$0xff] }
  0x9c   :  { %913 = vmatpush.msra.mxu3 %v478_v57  ;;  %855 = vmatpush.msra.mxu1 %v328_v58  ;;  %v41_v57 = vld [vmem:[%s2967_s1 + $0x58] sm:$0xff]  ;;  %v92_v58 = vld [vmem:[%s2967_s1 + $0x1f0] sm:$0xff] }
  0x9d   :  { %872 = vmatpush.msra.mxu0 %v385_v59  ;;  %892 = vmatpush.msra.mxu2 %v433_v62  ;;  %v146_v59 = vld [vmem:[%s2967_s1 + $0x3a0] sm:$0xff]  ;;  %v197_v62 = vld [vmem:[%s2967_s1 + $0x538] sm:$0xff] }
  0x9e   :  { %914 = vmatpush.msra.mxu3 %v475_v63  ;;  %856 = vmatpush.msra.mxu1 %v325_v0  ;;  %v38_v63 = vld [vmem:[%s2967_s1 + $0x40] sm:$0xff]  ;;  %v89_v0 = vld [vmem:[%s2967_s1 + $0x1d8] sm:$0xff] }
  0x9f   :  { %873 = vmatpush.msra.mxu0 %v382_v1  ;;  %893 = vmatpush.msra.mxu2 %v430_v3  ;;  %v143_v1 = vld [vmem:[%s2967_s1 + $0x388] sm:$0xff]  ;;  %v194_v3 = vld [vmem:[%s2967_s1 + $0x520] sm:$0xff] }
  0xa0   :  { %915 = vmatpush.msra.mxu3 %v472_v4  ;;  %857 = vmatpush.msra.mxu1 %v322_v5  ;;  %v35_v4 = vld [vmem:[%s2967_s1 + $0x28] sm:$0xff]  ;;  %v86_v5 = vld [vmem:[%s2967_s1 + $0x1c0] sm:$0xff] }
  0xa1   :  { %874 = vmatpush.msra.mxu0 %v379_v6  ;;  %894 = vmatpush.msra.mxu2 %v427_v7  ;;  %v140_v6 = vld [vmem:[%s2967_s1 + $0x370] sm:$0xff]  ;;  %v191_v7 = vld [vmem:[%s2967_s1 + $0x508] sm:$0xff] }
  0xa2   :  { %916 = vmatpush.msra.mxu3 %v469_v8  ;;  %858 = vmatpush.msra.mxu1 %v319_v9  ;;  %v32_v8 = vld [vmem:[%s2967_s1 + $0x10] sm:$0xff]  ;;  %v83_v9 = vld [vmem:[%s2967_s1 + $0x1a8] sm:$0xff] }
  0xa3   :  { %875 = vmatpush.msra.mxu0 %v376_v10  ;;  %895 = vmatpush.msra.mxu2 %v424_v13  ;;  %v137_v10 = vld [vmem:[%s2967_s1 + $0x358] sm:$0xff]  ;;  %v188_v13 = vld [vmem:[%s2967_s1 + $0x4f0] sm:$0xff] }
  0xa4   :  { %917 = vmatpush.msra.mxu3 %v466_v14  ;;  %859 = vmatmul.f32.vlgmr.msra.gmra.mxu1 %v1723_v11  ;;  %v71_v11 = vld [vmem:[%s2967_s1 + $0x148] sm:$0xff]  ;;  %v269_v14 = vld [vmem:[%s2967_s1 + $0x778] sm:$0xff] }
  0xa5   :  { %876 = vmatpush.msra.mxu0 %v373_v15  ;;  %923 = vmatpush.msrb.mxu1 %v77_v18  ;;  %v80_v15 = vld [vmem:[%s2967_s1 + $0x190] sm:$0xff]  ;;  %v134_v18 = vld [vmem:[%s2967_s1 + $0x340] sm:$0xff] }
  0xa6   :  { %896 = vmatpush.msra.mxu2 %v421_v20  ;;  %918 = vmatpush.msra.mxu3 %v463_v21  ;;  %v185_v20 = vld [vmem:[%s2967_s1 + $0x4d8] sm:$0xff]  ;;  %v266_v21 = vld [vmem:[%s2967_s1 + $0x760] sm:$0xff] }
  0xa7   :  { %877 = vmatpush.msra.mxu0 %v370_v23  ;;  %924 = vmatpush.msrb.mxu1 %v74_v24  ;;  %v317_v23 = vld [vmem:[%s2967_s1 + $0x8f8] sm:$0xff]  ;;  %v131_v24 = vld [vmem:[%s2967_s1 + $0x328] sm:$0xff] }
  0xa8   :  { %943 = vmatpush.msrb.mxu3 %v125_v25  ;;  %897 = vmatpush.msra.mxu2 %v418_v26  ;;  %v182_v25 = vld [vmem:[%s2967_s1 + $0x4c0] sm:$0xff]  ;;  %v263_v26 = vld [vmem:[%s2967_s1 + $0x748] sm:$0xff] }
  0xa9   :  { %878 = vmatpush.msra.mxu0 %v367_v27  ;;  %925 = vmatpush.msrb.mxu1 %v71_v11  ;;  %v314_v27 = vld [vmem:[%s2967_s1 + $0x8e0] sm:$0xff]  ;;  %v128_v11 = vld [vmem:[%s2967_s1 + $0x310] sm:$0xff] }
  0xaa   :  { %944 = vmatpush.msrb.mxu3 %v122_v28  ;;  %898 = vmatpush.msra.mxu2 %v415_v29  ;;  %v179_v28 = vld [vmem:[%s2967_s1 + $0x4a8] sm:$0xff]  ;;  %v260_v29 = vld [vmem:[%s2967_s1 + $0x730] sm:$0xff] }
  0xab   :  { %879 = vmatmul.f32.vlgmr.msra.gmra.mxu0 %v1746_v17  ;;  %899 = vmatmul.f32.vlgmr.msra.gmra.mxu2 %v1915_v12  ;;  %v221_v17 = vld [vmem:[%s2967_s1 + $0x5f8] sm:$0xff] }
  0xac   :  { %926 = vmatpush.msrb.mxu1 %v68_v30  ;;  %945 = vmatpush.msrb.mxu3 %v119_v31  ;;  %v113_v12 = vld [vmem:[%s2967_s1 + $0x298] sm:$0xff]  ;;  %v311_v30 = vld [vmem:[%s2967_s1 + $0x8c8] sm:$0xff] }
  0xad   :  { %963 = vmatpush.msrb.mxu0 %v173_v32  ;;  %1246 = vmatmul.msk.f32.vlgmr.msra.gmra.mxu3 %vm509_vm1, %v1932_v19  ;;  %v110_v19 = vld [vmem:[%s2967_s1 + $0x280] sm:$0xff]  ;;  %v365_v31 = vld [vmem:[%s2967_s1 + $0xa78] sm:$0xff]  ;;  %v176_v32 = vld [vmem:[%s2967_s1 + $0x490] sm:$0xff] }
  0xae   :  { %927 = vmatpush.msrb.mxu1 %v65_v33  ;;  %946 = vmatpush.msrb.mxu3 %v116_v34  ;;  %v257_v33 = vld [vmem:[%s2967_s1 + $0x718] sm:$0xff]  ;;  %v308_v34 = vld [vmem:[%s2967_s1 + $0x8b0] sm:$0xff] }
  0xaf   :  { %964 = vmatpush.msrb.mxu0 %v170_v60  ;;  %983 = vmatpush.msrb.mxu2 %v221_v17  ;;  %v362_v60 = vld [vmem:[%s2967_s1 + $0xa60] sm:$0xff]  ;;  %v413_v17 = vld [vmem:[%s2967_s1 + $0xbf8] sm:$0xff] }
  0xb0   :  { %928 = vmatpush.msrb.mxu1 %v62_v35  ;;  %947 = vmatpush.msrb.mxu3 %v113_v12  ;;  %v254_v35 = vld [vmem:[%s2967_s1 + $0x700] sm:$0xff]  ;;  %v305_v12 = vld [vmem:[%s2967_s1 + $0x898] sm:$0xff] }
  0xb1   :  { %965 = vmatpush.msrb.mxu0 %v167_v36  ;;  %984 = vmatpush.msrb.mxu2 %v218_v37  ;;  %v359_v36 = vld [vmem:[%s2967_s1 + $0xa48] sm:$0xff]  ;;  %v410_v37 = vld [vmem:[%s2967_s1 + $0xbe0] sm:$0xff] }
  0xb2   :  { %929 = vmatpush.msrb.mxu1 %v59_v38  ;;  %948 = vmatpush.msrb.mxu3 %v110_v19  ;;  %v251_v38 = vld [vmem:[%s2967_s1 + $0x6e8] sm:$0xff]  ;;  %v302_v19 = vld [vmem:[%s2967_s1 + $0x880] sm:$0xff] }
  0xb3   :  { %966 = vmatpush.msrb.mxu0 %v164_v2  ;;  %985 = vmatpush.msrb.mxu2 %v215_v39  ;;  %v356_v2 = vld [vmem:[%s2967_s1 + $0xa30] sm:$0xff]  ;;  %v407_v39 = vld [vmem:[%s2967_s1 + $0xbc8] sm:$0xff] }
  0xb4   :  { %930 = vmatpush.msrb.mxu1 %v56_v40  ;;  %949 = vmatpush.msrb.mxu3 %v107_v41  ;;  %v248_v40 = vld [vmem:[%s2967_s1 + $0x6d0] sm:$0xff]  ;;  %v299_v41 = vld [vmem:[%s2967_s1 + $0x868] sm:$0xff] }
  0xb5   :  { %967 = vmatpush.msrb.mxu0 %v161_v42  ;;  %986 = vmatpush.msrb.mxu2 %v212_v43  ;;  %v353_v42 = vld [vmem:[%s2967_s1 + $0xa18] sm:$0xff]  ;;  %v404_v43 = vld [vmem:[%s2967_s1 + $0xbb0] sm:$0xff] }
  0xb6   :  { %931 = vmatpush.msrb.mxu1 %v53_v44  ;;  %950 = vmatpush.msrb.mxu3 %v104_v45  ;;  %v245_v44 = vld [vmem:[%s2967_s1 + $0x6b8] sm:$0xff]  ;;  %v296_v45 = vld [vmem:[%s2967_s1 + $0x850] sm:$0xff] }
  0xb7   :  { %968 = vmatpush.msrb.mxu0 %v158_v46  ;;  %987 = vmatpush.msrb.mxu2 %v209_v47  ;;  %v350_v46 = vld [vmem:[%s2967_s1 + $0xa00] sm:$0xff]  ;;  %v401_v47 = vld [vmem:[%s2967_s1 + $0xb98] sm:$0xff] }
  0xb8   :  { %932 = vmatpush.msrb.mxu1 %v50_v16  ;;  %951 = vmatpush.msrb.mxu3 %v101_v48  ;;  %v242_v16 = vld [vmem:[%s2967_s1 + $0x6a0] sm:$0xff]  ;;  %v293_v48 = vld [vmem:[%s2967_s1 + $0x838] sm:$0xff] }
  0xb9   :  { %969 = vmatpush.msrb.mxu0 %v155_v49  ;;  %988 = vmatpush.msrb.mxu2 %v206_v55  ;;  %v347_v49 = vld [vmem:[%s2967_s1 + $0x9e8] sm:$0xff]  ;;  %v398_v55 = vld [vmem:[%s2967_s1 + $0xb80] sm:$0xff] }
  0xba   :  { %933 = vmatpush.msrb.mxu1 %v47_v50  ;;  %952 = vmatpush.msrb.mxu3 %v98_v22  ;;  %v239_v50 = vld [vmem:[%s2967_s1 + $0x688] sm:$0xff]  ;;  %v290_v22 = vld [vmem:[%s2967_s1 + $0x820] sm:$0xff] }
  0xbb   :  { %970 = vmatpush.msrb.mxu0 %v152_v51  ;;  %989 = vmatpush.msrb.mxu2 %v203_v52  ;;  %v344_v51 = vld [vmem:[%s2967_s1 + $0x9d0] sm:$0xff]  ;;  %v395_v52 = vld [vmem:[%s2967_s1 + $0xb68] sm:$0xff] }
  0xbc   :  { %934 = vmatpush.msrb.mxu1 %v44_v53  ;;  %953 = vmatpush.msrb.mxu3 %v95_v61  ;;  %v236_v53 = vld [vmem:[%s2967_s1 + $0x670] sm:$0xff]  ;;  %v287_v61 = vld [vmem:[%s2967_s1 + $0x808] sm:$0xff] }
  0xbd   :  { %971 = vmatpush.msrb.mxu0 %v149_v54  ;;  %990 = vmatpush.msrb.mxu2 %v200_v56  ;;  %v341_v54 = vld [vmem:[%s2967_s1 + $0x9b8] sm:$0xff]  ;;  %v392_v56 = vld [vmem:[%s2967_s1 + $0xb50] sm:$0xff] }
  0xbe   :  { %935 = vmatpush.msrb.mxu1 %v41_v57  ;;  %954 = vmatpush.msrb.mxu3 %v92_v58  ;;  %v233_v57 = vld [vmem:[%s2967_s1 + $0x658] sm:$0xff]  ;;  %v284_v58 = vld [vmem:[%s2967_s1 + $0x7f0] sm:$0xff] }
  0xbf   :  { %972 = vmatpush.msrb.mxu0 %v146_v59  ;;  %991 = vmatpush.msrb.mxu2 %v197_v62  ;;  %v338_v59 = vld [vmem:[%s2967_s1 + $0x9a0] sm:$0xff]  ;;  %v389_v62 = vld [vmem:[%s2967_s1 + $0xb38] sm:$0xff] }
  0xc0   :  { %936 = vmatpush.msrb.mxu1 %v38_v63  ;;  %955 = vmatpush.msrb.mxu3 %v89_v0  ;;  %v230_v63 = vld [vmem:[%s2967_s1 + $0x640] sm:$0xff]  ;;  %v281_v0 = vld [vmem:[%s2967_s1 + $0x7d8] sm:$0xff] }
  0xc1   :  { %973 = vmatpush.msrb.mxu0 %v143_v1  ;;  %992 = vmatpush.msrb.mxu2 %v194_v3  ;;  %v335_v1 = vld [vmem:[%s2967_s1 + $0x988] sm:$0xff]  ;;  %v386_v3 = vld [vmem:[%s2967_s1 + $0xb20] sm:$0xff] }
  0xc2   :  { %937 = vmatpush.msrb.mxu1 %v35_v4  ;;  %956 = vmatpush.msrb.mxu3 %v86_v5  ;;  %v227_v4 = vld [vmem:[%s2967_s1 + $0x628] sm:$0xff]  ;;  %v278_v5 = vld [vmem:[%s2967_s1 + $0x7c0] sm:$0xff] }
  0xc3   :  { %974 = vmatpush.msrb.mxu0 %v140_v6  ;;  %993 = vmatpush.msrb.mxu2 %v191_v7  ;;  %v2651_v6 = vld [vmem:[%s2969_s2] sm:$0x7]  ;;  %v332_v7 = vld [vmem:[%s2967_s1 + $0x970] sm:$0xff] }
  0xc4   :  { %938 = vmatpush.msrb.mxu1 %v32_v8  ;;  %957 = vmatpush.msrb.mxu3 %v83_v9  ;;  %v383_v8 = vld [vmem:[%s2967_s1 + $0xb08] sm:$0xff] }
  0xc5   :  { %975 = vmatpush.msrb.mxu0 %v137_v10  ;;  %994 = vmatpush.msrb.mxu2 %v188_v13  ;;  %v1250_v9 = vld [vmem:[%s2968_s0 + $0x8] sm:$0xff]  ;;  %v224_v10 = vld [vmem:[%s2967_s1 + $0x610] sm:$0xff] }
  0xc6   :  { %1003 = vmatpush.msra.mxu1 %v269_v14  ;;  %958 = vmatpush.msrb.mxu3 %v80_v15  ;;  %v275_v13 = vld [vmem:[%s2967_s1 + $0x7a8] sm:$0xff]  ;;  %v329_v14 = vld [vmem:[%s2967_s1 + $0x958] sm:$0xff]  ;;  %v380_v15 = vld [vmem:[%s2967_s1 + $0xaf0] sm:$0xff] }
  0xc7   :  { %976 = vmatpush.msrb.mxu0 %v134_v18  ;;  %995 = vmatpush.msrb.mxu2 %v185_v20  ;;  %v503_v18 = vperm.slane %v2651_v6, 0  ;;  %v540_v20 = vpop.f32.mrf.mxu0 }
  0xc8   :  { %1004 = vmatpush.msra.mxu1 %v266_v21  ;;  %1023 = vmatpush.msra.mxu3 %v317_v23  ;;  %v461_v21 = vld [vmem:[%s2967_s1 + $0xd78] sm:$0xff]  ;;  %v272_v23 = vld [vmem:[%s2967_s1 + $0x790] sm:$0xff] }
  0xc9   :  { %977 = vmatpush.msrb.mxu0 %v131_v24  ;;  %996 = vmatpush.msrb.mxu2 %v182_v25  ;;  %v326_v24 = vld [vmem:[%s2967_s1 + $0x940] sm:$0xff]  ;;  %v377_v25 = vld [vmem:[%s2967_s1 + $0xad8] sm:$0xff] }
  0xca   :  { %1005 = vmatpush.msra.mxu1 %v263_v26  ;;  %1024 = vmatpush.msra.mxu3 %v314_v27  ;;  %v1251_v26 = vld [vmem:[%s2968_s0] sm:$0xff]  ;;  %v1252_v27 = vld [vmem:[%s2968_s0 + $0x18] sm:$0xff] }
  0xcb   :  { %978 = vmatpush.msrb.mxu0 %v128_v11  ;;  %997 = vmatpush.msrb.mxu2 %v179_v28  ;;  %v458_v11 = vld [vmem:[%s2967_s1 + $0xd60] sm:$0xff]  ;;  %v500_v28 = vld [vmem:[%s2967_s1 + $0xeb0] sm:$0x3] }
  0xcc   :  { %1006 = vmatpush.msra.mxu1 %v260_v29  ;;  %1025 = vmatpush.msra.mxu3 %v311_v30  ;;  %v541_v29 = vadd.f32 %v540_v20, %v503_v18  ;;  %v323_v30 = vld [vmem:[%s2967_s1 + $0x928] sm:$0xff]  ;;  %v428_v18 = vld [vmem:[%s2967_s1 + $0xc70] sm:$0xff] }
  0xcd   :  { %1043 = vmatpush.msra.mxu0 %v365_v31  ;;  %998 = vmatpush.msrb.mxu2 %v176_v32  ;;  %v374_v31 = vld [vmem:[%s2967_s1 + $0xac0] sm:$0xff]  ;;  %v560_v32 = vpop.f32.mrf.mxu1  ;;  %v1152_v20 = vld [vmem:[%s2970_s3 + $0xd0] sm:$0xff] }
  0xce   :  { %1007 = vmatpush.msra.mxu1 %v257_v33  ;;  %1026 = vmatpush.msra.mxu3 %v308_v34  ;;  %v455_v33 = vld [vmem:[%s2967_s1 + $0xd48] sm:$0xff]  ;;  %v497_v34 = vld [vmem:[%s2967_s1 + $0xe98] sm:$0xff] }
  0xcf   :  { %1044 = vmatpush.msra.mxu0 %v362_v60  ;;  %1063 = vmatpush.msra.mxu2 %v413_v17  ;;  %v320_v60 = vld [vmem:[%s2967_s1 + $0x910] sm:$0xff]  ;;  %v371_v17 = vld [vmem:[%s2967_s1 + $0xaa8] sm:$0xff] }
  0xd0   :  { %1008 = vmatpush.msra.mxu1 %v254_v35  ;;  %1027 = vmatpush.msra.mxu3 %v305_v12  ;;  %v561_v35 = vadd.f32 %v560_v32, %v541_v29  ;;  %v1253_v12 = vld [vmem:[%s2968_s0 + $0x10] sm:$0xff]  ;;  %v419_v32 = vld [vmem:[%s2967_s1 + $0xc28] sm:$0xff] }
  0xd1   :  { %1045 = vmatpush.msra.mxu0 %v359_v36  ;;  %1064 = vmatpush.msra.mxu2 %v410_v37  ;;  %v1254_v36 = vld [vmem:[%s2968_s0 + $0x28] sm:$0xff]  ;;  %v452_v37 = vld [vmem:[%s2967_s1 + $0xd30] sm:$0xff] }
  0xd2   :  { %1009 = vmatpush.msra.mxu1 %v251_v38  ;;  %1028 = vmatpush.msra.mxu3 %v302_v19  ;;  %v494_v38 = vld [vmem:[%s2967_s1 + $0xe80] sm:$0xff]  ;;  %v580_v19 = vpop.f32.mrf.mxu2  ;;  %v464_v29 = vld [vmem:[%s2967_s1 + $0xd90] sm:$0xff] }
  0xd3   :  { %1046 = vmatpush.msra.mxu0 %v356_v2  ;;  %1065 = vmatpush.msra.mxu2 %v407_v39  ;;  %v1141_v2 = vld [vmem:[%s2970_s3 + $0x78] sm:$0xff]  ;;  %v368_v39 = vld [vmem:[%s2967_s1 + $0xa90] sm:$0xff] }
  0xd4   :  { %1010 = vmatpush.msra.mxu1 %v248_v40  ;;  %1029 = vmatpush.msra.mxu3 %v299_v41  ;;  %v449_v40 = vld [vmem:[%s2967_s1 + $0xd18] sm:$0xff]  ;;  %v491_v41 = vld [vmem:[%s2967_s1 + $0xe68] sm:$0xff] }
  0xd5   :  { %1047 = vmatpush.msra.mxu0 %v353_v42  ;;  %1066 = vmatpush.msra.mxu2 %v404_v43  ;;  %v581_v42 = vadd.f32 %v580_v19, %v561_v35  ;;  %v1140_v43 = vld [vmem:[%s2970_s3 + $0x70] sm:$0xff]  ;;  %v1149_v19 = vld [vmem:[%s2970_s3 + $0xb8] sm:$0xff] }
  0xd6   :  { %1011 = vmatpush.msra.mxu1 %v245_v44  ;;  %1030 = vmatpush.msra.mxu3 %v296_v45  ;;  %v600_v44 = vpop.f32.mrf.mxu3  ;;  %v1255_v45 = vld [vmem:[%s2968_s0 + $0x20] sm:$0xff]  ;;  %v416_v35 = vld [vmem:[%s2967_s1 + $0xc10] sm:$0xff] }
  0xd7   :  { %1048 = vmatpush.msra.mxu0 %v350_v46  ;;  %1067 = vmatpush.msra.mxu2 %v401_v47  ;;  %v1256_v46 = vld [vmem:[%s2968_s0 + $0x38] sm:$0xff]  ;;  %v446_v47 = vld [vmem:[%s2967_s1 + $0xd00] sm:$0xff] }
  0xd8   :  { %1012 = vmatpush.msra.mxu1 %v242_v16  ;;  %1031 = vmatpush.msra.mxu3 %v293_v48  ;;  %v488_v16 = vld [vmem:[%s2967_s1 + $0xe50] sm:$0xff]  ;;  %v1139_v48 = vld [vmem:[%s2970_s3 + $0x68] sm:$0xff] }
  0xd9   :  { %1049 = vmatpush.msra.mxu0 %v347_v49  ;;  %1068 = vmatpush.msra.mxu2 %v398_v55  ;;  %v443_v49 = vld [vmem:[%s2967_s1 + $0xce8] sm:$0xff]  ;;  %v601_v55 = vadd.f32 %v600_v44, %v581_v42  ;;  %v1126_v44 = vld [vmem:[%s2970_s3] sm:$0xff] }
  0xda   :  { %1013 = vmatpush.msra.mxu1 %v239_v50  ;;  %1032 = vmatpush.msra.mxu3 %v290_v22  ;;  %v485_v50 = vld [vmem:[%s2967_s1 + $0xe38] sm:$0xff]  ;;  %v1138_v22 = vld [vmem:[%s2970_s3 + $0x60] sm:$0xff]  ;;  %v1127_v42 = vld [vmem:[%s2970_s3 + $0x8] sm:$0xff] }
  0xdb   :  { %1050 = vmatpush.msra.mxu0 %v344_v51  ;;  %1069 = vmatpush.msra.mxu2 %v395_v52  ;;  %v1157_v51 = vld [vmem:[%s2970_s3 + $0xf8] sm:$0xff]  ;;  %v620_v52 = vpop.f32.mrf.mxu0 }
  0xdc   :  { %1014 = vmatpush.msra.mxu1 %v236_v53  ;;  %1033 = vmatpush.msra.mxu3 %v287_v61  ;;  %v440_v53 = vld [vmem:[%s2967_s1 + $0xcd0] sm:$0xff] }
  0xdd   :  { %1051 = vmatpush.msra.mxu0 %v341_v54  ;;  %1070 = vmatpush.msra.mxu2 %v392_v56  ;;  %v1257_v61 = vld [vmem:[%s2968_s0 + $0x30] sm:$0xff]  ;;  %v482_v54 = vld [vmem:[%s2967_s1 + $0xe20] sm:$0xff]  ;;  %v1137_v56 = vld [vmem:[%s2970_s3 + $0x58] sm:$0xff] }
  0xde   :  { %1015 = vmatpush.msra.mxu1 %v233_v57  ;;  %1034 = vmatpush.msra.mxu3 %v284_v58  ;;  %v1156_v57 = vld [vmem:[%s2970_s3 + $0xf0] sm:$0xff]  ;;  %v437_v58 = vld [vmem:[%s2967_s1 + $0xcb8] sm:$0xff] }
  0xdf   :  { %1052 = vmatpush.msra.mxu0 %v338_v59  ;;  %1071 = vmatpush.msra.mxu2 %v389_v62  ;;  %v621_v59 = vadd.f32 %v620_v52, %v601_v55  ;;  %v479_v62 = vld [vmem:[%s2967_s1 + $0xe08] sm:$0xff] }
  0xe0   :  { %1016 = vmatpush.msra.mxu1 %v230_v63  ;;  %1035 = vmatpush.msra.mxu3 %v281_v0  ;;  %v1136_v63 = vld [vmem:[%s2970_s3 + $0x50] sm:$0xff]  ;;  %v1155_v0 = vld [vmem:[%s2970_s3 + $0xe8] sm:$0xff] }
  0xe1   :  { %1053 = vmatpush.msra.mxu0 %v335_v1  ;;  %1072 = vmatpush.msra.mxu2 %v386_v3  ;;  %v640_v1 = vpop.f32.mrf.mxu1  ;;  %v434_v3 = vld [vmem:[%s2967_s1 + $0xca0] sm:$0xff]  ;;  %v1143_v55 = vld [vmem:[%s2970_s3 + $0x88] sm:$0xff] }
  0xe2   :  { %959 = vmatmul.f32.vlgmr.msrb.gmra.mxu3 %v1250_v9  ;;  %1017 = vmatpush.msra.mxu1 %v227_v4  ;;  %v1154_v4 = vld [vmem:[%s2970_s3 + $0xe0] sm:$0xff]  ;;  %v1153_v9 = vld [vmem:[%s2970_s3 + $0xd8] sm:$0xff] }
  0xe3   :  { %1036 = vmatpush.msra.mxu3 %v278_v5  ;;  %1054 = vmatpush.msra.mxu0 %v332_v7  ;;  %v476_v5 = vld [vmem:[%s2967_s1 + $0xdf0] sm:$0xff]  ;;  %v1135_v7 = vld [vmem:[%s2970_s3 + $0x48] sm:$0xff] }
  0xe4   :  { %1073 = vmatpush.msra.mxu2 %v383_v8  ;;  %1018 = vmatpush.msra.mxu1 %v224_v10  ;;  %v431_v8 = vld [vmem:[%s2967_s1 + $0xc88] sm:$0xff]  ;;  %v641_v10 = vadd.f32 %v640_v1, %v621_v59 }
  0xe5   :  { %1037 = vmatpush.msra.mxu3 %v275_v13  ;;  %1055 = vmatpush.msra.mxu0 %v329_v14  ;;  %v473_v13 = vld [vmem:[%s2967_s1 + $0xdd8] sm:$0xff]  ;;  %v1134_v14 = vld [vmem:[%s2970_s3 + $0x40] sm:$0xff] }
  0xe6   :  { %1074 = vmatpush.msra.mxu2 %v380_v15  ;;  %939 = vmatmul.f32.vlgmr.msrb.gmra.mxu1 %v1251_v26  ;;  %v660_v15 = vpop.f32.mrf.mxu2  ;;  %v467_v26 = vld [vmem:[%s2967_s1 + $0xda8] sm:$0xff] }
  0xe7   :  { %999 = vmatmul.f32.vlgmr.msrb.gmra.mxu2 %v1252_v27  ;;  %1083 = vmatpush.msrb.mxu1 %v461_v21  ;;  %v470_v21 = vld [vmem:[%s2967_s1 + $0xdc0] sm:$0xff]  ;;  %v1132_v27 = vld [vmem:[%s2970_s3 + $0x30] sm:$0xff] }
  0xe8   :  { %1038 = vmatpush.msra.mxu3 %v272_v23  ;;  %1056 = vmatpush.msra.mxu0 %v326_v24  ;;  %v1133_v23 = vld [vmem:[%s2970_s3 + $0x38] sm:$0xff] }
  0xe9   :  { %1075 = vmatpush.msra.mxu2 %v377_v25  ;;  %1084 = vmatpush.msrb.mxu1 %v458_v11  ;;  %v425_v24 = vld [vmem:[%s2967_s1 + $0xc58] sm:$0xff]  ;;  %v661_v25 = vadd.f32 %v660_v15, %v641_v10  ;;  %v680_v11 = vpop.f32.mrf.mxu3  ;;  %v1170_v15 = vld [vmem:[%s2970_s3 + $0x160] sm:$0xff] }
  0xea   :  { %1247 = vmatpush.msk.msrb.mxu3 %vm513_vm0, %v500_v28  ;;  %1057 = vmatpush.msra.mxu0 %v323_v30  ;;  %v422_v28 = vld [vmem:[%s2967_s1 + $0xc40] sm:$0xff]  ;;  %v1131_v30 = vld [vmem:[%s2970_s3 + $0x28] sm:$0xff]  ;;  %v1173_v10 = vld [vmem:[%s2970_s3 + $0x178] sm:$0xff] }
  0xeb   :  { %1076 = vmatpush.msra.mxu2 %v374_v31  ;;  %979 = vmatmul.f32.vlgmr.msrb.gmra.mxu0 %v1253_v12  ;;  %v700_v31 = vpop.f32.mrf.mxu0 }
  0xec   :  { %1039 = vmatmul.f32.vlgmr.msra.gmra.mxu3 %v1254_v36  ;;  %1085 = vmatpush.msrb.mxu1 %v455_v33  ;;  %v1151_v33 = vld [vmem:[%s2970_s3 + $0xc8] sm:$0xff] }
  0xed   :  { %1107 = vmatpush.msrb.mxu3 %v497_v34  ;;  %1058 = vmatpush.msra.mxu0 %v320_v60  ;;  %v681_v34 = vadd.f32 %v680_v11, %v661_v25  ;;  %v1130_v60 = vld [vmem:[%s2970_s3 + $0x20] sm:$0xff]  ;;  %v1258_v36 = vld [vmem:[%s2968_s0 + $0x48] sm:$0xff]  ;;  %v1164_v25 = vld [vmem:[%s2970_s3 + $0x130] sm:$0xff]  ;;  %v505_v11 = vperm.slane %v2651_v6, 2 }
  0xee   :  { %1077 = vmatpush.msra.mxu2 %v371_v17  ;;  %1086 = vmatpush.msrb.mxu1 %v452_v37  ;;  %v1150_v17 = vld [vmem:[%s2970_s3 + $0xc0] sm:$0xff]  ;;  %v1129_v37 = vld [vmem:[%s2970_s3 + $0x18] sm:$0xff] }
  0xef   :  { %1108 = vmatpush.msrb.mxu3 %v494_v38  ;;  %1178 = vmatpush.msrb.mxu0 %v1141_v2  ;;  %v701_v12 = vadd.f32 %v700_v31, %v681_v34  ;;  %v720_v38 = vpop.f32.mrf.mxu1  ;;  %v1128_v2 = vld [vmem:[%s2970_s3 + $0x10] sm:$0xff] }
  0xf0   :  { %1078 = vmatpush.msra.mxu2 %v368_v39  ;;  %1019 = vmatmul.f32.vlgmr.msra.gmra.mxu1 %v1255_v45  ;;  %v1259_v39 = vld [vmem:[%s2968_s0 + $0x40] sm:$0xff] }
  0xf1   :  { %1079 = vmatmul.f32.vlgmr.msra.gmra.mxu2 %v1256_v46  ;;  %1087 = vmatpush.msrb.mxu1 %v449_v40  ;;  %v1148_v40 = vld [vmem:[%s2970_s3 + $0xb0] sm:$0xff]  ;;  %v1146_v45 = vld [vmem:[%s2970_s3 + $0xa0] sm:$0xff] }
  0xf2   :  { %1109 = vmatpush.msrb.mxu3 %v491_v41  ;;  %1179 = vmatpush.msrb.mxu0 %v1140_v43  ;;  %v721_v41 = vadd.f32 %v720_v38, %v701_v12  ;;  %v1147_v43 = vld [vmem:[%s2970_s3 + $0xa8] sm:$0xff] }
  0xf3   :  { %1088 = vmatpush.msrb.mxu1 %v446_v47  ;;  %1198 = vmatpush.msrb.mxu2 %v1157_v51  ;;  %v1145_v47 = vld [vmem:[%s2970_s3 + $0x98] sm:$0xff] }
  0xf4   :  { %1110 = vmatpush.msrb.mxu3 %v488_v16  ;;  %1180 = vmatpush.msrb.mxu0 %v1139_v48  ;;  %v1123_v46 = vmax.f32 %v721_v41, 0.0  ;;  %v504_v16 = vperm.slane %v2651_v6, 1  ;;  %v1158_v6 = vld [vmem:[%s2970_s3 + $0x100] sm:$0xff] }
  0xf5   :  { %1059 = vmatmul.f32.vlgmr.msra.gmra.mxu0 %v1257_v61  ;;  %1089 = vmatpush.msrb.mxu1 %v443_v49  ;;  %v1144_v49 = vld [vmem:[%s2970_s3 + $0x90] sm:$0xff] }
  0xf6   :  { %1111 = vmatpush.msrb.mxu3 %v485_v50  ;;  %1181 = vmatpush.msrb.mxu0 %v1138_v22  ;;  %v1142_v22 = vld [vmem:[%s2970_s3 + $0x80] sm:$0xff] }
  0xf7   :  { %1090 = vmatpush.msrb.mxu1 %v440_v53  ;;  %1199 = vmatpush.msrb.mxu2 %v1156_v57 }
  0xf8   :  { %1112 = vmatpush.msrb.mxu3 %v482_v54  ;;  %1182 = vmatpush.msrb.mxu0 %v1137_v56 }
  0xf9   :  { %1091 = vmatpush.msrb.mxu1 %v437_v58  ;;  %1200 = vmatpush.msrb.mxu2 %v1155_v0 }
  0xfa   :  { %1113 = vmatpush.msrb.mxu3 %v479_v62  ;;  %1183 = vmatpush.msrb.mxu0 %v1136_v63 }
  0xfb   :  { %1092 = vmatpush.msrb.mxu1 %v434_v3  ;;  %1201 = vmatpush.msrb.mxu2 %v1154_v4 }
  0xfc   :  { %1114 = vmatpush.msrb.mxu3 %v476_v5  ;;  %1184 = vmatpush.msrb.mxu0 %v1135_v7 }
  0xfd   :  { %1093 = vmatpush.msrb.mxu1 %v431_v8  ;;  %1202 = vmatpush.msrb.mxu2 %v1153_v9 }
  0xfe   :  { %1115 = vmatpush.msrb.mxu3 %v473_v13  ;;  %1185 = vmatpush.msrb.mxu0 %v1134_v14  ;;  %v1172_v13 = vld [vmem:[%s2970_s3 + $0x170] sm:$0xff]  ;;  %v1171_v14 = vld [vmem:[%s2970_s3 + $0x168] sm:$0xff] }
  0xff   :  { %1094 = vmatpush.msrb.mxu1 %v428_v18  ;;  %1203 = vmatpush.msrb.mxu2 %v1152_v20  ;;  %v1169_v18 = vld [vmem:[%s2970_s3 + $0x158] sm:$0xff]  ;;  %v1168_v20 = vld [vmem:[%s2970_s3 + $0x150] sm:$0xff] }
 0x100   :  { %1116 = vmatpush.msrb.mxu3 %v470_v21  ;;  %1186 = vmatpush.msrb.mxu0 %v1133_v23  ;;  %v1167_v21 = vld [vmem:[%s2970_s3 + $0x148] sm:$0xff]  ;;  %v1166_v23 = vld [vmem:[%s2970_s3 + $0x140] sm:$0xff] }
 0x101   :  { %1095 = vmatpush.msrb.mxu1 %v425_v24  ;;  %1204 = vmatpush.msrb.mxu2 %v1151_v33  ;;  %v1165_v24 = vld [vmem:[%s2970_s3 + $0x138] sm:$0xff]  ;;  %v1159_v33 = vld [vmem:[%s2970_s3 + $0x108] sm:$0xff] }
 0x102   :  { %1117 = vmatpush.msrb.mxu3 %v467_v26  ;;  %1187 = vmatpush.msrb.mxu0 %v1132_v27  ;;  %v1163_v26 = vld [vmem:[%s2970_s3 + $0x128] sm:$0xff]  ;;  %v1162_v27 = vld [vmem:[%s2970_s3 + $0x120] sm:$0xff] }
 0x103   :  { %1096 = vmatpush.msrb.mxu1 %v422_v28  ;;  %1205 = vmatpush.msrb.mxu2 %v1150_v17 }
 0x104   :  { %1118 = vmatpush.msrb.mxu3 %v464_v29  ;;  %1188 = vmatpush.msrb.mxu0 %v1131_v30  ;;  %v1161_v29 = vld [vmem:[%s2970_s3 + $0x118] sm:$0xff]  ;;  %v1160_v30 = vld [vmem:[%s2970_s3 + $0x110] sm:$0xff] }
 0x105   :  { %1248 = vmatmul.msk.f32.vlgmr.msrb.gmra.mxu3 %vm509_vm1, %v1258_v36  ;;  %1097 = vmatpush.msrb.mxu1 %v419_v32 }
 0x106   :  { %1189 = vmatpush.msrb.mxu0 %v1130_v60  ;;  %1206 = vmatpush.msrb.mxu2 %v1149_v19 }
 0x107   :  { %1098 = vmatpush.msrb.mxu1 %v416_v35  ;;  %1218 = vmatpush.msra.mxu3 %v1173_v10 }
 0x108   :  { %1190 = vmatpush.msrb.mxu0 %v1129_v37  ;;  %1099 = vmatmul.f32.vlgmr.msrb.gmra.mxu1 %v1259_v39 }
 0x109   :  { %1207 = vmatpush.msrb.mxu2 %v1148_v40  ;;  %1219 = vmatpush.msra.mxu3 %v1172_v13 }
 0x10a   :  { %1191 = vmatpush.msrb.mxu0 %v1128_v2  ;;  %v740_v48 = vpop.f32.mrf.mxu2 }
 0x10b   :  { %1208 = vmatpush.msrb.mxu2 %v1147_v43  ;;  %v741_v50 = vadd.f32 %v740_v48, %v504_v16  ;;  %1220 = vmatpush.msra.mxu3 %v1171_v14 }
 0x10c   :  { %1192 = vmatpush.msrb.mxu0 %v1127_v42 }
 0x10d   :  { %1209 = vmatpush.msrb.mxu2 %v1146_v45  ;;  %v760_v51 = vpop.f32.mrf.mxu3  ;;  %1221 = vmatpush.msra.mxu3 %v1170_v15 }
 0x10e   :  { %1193 = vmatpush.msrb.mxu0 %v1126_v44  ;;  %v761_v52 = vadd.f32 %v760_v51, %v741_v50 }
 0x10f   :  { %1194 = vmatmul.f32.vlgmr.msrb.gmra.mxu0 %v1123_v46  ;;  %1210 = vmatpush.msrb.mxu2 %v1145_v47  ;;  %v1249_v47 = vld [vmem:[%s2971_s4] ss:$0 sm:$0xff] }
 0x110   :  { %v780_v53 = vpop.f32.mrf.mxu1  ;;  %1222 = vmatpush.msra.mxu3 %v1169_v18 }
 0x111   :  { %1211 = vmatpush.msrb.mxu2 %v1144_v49  ;;  %v781_v61 = vadd.f32 %v780_v53, %v761_v52 }
 0x112   :  { %1223 = vmatpush.msra.mxu3 %v1168_v20 }
 0x113   :  { %1212 = vmatpush.msrb.mxu2 %v1143_v55  ;;  %v800_v54 = vpop.f32.mrf.mxu0  ;;  %v820_v57 = vpop.f32.mrf.mxu2 }
 0x114   :  { %v801_v56 = vadd.f32 %v800_v54, %v781_v61  ;;  %1224 = vmatpush.msra.mxu3 %v1167_v21 }
 0x115   :  { %1213 = vmatpush.msrb.mxu2 %v1142_v22 }
 0x116   :  { %v821_v58 = vadd.f32 %v820_v57, %v801_v56  ;;  %v840_v59 = vpop.f32.mrf.mxu3  ;;  %1225 = vmatpush.msra.mxu3 %v1166_v23 }
 0x118   :  { %v841_v63 = vadd.f32 %v840_v59, %v821_v58  ;;  %1226 = vmatpush.msra.mxu3 %v1165_v24 }
 0x11a   :  { %1227 = vmatpush.msra.mxu3 %v1164_v25 }
 0x11c   :  { %1228 = vmatpush.msra.mxu3 %v1163_v26 }
 0x11e   :  { %1229 = vmatpush.msra.mxu3 %v1162_v27 }
 0x120   :  { %1230 = vmatpush.msra.mxu3 %v1161_v29 }
 0x121   :  { %v860_v62 = vpop.f32.mrf.mxu1 }
 0x122   :  { %v861_v1 = vadd.f32 %v860_v62, %v841_v63  ;;  %1231 = vmatpush.msra.mxu3 %v1160_v30 }
 0x124   :  { %1232 = vmatpush.msra.mxu3 %v1159_v33 }
 0x126   :  { %1233 = vmatpush.msra.mxu3 %v1158_v6 }
 0x128   :  { %v880_v0 = vpop.f32.mrf.mxu0 }
 0x129   :  { %v881_v3 = vadd.f32 %v880_v0, %v861_v1 }
 0x12e   :  { %v900_v4 = vpop.f32.mrf.mxu2 }
 0x12f   :  { %v901_v5 = vadd.f32 %v900_v4, %v881_v3 }
 0x130   :  { %v920_v7 = vpop.f32.mrf.mxu3 }
 0x131   :  { %v921_v8 = vadd.f32 %v920_v7, %v901_v5 }
 0x133   :  { %v1124_v9 = vmax.f32 %v921_v8, 0.0 }
 0x135   :  { %1214 = vmatmul.f32.vlgmr.msrb.gmra.mxu2 %v1124_v9 }
 0x163   :  { %v940_v28 = vpop.f32.mrf.mxu1 }
 0x164   :  { %v941_v31 = vadd.f32 %v940_v28, %v505_v11 }
 0x165   :  { %v960_v32 = vpop.f32.mrf.mxu3 }
 0x166   :  { %v961_v34 = vadd.f32 %v960_v32, %v941_v31 }
 0x168   :  { %v980_v60 = vpop.f32.mrf.mxu0 }
 0x169   :  { %v981_v17 = vadd.f32 %v980_v60, %v961_v34 }
 0x16a   :  { %v1000_v35 = vpop.f32.mrf.mxu2 }
 0x16b   :  { %v1001_v12 = vadd.f32 %v1000_v35, %v981_v17 }
 0x16d   :  { %v1020_v36 = vpop.f32.mrf.mxu1 }
 0x16e   :  { %v1021_v37 = vadd.f32 %v1020_v36, %v1001_v12 }
 0x16f   :  { %v1040_v38 = vpop.f32.mrf.mxu3 }
 0x170   :  { %v1041_v19 = vadd.f32 %v1040_v38, %v1021_v37 }
 0x172   :  { %v1060_v2 = vpop.f32.mrf.mxu0 }
 0x173   :  { %v1061_v39 = vadd.f32 %v1060_v2, %v1041_v19 }
 0x174   :  { %v1080_v40 = vpop.f32.mrf.mxu2 }
 0x175   :  { %v1081_v41 = vadd.f32 %v1080_v40, %v1061_v39 }
 0x185   :  { %v1100_v42 = vpop.f32.mrf.mxu1 }
 0x186   :  { %v1101_v43 = vadd.f32 %v1100_v42, %v1081_v41 }
 0x188   :  { %v1120_v44 = vpop.f32.mrf.mxu3 }
 0x189   :  { %v1121_v45 = vadd.f32 %v1120_v44, %v1101_v43 }
 0x18b   :  { %v1125_v46 = vmax.f32 %v1121_v45, 0.0 }
 0x18c   :  { %v1195_v16 = vpop.f32.mrf.mxu0 }
 0x18d   :  { %1234 = vmatmul.f32.vlgmr.msra.gmra.mxu3 %v1125_v46  ;;  %v1196_v49 = vadd.f32 %v1249_v47, %v1195_v16 }
 0x1b8   :  { %v1215_v48 = vpop.f32.mrf.mxu2 }
 0x1b9   :  { %v1216_v55 = vadd.f32 %v1215_v48, %v1196_v49 }
 0x210   :  { %v1235_v50 = vpop.f32.mrf.mxu3 }
 0x211   :  { %v1236_v22 = vadd.f32 %v1235_v50, %v1216_v55 }
 0x213   :  { %1238 = vst [vmem:[%s2972_s5] sm:$0xff] %v1236_v22 }

</bundles_post_ra>
